<compile_context>
chip_gen: v7x
topology: tpu7x:2x2x1
jax: 0.10.0
libtpu: 0.0.40
codegen_flags: <defaults>
</compile_context>

<pallas_src>
import numpy as np
import jax
import jax.numpy as jnp
from jax.experimental import pallas as pl
from jax.experimental.pallas import tpu as pltpu


def _round_up(x, m):
    return ((x + m - 1) // m) * m


# ---------------------------------------------------------------------------
# Fused kernel: encoder LSTM -> teacher-forced decoder LSTM -> Linear (batch=1)
# ---------------------------------------------------------------------------
def seq2seq_kernel(enc_x_ref, dec_x_ref, enc_w_ref, enc_b_ref,
                   dec_w_hbm, dec_b_hbm, out_w_hbm, out_b_hbm,
                   pred_ref,
                   dec_w_vmem, dec_b_vmem, out_w_vmem, out_b_vmem, sems):
    """Layout: gate g of each LSTM weight lives in lanes [g*Hp, (g+1)*Hp) of a
    [2*Hp, 4*Hp] bf16 slab (rows 0:Hp = W_ih^T, rows Hp:2Hp = W_hh^T)."""
    Hp = enc_w_ref.shape[0] // 2
    T_enc = enc_x_ref.shape[0]
    T_dec = dec_x_ref.shape[0]
    bf16 = jnp.bfloat16

    # Decoder-side / output weights start in HBM (pl.ANY).  Kick their DMAs
    # off immediately so they land while the encoder recurrence runs.
    cp_dw = pltpu.make_async_copy(dec_w_hbm, dec_w_vmem, sems.at[0])
    cp_db = pltpu.make_async_copy(dec_b_hbm, dec_b_vmem, sems.at[1])
    cp_ow = pltpu.make_async_copy(out_w_hbm, out_w_vmem, sems.at[2])
    cp_ob = pltpu.make_async_copy(out_b_hbm, out_b_vmem, sems.at[3])
    cp_dw.start(); cp_db.start(); cp_ow.start(); cp_ob.start()

    def sigmoid(x):
        # one EUP push (tanh) instead of dependent exp + reciprocal
        return 0.5 * (jnp.tanh(0.5 * x) + 1.0)

    def lstm_cell(pre, c):
        # PyTorch gate order (i, f, g, o); each gate is a lane-aligned 128-lane block.
        i = sigmoid(pre[:, 0 * Hp:1 * Hp])
        f = sigmoid(pre[:, 1 * Hp:2 * Hp])
        g = jnp.tanh(pre[:, 2 * Hp:3 * Hp])
        o = sigmoid(pre[:, 3 * Hp:4 * Hp])
        c_new = f * c + i * g
        h_new = o * jnp.tanh(c_new)
        return h_new, c_new

    # Encoder input projection for the whole sequence up front (off the serial
    # critical path).  bf16 x bf16 -> f32 accumulate on the MXU.
    xg_e = jnp.dot(enc_x_ref[...].astype(bf16), enc_w_ref[0:Hp, :],
                   preferred_element_type=jnp.float32) + enc_b_ref[...]

    h = jnp.zeros((1, Hp), jnp.float32)
    c = jnp.zeros((1, Hp), jnp.float32)

    # -------- encoder recurrence: fully unrolled, static slices only --------
    for t in range(T_enc):
        pre = xg_e[t:t + 1, :] + jnp.dot(h.astype(bf16), enc_w_ref[Hp:2 * Hp, :],
                                         preferred_element_type=jnp.float32)
        h, c = lstm_cell(pre, c)

    # Decoder weights must have landed by now (DMA hidden under encoder).
    cp_dw.wait()
    cp_db.wait()

    # Decoder input projection; the model applies ReLU to teacher-forced inputs.
    xg_d = jnp.dot(jnp.maximum(dec_x_ref[...], 0.0).astype(bf16),
                   dec_w_vmem[0:Hp, :],
                   preferred_element_type=jnp.float32) + dec_b_vmem[...]

    # -------- decoder recurrence (teacher forcing): fully unrolled --------
    hs = []
    for t in range(T_dec):
        pre = xg_d[t:t + 1, :] + jnp.dot(h.astype(bf16), dec_w_vmem[Hp:2 * Hp, :],
                                         preferred_element_type=jnp.float32)
        h, c = lstm_cell(pre, c)
        hs.append(h)
    dec_h = jnp.concatenate(hs, axis=0)          # [T_dec, Hp], stays in vregs

    cp_ow.wait()
    cp_ob.wait()

    # Output projection: lane-dense (Vp multiple of 128) unmasked full store.
    pred_ref[...] = jnp.dot(dec_h.astype(bf16), out_w_vmem[...],
                            preferred_element_type=jnp.float32) + out_b_vmem[...]


# ---------------------------------------------------------------------------
# Parameters (PyTorch-like) and one-time device-side packing
# ---------------------------------------------------------------------------
def init_params(key, vocab_size, hidden_dim):
    H = hidden_dim
    k = jax.random.split(key, 11)
    bound = 1.0 / np.sqrt(H)
    u = lambda kk, shape: jax.random.uniform(kk, shape, jnp.float32, -bound, bound)
    return {
        "embedding": jax.random.normal(k[0], (vocab_size, H), jnp.float32),
        # LSTM weights stored as [H, 4H] (already transposed), biases as [1, 4H]
        "wi_enc": u(k[1], (H, 4 * H)),
        "wh_enc": u(k[2], (H, 4 * H)),
        "b_enc":  u(k[3], (1, 4 * H)) + u(k[4], (1, 4 * H)),  # b_ih + b_hh
        "wi_dec": u(k[5], (H, 4 * H)),
        "wh_dec": u(k[6], (H, 4 * H)),
        "b_dec":  u(k[7], (1, 4 * H)) + u(k[8], (1, 4 * H)),
        "w_out":  u(k[9], (H, vocab_size)),
        "b_out":  u(k[10], (1, vocab_size)),
    }


def _pack_lstm(wi, wh, b, H, Hp):
    """[H,4H] wi/wh + [1,4H] bias -> gate-per-128-lane slab [2Hp,4Hp] (bf16)
    and padded bias [1,4Hp] (f32)."""
    slab = jnp.zeros((2 * Hp, 4 * Hp), jnp.float32)
    b_p = jnp.zeros((1, 4 * Hp), jnp.float32)
    for g in range(4):
        slab = slab.at[:H, g * Hp:g * Hp + H].set(wi[:, g * H:(g + 1) * H])
        slab = slab.at[Hp:Hp + H, g * Hp:g * Hp + H].set(wh[:, g * H:(g + 1) * H])
        b_p = b_p.at[:, g * Hp:g * Hp + H].set(b[:, g * H:(g + 1) * H])
    return slab.astype(jnp.bfloat16), b_p


def prepare_params(params):
    """One-time packing: padding, gate-per-128-lane layout, bf16 weight cast."""
    H = params["embedding"].shape[1]
    V = params["w_out"].shape[1]
    Hp = _round_up(H, 128)
    Vp = _round_up(V, 128)
    enc_w, enc_b = _pack_lstm(params["wi_enc"], params["wh_enc"], params["b_enc"], H, Hp)
    dec_w, dec_b = _pack_lstm(params["wi_dec"], params["wh_dec"], params["b_dec"], H, Hp)
    out_w = jnp.zeros((Hp, Vp), jnp.float32).at[:H, :V].set(params["w_out"]).astype(jnp.bfloat16)
    out_b = jnp.zeros((1, Vp), jnp.float32).at[:, :V].set(params["b_out"])
    emb_p = jnp.zeros((params["embedding"].shape[0], Hp), jnp.float32).at[:, :H].set(params["embedding"])
    prep = {"enc_w": enc_w, "enc_b": enc_b, "dec_w": dec_w, "dec_b": dec_b,
            "out_w": out_w, "out_b": out_b, "emb_p": emb_p}
    return jax.tree_util.tree_map(jax.block_until_ready, prep)


# ---------------------------------------------------------------------------
# Forward (teacher-forcing branch)
# ---------------------------------------------------------------------------
def build_forward(vocab_size):
    V = vocab_size

    @jax.jit
    def forward(prep, input_ids, gold_ids):
        emb_p = prep["emb_p"]
        Hp = emb_p.shape[1]
        Vp = prep["out_b"].shape[1]

        # Glue: embedding lookups + teacher-forcing input construction
        # (already lane-padded since the embedding table is padded at init).
        enc_x = emb_p[input_ids]                                          # [T_in, Hp]
        dec_x = jnp.concatenate(
            [jnp.zeros((1, Hp), jnp.float32), emb_p[gold_ids[:-1]]], 0)   # [T_g, Hp]
        T_dec = dec_x.shape[0]

        preds_p = pl.pallas_call(
            seq2seq_kernel,
            out_shape=jax.ShapeDtypeStruct((T_dec, Vp), jnp.float32),
            in_specs=[
                pl.BlockSpec(memory_space=pltpu.MemorySpace.VMEM),  # enc_x
                pl.BlockSpec(memory_space=pltpu.MemorySpace.VMEM),  # dec_x
                pl.BlockSpec(memory_space=pltpu.MemorySpace.VMEM),  # enc_w slab
                pl.BlockSpec(memory_space=pltpu.MemorySpace.VMEM),  # enc_b
                pl.BlockSpec(memory_space=pl.ANY),                  # dec_w slab (HBM)
                pl.BlockSpec(memory_space=pl.ANY),                  # dec_b     (HBM)
                pl.BlockSpec(memory_space=pl.ANY),                  # out_w     (HBM)
                pl.BlockSpec(memory_space=pl.ANY),                  # out_b     (HBM)
            ],
            out_specs=pl.BlockSpec(memory_space=pltpu.MemorySpace.VMEM),
            scratch_shapes=[
                pltpu.VMEM(prep["dec_w"].shape, jnp.bfloat16),
                pltpu.VMEM(prep["dec_b"].shape, jnp.float32),
                pltpu.VMEM(prep["out_w"].shape, jnp.bfloat16),
                pltpu.VMEM(prep["out_b"].shape, jnp.float32),
                pltpu.SemaphoreType.DMA((4,)),
            ],
        )(enc_x, dec_x, prep["enc_w"], prep["enc_b"],
          prep["dec_w"], prep["dec_b"], prep["out_w"], prep["out_b"])

        preds = preds_p[:, :V]
        idxs = jnp.argmax(preds, axis=1)
        return preds, idxs

    return forward


# ---------------------------------------------------------------------------
# Pure-JAX references
# ---------------------------------------------------------------------------
def forward_reference_f32(params, input_seq, gold_seq):
    """True module semantics, all f32 (loose check: bf16 weight rounding only)."""
    emb = params["embedding"]
    H = emb.shape[1]

    def lstm_seq(xs, wi, wh, b, h, c):
        outs = []
        for t in range(xs.shape[0]):
            pre = xs[t:t + 1] @ wi + b + h @ wh
            i = jax.nn.sigmoid(pre[:, 0:H])
            f = jax.nn.sigmoid(pre[:, H:2 * H])
            g = jnp.tanh(pre[:, 2 * H:3 * H])
            o = jax.nn.sigmoid(pre[:, 3 * H:4 * H])
            c = f * c + i * g
            h = o * jnp.tanh(c)
            outs.append(h)
        return jnp.concatenate(outs, 0), h, c

    enc_x = emb[jnp.asarray(input_seq, jnp.int32)]
    dec_x = jnp.concatenate(
        [jnp.zeros((1, H), jnp.float32), emb[jnp.asarray(gold_seq[:-1], jnp.int32)]], 0)
    dec_x = jnp.maximum(dec_x, 0.0)
    h0 = jnp.zeros((1, H), jnp.float32)
    c0 = jnp.zeros((1, H), jnp.float32)
    _, h, c = lstm_seq(enc_x, params["wi_enc"], params["wh_enc"], params["b_enc"], h0, c0)
    dec_out, _, _ = lstm_seq(dec_x, params["wi_dec"], params["wh_dec"], params["b_dec"], h, c)
    return dec_out @ params["w_out"] + params["b_out"]


def forward_reference_bf16(params, input_seq, gold_seq):
    """Numerics-matched reference (bf16 weights/activations at the dots,
    f32 accumulation, tanh-based sigmoid) — tight check for layout/padding bugs."""
    emb = params["embedding"]
    H = emb.shape[1]
    bf = jnp.bfloat16
    sig = lambda x: 0.5 * (jnp.tanh(0.5 * x) + 1.0)
    dot = lambda a, b: jnp.dot(a.astype(bf), b.astype(bf),
                               preferred_element_type=jnp.float32)

    def lstm_seq(xs, wi, wh, b, h, c):
        xg = dot(xs, wi) + b
        outs = []
        for t in range(xs.shape[0]):
            pre = xg[t:t + 1] + dot(h, wh)
            i = sig(pre[:, 0:H])
            f = sig(pre[:, H:2 * H])
            g = jnp.tanh(pre[:, 2 * H:3 * H])
            o = sig(pre[:, 3 * H:4 * H])
            c = f * c + i * g
            h = o * jnp.tanh(c)
            outs.append(h)
        return jnp.concatenate(outs, 0), h, c

    enc_x = emb[jnp.asarray(input_seq, jnp.int32)]
    dec_x = jnp.concatenate(
        [jnp.zeros((1, H), jnp.float32), emb[jnp.asarray(gold_seq[:-1], jnp.int32)]], 0)
    dec_x = jnp.maximum(dec_x, 0.0)
    h0 = jnp.zeros((1, H), jnp.float32)
    c0 = jnp.zeros((1, H), jnp.float32)
    _, h, c = lstm_seq(enc_x, params["wi_enc"], params["wh_enc"], params["b_enc"], h0, c0)
    dec_out, _, _ = lstm_seq(dec_x, params["wi_dec"], params["wh_dec"], params["b_dec"], h, c)
    return dot(dec_out, params["w_out"]) + params["b_out"]


if __name__ == "__main__":
    vocab_size = 20
    hidden_dim = 32
    seq_len = 8

    key = jax.random.PRNGKey(0)
    pkey, ikey, gkey = jax.random.split(key, 3)
    params = init_params(pkey, vocab_size, hidden_dim)
    prep = prepare_params(params)          # one-time pad/pack/bf16 cast (hoisted out of forward)

    input_seq = np.array(jax.random.randint(ikey, (seq_len,), 0, vocab_size))
    gold_seq = np.array(jax.random.randint(gkey, (seq_len,), 0, vocab_size))

    fwd = build_forward(vocab_size)
    preds, idxs = fwd(prep, jnp.asarray(input_seq, jnp.int32), jnp.asarray(gold_seq, jnp.int32))
    preds = jax.block_until_ready(preds)
    idxs = jax.block_until_ready(idxs)
    predicted_list = list(np.array(idxs))  # matches `list(np.array(idxs))` in the torch code

    assert preds.shape == (seq_len, vocab_size)
    assert len(predicted_list) == seq_len

    # Tight check vs numerics-matched (bf16-weight) reference: catches layout/padding bugs.
    ref_bf16 = np.array(forward_reference_bf16(params, input_seq, gold_seq))
    assert np.allclose(np.array(preds), ref_bf16, atol=1e-3, rtol=1e-3), \
        "mismatch vs bf16-matched reference"

    # Loose sanity check vs true f32 module semantics (difference = bf16 weight rounding).
    ref_f32 = np.array(forward_reference_f32(params, input_seq, gold_seq))
    assert np.allclose(np.array(preds), ref_f32, atol=1e-1, rtol=1e-1), \
        "mismatch vs f32 reference"

    print("KERNEL_OK")
</pallas_src>

<mosaic_0001>
module attributes {stable_mosaic.version = 11 : i64} {
  func.func @seq2seq_kernel(%arg0: memref<8x128xf32, #tpu.memory_space<vmem>>, %arg1: memref<8x128xf32, #tpu.memory_space<vmem>>, %arg2: memref<256x512xbf16, #tpu.memory_space<vmem>>, %arg3: memref<1x512xf32, #tpu.memory_space<vmem>>, %arg4: memref<256x512xbf16, #tpu.memory_space<any>>, %arg5: memref<1x512xf32, #tpu.memory_space<any>>, %arg6: memref<128x128xbf16, #tpu.memory_space<any>>, %arg7: memref<1x128xf32, #tpu.memory_space<any>>, %arg8: memref<8x128xf32, #tpu.memory_space<vmem>>, %arg9: memref<256x512xbf16, #tpu.memory_space<vmem>>, %arg10: memref<1x512xf32, #tpu.memory_space<vmem>>, %arg11: memref<128x128xbf16, #tpu.memory_space<vmem>>, %arg12: memref<1x128xf32, #tpu.memory_space<vmem>>, %arg13: memref<4x!tpu.dma_semaphore, #tpu.memory_space<semaphore_mem>>) attributes {dimension_semantics = [], scalar_prefetch = 0 : i64, scratch_operands = 5 : i64, tpu.core_type = #tpu.core_type<tc>} {
    %c0_i32 = arith.constant 0 : i32
    %0 = tpu.memref_slice %arg13[%c0_i32] : memref<4x!tpu.dma_semaphore, #tpu.memory_space<semaphore_mem>> -> memref<1x!tpu.dma_semaphore, #tpu.memory_space<semaphore_mem>>
    %1 = tpu.memref_squeeze %0 : memref<1x!tpu.dma_semaphore, #tpu.memory_space<semaphore_mem>> -> memref<!tpu.dma_semaphore, #tpu.memory_space<semaphore_mem>>
    tpu.enqueue_dma source(%arg4 : memref<256x512xbf16, #tpu.memory_space<any>>) target(%arg9 : memref<256x512xbf16, #tpu.memory_space<vmem>>) target_semaphore(%1 : memref<!tpu.dma_semaphore, #tpu.memory_space<semaphore_mem>>)
    %c1_i32 = arith.constant 1 : i32
    %2 = tpu.memref_slice %arg13[%c1_i32] : memref<4x!tpu.dma_semaphore, #tpu.memory_space<semaphore_mem>> -> memref<1x!tpu.dma_semaphore, #tpu.memory_space<semaphore_mem>>
    %3 = tpu.memref_squeeze %2 : memref<1x!tpu.dma_semaphore, #tpu.memory_space<semaphore_mem>> -> memref<!tpu.dma_semaphore, #tpu.memory_space<semaphore_mem>>
    tpu.enqueue_dma source(%arg5 : memref<1x512xf32, #tpu.memory_space<any>>) target(%arg10 : memref<1x512xf32, #tpu.memory_space<vmem>>) target_semaphore(%3 : memref<!tpu.dma_semaphore, #tpu.memory_space<semaphore_mem>>)
    %c2_i32 = arith.constant 2 : i32
    %4 = tpu.memref_slice %arg13[%c2_i32] : memref<4x!tpu.dma_semaphore, #tpu.memory_space<semaphore_mem>> -> memref<1x!tpu.dma_semaphore, #tpu.memory_space<semaphore_mem>>
    %5 = tpu.memref_squeeze %4 : memref<1x!tpu.dma_semaphore, #tpu.memory_space<semaphore_mem>> -> memref<!tpu.dma_semaphore, #tpu.memory_space<semaphore_mem>>
    tpu.enqueue_dma source(%arg6 : memref<128x128xbf16, #tpu.memory_space<any>>) target(%arg11 : memref<128x128xbf16, #tpu.memory_space<vmem>>) target_semaphore(%5 : memref<!tpu.dma_semaphore, #tpu.memory_space<semaphore_mem>>)
    %c3_i32 = arith.constant 3 : i32
    %6 = tpu.memref_slice %arg13[%c3_i32] : memref<4x!tpu.dma_semaphore, #tpu.memory_space<semaphore_mem>> -> memref<1x!tpu.dma_semaphore, #tpu.memory_space<semaphore_mem>>
    %7 = tpu.memref_squeeze %6 : memref<1x!tpu.dma_semaphore, #tpu.memory_space<semaphore_mem>> -> memref<!tpu.dma_semaphore, #tpu.memory_space<semaphore_mem>>
    tpu.enqueue_dma source(%arg7 : memref<1x128xf32, #tpu.memory_space<any>>) target(%arg12 : memref<1x128xf32, #tpu.memory_space<vmem>>) target_semaphore(%7 : memref<!tpu.dma_semaphore, #tpu.memory_space<semaphore_mem>>)
    %c0 = arith.constant 0 : index
    %c0_0 = arith.constant 0 : index
    %8 = vector.load %arg0[%c0, %c0_0] : memref<8x128xf32, #tpu.memory_space<vmem>>, vector<8x128xf32>
    %9 = arith.truncf %8 : vector<8x128xf32> to vector<8x128xbf16>
    %c0_1 = arith.constant 0 : index
    %c0_2 = arith.constant 0 : index
    %10 = vector.load %arg2[%c0_1, %c0_2] : memref<256x512xbf16, #tpu.memory_space<vmem>>, vector<128x512xbf16>
    %cst = arith.constant dense<0.000000e+00> : vector<8x512xf32>
    %11 = tpu.matmul %9, %10, %cst {dimension_numbers = #tpu.dot_dimension_numbers<[1], [0], [0], [1], [0, 0, 1, 1], [], []>} : vector<8x128xbf16>, vector<128x512xbf16>, vector<8x512xf32> -> vector<8x512xf32>
    %c0_3 = arith.constant 0 : index
    %c0_4 = arith.constant 0 : index
    %12 = vector.load %arg3[%c0_3, %c0_4] : memref<1x512xf32, #tpu.memory_space<vmem>>, vector<1x512xf32>
    %13 = vector.broadcast %12 : vector<1x512xf32> to vector<8x512xf32>
    %14 = arith.addf %11, %13 : vector<8x512xf32>
    %cst_5 = arith.constant 0.000000e+00 : f32
    %15 = vector.broadcast %cst_5 : f32 to vector<1x128xf32>
    %cst_6 = arith.constant 0.000000e+00 : f32
    %16 = vector.broadcast %cst_6 : f32 to vector<1x128xf32>
    %17 = vector.extract_strided_slice %14 {offsets = [0, 0], sizes = [1, 512], strides = [1, 1]} : vector<8x512xf32> to vector<1x512xf32>
    %18 = arith.truncf %15 : vector<1x128xf32> to vector<1x128xbf16>
    %c128 = arith.constant 128 : index
    %c0_7 = arith.constant 0 : index
    %19 = vector.load %arg2[%c128, %c0_7] : memref<256x512xbf16, #tpu.memory_space<vmem>>, vector<128x512xbf16>
    %cst_8 = arith.constant dense<0.000000e+00> : vector<1x512xf32>
    %20 = tpu.matmul %18, %19, %cst_8 {dimension_numbers = #tpu.dot_dimension_numbers<[1], [0], [0], [1], [0, 0, 1, 1], [], []>} : vector<1x128xbf16>, vector<128x512xbf16>, vector<1x512xf32> -> vector<1x512xf32>
    %21 = arith.addf %17, %20 : vector<1x512xf32>
    %22 = vector.extract_strided_slice %21 {offsets = [0, 0], sizes = [1, 128], strides = [1, 1]} : vector<1x512xf32> to vector<1x128xf32>
    %cst_9 = arith.constant 5.000000e-01 : f32
    %23 = vector.broadcast %cst_9 : f32 to vector<1x128xf32>
    %24 = arith.mulf %23, %22 : vector<1x128xf32>
    %25 = math.tanh %24 : vector<1x128xf32>
    %cst_10 = arith.constant 1.000000e+00 : f32
    %26 = vector.broadcast %cst_10 : f32 to vector<1x128xf32>
    %27 = arith.addf %25, %26 : vector<1x128xf32>
    %cst_11 = arith.constant 5.000000e-01 : f32
    %28 = vector.broadcast %cst_11 : f32 to vector<1x128xf32>
    %29 = arith.mulf %28, %27 : vector<1x128xf32>
    %30 = vector.extract_strided_slice %21 {offsets = [0, 128], sizes = [1, 128], strides = [1, 1]} : vector<1x512xf32> to vector<1x128xf32>
    %cst_12 = arith.constant 5.000000e-01 : f32
    %31 = vector.broadcast %cst_12 : f32 to vector<1x128xf32>
    %32 = arith.mulf %31, %30 : vector<1x128xf32>
    %33 = math.tanh %32 : vector<1x128xf32>
    %cst_13 = arith.constant 1.000000e+00 : f32
    %34 = vector.broadcast %cst_13 : f32 to vector<1x128xf32>
    %35 = arith.addf %33, %34 : vector<1x128xf32>
    %cst_14 = arith.constant 5.000000e-01 : f32
    %36 = vector.broadcast %cst_14 : f32 to vector<1x128xf32>
    %37 = arith.mulf %36, %35 : vector<1x128xf32>
    %38 = vector.extract_strided_slice %21 {offsets = [0, 256], sizes = [1, 128], strides = [1, 1]} : vector<1x512xf32> to vector<1x128xf32>
    %39 = math.tanh %38 : vector<1x128xf32>
    %40 = vector.extract_strided_slice %21 {offsets = [0, 384], sizes = [1, 128], strides = [1, 1]} : vector<1x512xf32> to vector<1x128xf32>
    %cst_15 = arith.constant 5.000000e-01 : f32
    %41 = vector.broadcast %cst_15 : f32 to vector<1x128xf32>
    %42 = arith.mulf %41, %40 : vector<1x128xf32>
    %43 = math.tanh %42 : vector<1x128xf32>
    %cst_16 = arith.constant 1.000000e+00 : f32
    %44 = vector.broadcast %cst_16 : f32 to vector<1x128xf32>
    %45 = arith.addf %43, %44 : vector<1x128xf32>
    %cst_17 = arith.constant 5.000000e-01 : f32
    %46 = vector.broadcast %cst_17 : f32 to vector<1x128xf32>
    %47 = arith.mulf %46, %45 : vector<1x128xf32>
    %48 = arith.mulf %37, %16 : vector<1x128xf32>
    %49 = arith.mulf %29, %39 : vector<1x128xf32>
    %50 = arith.addf %48, %49 : vector<1x128xf32>
    %51 = math.tanh %50 : vector<1x128xf32>
    %52 = arith.mulf %47, %51 : vector<1x128xf32>
    %53 = vector.extract_strided_slice %14 {offsets = [1, 0], sizes = [1, 512], strides = [1, 1]} : vector<8x512xf32> to vector<1x512xf32>
    %54 = arith.truncf %52 : vector<1x128xf32> to vector<1x128xbf16>
    %c128_18 = arith.constant 128 : index
    %c0_19 = arith.constant 0 : index
    %55 = vector.load %arg2[%c128_18, %c0_19] : memref<256x512xbf16, #tpu.memory_space<vmem>>, vector<128x512xbf16>
    %cst_20 = arith.constant dense<0.000000e+00> : vector<1x512xf32>
    %56 = tpu.matmul %54, %55, %cst_20 {dimension_numbers = #tpu.dot_dimension_numbers<[1], [0], [0], [1], [0, 0, 1, 1], [], []>} : vector<1x128xbf16>, vector<128x512xbf16>, vector<1x512xf32> -> vector<1x512xf32>
    %57 = arith.addf %53, %56 : vector<1x512xf32>
    %58 = vector.extract_strided_slice %57 {offsets = [0, 0], sizes = [1, 128], strides = [1, 1]} : vector<1x512xf32> to vector<1x128xf32>
    %cst_21 = arith.constant 5.000000e-01 : f32
    %59 = vector.broadcast %cst_21 : f32 to vector<1x128xf32>
    %60 = arith.mulf %59, %58 : vector<1x128xf32>
    %61 = math.tanh %60 : vector<1x128xf32>
    %cst_22 = arith.constant 1.000000e+00 : f32
    %62 = vector.broadcast %cst_22 : f32 to vector<1x128xf32>
    %63 = arith.addf %61, %62 : vector<1x128xf32>
    %cst_23 = arith.constant 5.000000e-01 : f32
    %64 = vector.broadcast %cst_23 : f32 to vector<1x128xf32>
    %65 = arith.mulf %64, %63 : vector<1x128xf32>
    %66 = vector.extract_strided_slice %57 {offsets = [0, 128], sizes = [1, 128], strides = [1, 1]} : vector<1x512xf32> to vector<1x128xf32>
    %cst_24 = arith.constant 5.000000e-01 : f32
    %67 = vector.broadcast %cst_24 : f32 to vector<1x128xf32>
    %68 = arith.mulf %67, %66 : vector<1x128xf32>
    %69 = math.tanh %68 : vector<1x128xf32>
    %cst_25 = arith.constant 1.000000e+00 : f32
    %70 = vector.broadcast %cst_25 : f32 to vector<1x128xf32>
    %71 = arith.addf %69, %70 : vector<1x128xf32>
    %cst_26 = arith.constant 5.000000e-01 : f32
    %72 = vector.broadcast %cst_26 : f32 to vector<1x128xf32>
    %73 = arith.mulf %72, %71 : vector<1x128xf32>
    %74 = vector.extract_strided_slice %57 {offsets = [0, 256], sizes = [1, 128], strides = [1, 1]} : vector<1x512xf32> to vector<1x128xf32>
    %75 = math.tanh %74 : vector<1x128xf32>
    %76 = vector.extract_strided_slice %57 {offsets = [0, 384], sizes = [1, 128], strides = [1, 1]} : vector<1x512xf32> to vector<1x128xf32>
    %cst_27 = arith.constant 5.000000e-01 : f32
    %77 = vector.broadcast %cst_27 : f32 to vector<1x128xf32>
    %78 = arith.mulf %77, %76 : vector<1x128xf32>
    %79 = math.tanh %78 : vector<1x128xf32>
    %cst_28 = arith.constant 1.000000e+00 : f32
    %80 = vector.broadcast %cst_28 : f32 to vector<1x128xf32>
    %81 = arith.addf %79, %80 : vector<1x128xf32>
    %cst_29 = arith.constant 5.000000e-01 : f32
    %82 = vector.broadcast %cst_29 : f32 to vector<1x128xf32>
    %83 = arith.mulf %82, %81 : vector<1x128xf32>
    %84 = arith.mulf %73, %50 : vector<1x128xf32>
    %85 = arith.mulf %65, %75 : vector<1x128xf32>
    %86 = arith.addf %84, %85 : vector<1x128xf32>
    %87 = math.tanh %86 : vector<1x128xf32>
    %88 = arith.mulf %83, %87 : vector<1x128xf32>
    %89 = vector.extract_strided_slice %14 {offsets = [2, 0], sizes = [1, 512], strides = [1, 1]} : vector<8x512xf32> to vector<1x512xf32>
    %90 = arith.truncf %88 : vector<1x128xf32> to vector<1x128xbf16>
    %c128_30 = arith.constant 128 : index
    %c0_31 = arith.constant 0 : index
    %91 = vector.load %arg2[%c128_30, %c0_31] : memref<256x512xbf16, #tpu.memory_space<vmem>>, vector<128x512xbf16>
    %cst_32 = arith.constant dense<0.000000e+00> : vector<1x512xf32>
    %92 = tpu.matmul %90, %91, %cst_32 {dimension_numbers = #tpu.dot_dimension_numbers<[1], [0], [0], [1], [0, 0, 1, 1], [], []>} : vector<1x128xbf16>, vector<128x512xbf16>, vector<1x512xf32> -> vector<1x512xf32>
    %93 = arith.addf %89, %92 : vector<1x512xf32>
    %94 = vector.extract_strided_slice %93 {offsets = [0, 0], sizes = [1, 128], strides = [1, 1]} : vector<1x512xf32> to vector<1x128xf32>
    %cst_33 = arith.constant 5.000000e-01 : f32
    %95 = vector.broadcast %cst_33 : f32 to vector<1x128xf32>
    %96 = arith.mulf %95, %94 : vector<1x128xf32>
    %97 = math.tanh %96 : vector<1x128xf32>
    %cst_34 = arith.constant 1.000000e+00 : f32
    %98 = vector.broadcast %cst_34 : f32 to vector<1x128xf32>
    %99 = arith.addf %97, %98 : vector<1x128xf32>
    %cst_35 = arith.constant 5.000000e-01 : f32
    %100 = vector.broadcast %cst_35 : f32 to vector<1x128xf32>
    %101 = arith.mulf %100, %99 : vector<1x128xf32>
    %102 = vector.extract_strided_slice %93 {offsets = [0, 128], sizes = [1, 128], strides = [1, 1]} : vector<1x512xf32> to vector<1x128xf32>
    %cst_36 = arith.constant 5.000000e-01 : f32
    %103 = vector.broadcast %cst_36 : f32 to vector<1x128xf32>
    %104 = arith.mulf %103, %102 : vector<1x128xf32>
    %105 = math.tanh %104 : vector<1x128xf32>
    %cst_37 = arith.constant 1.000000e+00 : f32
    %106 = vector.broadcast %cst_37 : f32 to vector<1x128xf32>
    %107 = arith.addf %105, %106 : vector<1x128xf32>
    %cst_38 = arith.constant 5.000000e-01 : f32
    %108 = vector.broadcast %cst_38 : f32 to vector<1x128xf32>
    %109 = arith.mulf %108, %107 : vector<1x128xf32>
    %110 = vector.extract_strided_slice %93 {offsets = [0, 256], sizes = [1, 128], strides = [1, 1]} : vector<1x512xf32> to vector<1x128xf32>
    %111 = math.tanh %110 : vector<1x128xf32>
    %112 = vector.extract_strided_slice %93 {offsets = [0, 384], sizes = [1, 128], strides = [1, 1]} : vector<1x512xf32> to vector<1x128xf32>
    %cst_39 = arith.constant 5.000000e-01 : f32
    %113 = vector.broadcast %cst_39 : f32 to vector<1x128xf32>
    %114 = arith.mulf %113, %112 : vector<1x128xf32>
    %115 = math.tanh %114 : vector<1x128xf32>
    %cst_40 = arith.constant 1.000000e+00 : f32
    %116 = vector.broadcast %cst_40 : f32 to vector<1x128xf32>
    %117 = arith.addf %115, %116 : vector<1x128xf32>
    %cst_41 = arith.constant 5.000000e-01 : f32
    %118 = vector.broadcast %cst_41 : f32 to vector<1x128xf32>
    %119 = arith.mulf %118, %117 : vector<1x128xf32>
    %120 = arith.mulf %109, %86 : vector<1x128xf32>
    %121 = arith.mulf %101, %111 : vector<1x128xf32>
    %122 = arith.addf %120, %121 : vector<1x128xf32>
    %123 = math.tanh %122 : vector<1x128xf32>
    %124 = arith.mulf %119, %123 : vector<1x128xf32>
    %125 = vector.extract_strided_slice %14 {offsets = [3, 0], sizes = [1, 512], strides = [1, 1]} : vector<8x512xf32> to vector<1x512xf32>
    %126 = arith.truncf %124 : vector<1x128xf32> to vector<1x128xbf16>
    %c128_42 = arith.constant 128 : index
    %c0_43 = arith.constant 0 : index
    %127 = vector.load %arg2[%c128_42, %c0_43] : memref<256x512xbf16, #tpu.memory_space<vmem>>, vector<128x512xbf16>
    %cst_44 = arith.constant dense<0.000000e+00> : vector<1x512xf32>
    %128 = tpu.matmul %126, %127, %cst_44 {dimension_numbers = #tpu.dot_dimension_numbers<[1], [0], [0], [1], [0, 0, 1, 1], [], []>} : vector<1x128xbf16>, vector<128x512xbf16>, vector<1x512xf32> -> vector<1x512xf32>
    %129 = arith.addf %125, %128 : vector<1x512xf32>
    %130 = vector.extract_strided_slice %129 {offsets = [0, 0], sizes = [1, 128], strides = [1, 1]} : vector<1x512xf32> to vector<1x128xf32>
    %cst_45 = arith.constant 5.000000e-01 : f32
    %131 = vector.broadcast %cst_45 : f32 to vector<1x128xf32>
    %132 = arith.mulf %131, %130 : vector<1x128xf32>
    %133 = math.tanh %132 : vector<1x128xf32>
    %cst_46 = arith.constant 1.000000e+00 : f32
    %134 = vector.broadcast %cst_46 : f32 to vector<1x128xf32>
    %135 = arith.addf %133, %134 : vector<1x128xf32>
    %cst_47 = arith.constant 5.000000e-01 : f32
    %136 = vector.broadcast %cst_47 : f32 to vector<1x128xf32>
    %137 = arith.mulf %136, %135 : vector<1x128xf32>
    %138 = vector.extract_strided_slice %129 {offsets = [0, 128], sizes = [1, 128], strides = [1, 1]} : vector<1x512xf32> to vector<1x128xf32>
    %cst_48 = arith.constant 5.000000e-01 : f32
    %139 = vector.broadcast %cst_48 : f32 to vector<1x128xf32>
    %140 = arith.mulf %139, %138 : vector<1x128xf32>
    %141 = math.tanh %140 : vector<1x128xf32>
    %cst_49 = arith.constant 1.000000e+00 : f32
    %142 = vector.broadcast %cst_49 : f32 to vector<1x128xf32>
    %143 = arith.addf %141, %142 : vector<1x128xf32>
    %cst_50 = arith.constant 5.000000e-01 : f32
    %144 = vector.broadcast %cst_50 : f32 to vector<1x128xf32>
    %145 = arith.mulf %144, %143 : vector<1x128xf32>
    %146 = vector.extract_strided_slice %129 {offsets = [0, 256], sizes = [1, 128], strides = [1, 1]} : vector<1x512xf32> to vector<1x128xf32>
    %147 = math.tanh %146 : vector<1x128xf32>
    %148 = vector.extract_strided_slice %129 {offsets = [0, 384], sizes = [1, 128], strides = [1, 1]} : vector<1x512xf32> to vector<1x128xf32>
    %cst_51 = arith.constant 5.000000e-01 : f32
    %149 = vector.broadcast %cst_51 : f32 to vector<1x128xf32>
    %150 = arith.mulf %149, %148 : vector<1x128xf32>
    %151 = math.tanh %150 : vector<1x128xf32>
    %cst_52 = arith.constant 1.000000e+00 : f32
    %152 = vector.broadcast %cst_52 : f32 to vector<1x128xf32>
    %153 = arith.addf %151, %152 : vector<1x128xf32>
    %cst_53 = arith.constant 5.000000e-01 : f32
    %154 = vector.broadcast %cst_53 : f32 to vector<1x128xf32>
    %155 = arith.mulf %154, %153 : vector<1x128xf32>
    %156 = arith.mulf %145, %122 : vector<1x128xf32>
    %157 = arith.mulf %137, %147 : vector<1x128xf32>
    %158 = arith.addf %156, %157 : vector<1x128xf32>
    %159 = math.tanh %158 : vector<1x128xf32>
    %160 = arith.mulf %155, %159 : vector<1x128xf32>
    %161 = vector.extract_strided_slice %14 {offsets = [4, 0], sizes = [1, 512], strides = [1, 1]} : vector<8x512xf32> to vector<1x512xf32>
    %162 = arith.truncf %160 : vector<1x128xf32> to vector<1x128xbf16>
    %c128_54 = arith.constant 128 : index
    %c0_55 = arith.constant 0 : index
    %163 = vector.load %arg2[%c128_54, %c0_55] : memref<256x512xbf16, #tpu.memory_space<vmem>>, vector<128x512xbf16>
    %cst_56 = arith.constant dense<0.000000e+00> : vector<1x512xf32>
    %164 = tpu.matmul %162, %163, %cst_56 {dimension_numbers = #tpu.dot_dimension_numbers<[1], [0], [0], [1], [0, 0, 1, 1], [], []>} : vector<1x128xbf16>, vector<128x512xbf16>, vector<1x512xf32> -> vector<1x512xf32>
    %165 = arith.addf %161, %164 : vector<1x512xf32>
    %166 = vector.extract_strided_slice %165 {offsets = [0, 0], sizes = [1, 128], strides = [1, 1]} : vector<1x512xf32> to vector<1x128xf32>
    %cst_57 = arith.constant 5.000000e-01 : f32
    %167 = vector.broadcast %cst_57 : f32 to vector<1x128xf32>
    %168 = arith.mulf %167, %166 : vector<1x128xf32>
    %169 = math.tanh %168 : vector<1x128xf32>
    %cst_58 = arith.constant 1.000000e+00 : f32
    %170 = vector.broadcast %cst_58 : f32 to vector<1x128xf32>
    %171 = arith.addf %169, %170 : vector<1x128xf32>
    %cst_59 = arith.constant 5.000000e-01 : f32
    %172 = vector.broadcast %cst_59 : f32 to vector<1x128xf32>
    %173 = arith.mulf %172, %171 : vector<1x128xf32>
    %174 = vector.extract_strided_slice %165 {offsets = [0, 128], sizes = [1, 128], strides = [1, 1]} : vector<1x512xf32> to vector<1x128xf32>
    %cst_60 = arith.constant 5.000000e-01 : f32
    %175 = vector.broadcast %cst_60 : f32 to vector<1x128xf32>
    %176 = arith.mulf %175, %174 : vector<1x128xf32>
    %177 = math.tanh %176 : vector<1x128xf32>
    %cst_61 = arith.constant 1.000000e+00 : f32
    %178 = vector.broadcast %cst_61 : f32 to vector<1x128xf32>
    %179 = arith.addf %177, %178 : vector<1x128xf32>
    %cst_62 = arith.constant 5.000000e-01 : f32
    %180 = vector.broadcast %cst_62 : f32 to vector<1x128xf32>
    %181 = arith.mulf %180, %179 : vector<1x128xf32>
    %182 = vector.extract_strided_slice %165 {offsets = [0, 256], sizes = [1, 128], strides = [1, 1]} : vector<1x512xf32> to vector<1x128xf32>
    %183 = math.tanh %182 : vector<1x128xf32>
    %184 = vector.extract_strided_slice %165 {offsets = [0, 384], sizes = [1, 128], strides = [1, 1]} : vector<1x512xf32> to vector<1x128xf32>
    %cst_63 = arith.constant 5.000000e-01 : f32
    %185 = vector.broadcast %cst_63 : f32 to vector<1x128xf32>
    %186 = arith.mulf %185, %184 : vector<1x128xf32>
    %187 = math.tanh %186 : vector<1x128xf32>
    %cst_64 = arith.constant 1.000000e+00 : f32
    %188 = vector.broadcast %cst_64 : f32 to vector<1x128xf32>
    %189 = arith.addf %187, %188 : vector<1x128xf32>
    %cst_65 = arith.constant 5.000000e-01 : f32
    %190 = vector.broadcast %cst_65 : f32 to vector<1x128xf32>
    %191 = arith.mulf %190, %189 : vector<1x128xf32>
    %192 = arith.mulf %181, %158 : vector<1x128xf32>
    %193 = arith.mulf %173, %183 : vector<1x128xf32>
    %194 = arith.addf %192, %193 : vector<1x128xf32>
    %195 = math.tanh %194 : vector<1x128xf32>
    %196 = arith.mulf %191, %195 : vector<1x128xf32>
    %197 = vector.extract_strided_slice %14 {offsets = [5, 0], sizes = [1, 512], strides = [1, 1]} : vector<8x512xf32> to vector<1x512xf32>
    %198 = arith.truncf %196 : vector<1x128xf32> to vector<1x128xbf16>
    %c128_66 = arith.constant 128 : index
    %c0_67 = arith.constant 0 : index
    %199 = vector.load %arg2[%c128_66, %c0_67] : memref<256x512xbf16, #tpu.memory_space<vmem>>, vector<128x512xbf16>
    %cst_68 = arith.constant dense<0.000000e+00> : vector<1x512xf32>
    %200 = tpu.matmul %198, %199, %cst_68 {dimension_numbers = #tpu.dot_dimension_numbers<[1], [0], [0], [1], [0, 0, 1, 1], [], []>} : vector<1x128xbf16>, vector<128x512xbf16>, vector<1x512xf32> -> vector<1x512xf32>
    %201 = arith.addf %197, %200 : vector<1x512xf32>
    %202 = vector.extract_strided_slice %201 {offsets = [0, 0], sizes = [1, 128], strides = [1, 1]} : vector<1x512xf32> to vector<1x128xf32>
    %cst_69 = arith.constant 5.000000e-01 : f32
    %203 = vector.broadcast %cst_69 : f32 to vector<1x128xf32>
    %204 = arith.mulf %203, %202 : vector<1x128xf32>
    %205 = math.tanh %204 : vector<1x128xf32>
    %cst_70 = arith.constant 1.000000e+00 : f32
    %206 = vector.broadcast %cst_70 : f32 to vector<1x128xf32>
    %207 = arith.addf %205, %206 : vector<1x128xf32>
    %cst_71 = arith.constant 5.000000e-01 : f32
    %208 = vector.broadcast %cst_71 : f32 to vector<1x128xf32>
    %209 = arith.mulf %208, %207 : vector<1x128xf32>
    %210 = vector.extract_strided_slice %201 {offsets = [0, 128], sizes = [1, 128], strides = [1, 1]} : vector<1x512xf32> to vector<1x128xf32>
    %cst_72 = arith.constant 5.000000e-01 : f32
    %211 = vector.broadcast %cst_72 : f32 to vector<1x128xf32>
    %212 = arith.mulf %211, %210 : vector<1x128xf32>
    %213 = math.tanh %212 : vector<1x128xf32>
    %cst_73 = arith.constant 1.000000e+00 : f32
    %214 = vector.broadcast %cst_73 : f32 to vector<1x128xf32>
    %215 = arith.addf %213, %214 : vector<1x128xf32>
    %cst_74 = arith.constant 5.000000e-01 : f32
    %216 = vector.broadcast %cst_74 : f32 to vector<1x128xf32>
    %217 = arith.mulf %216, %215 : vector<1x128xf32>
    %218 = vector.extract_strided_slice %201 {offsets = [0, 256], sizes = [1, 128], strides = [1, 1]} : vector<1x512xf32> to vector<1x128xf32>
    %219 = math.tanh %218 : vector<1x128xf32>
    %220 = vector.extract_strided_slice %201 {offsets = [0, 384], sizes = [1, 128], strides = [1, 1]} : vector<1x512xf32> to vector<1x128xf32>
    %cst_75 = arith.constant 5.000000e-01 : f32
    %221 = vector.broadcast %cst_75 : f32 to vector<1x128xf32>
    %222 = arith.mulf %221, %220 : vector<1x128xf32>
    %223 = math.tanh %222 : vector<1x128xf32>
    %cst_76 = arith.constant 1.000000e+00 : f32
    %224 = vector.broadcast %cst_76 : f32 to vector<1x128xf32>
    %225 = arith.addf %223, %224 : vector<1x128xf32>
    %cst_77 = arith.constant 5.000000e-01 : f32
    %226 = vector.broadcast %cst_77 : f32 to vector<1x128xf32>
    %227 = arith.mulf %226, %225 : vector<1x128xf32>
    %228 = arith.mulf %217, %194 : vector<1x128xf32>
    %229 = arith.mulf %209, %219 : vector<1x128xf32>
    %230 = arith.addf %228, %229 : vector<1x128xf32>
    %231 = math.tanh %230 : vector<1x128xf32>
    %232 = arith.mulf %227, %231 : vector<1x128xf32>
    %233 = vector.extract_strided_slice %14 {offsets = [6, 0], sizes = [1, 512], strides = [1, 1]} : vector<8x512xf32> to vector<1x512xf32>
    %234 = arith.truncf %232 : vector<1x128xf32> to vector<1x128xbf16>
    %c128_78 = arith.constant 128 : index
    %c0_79 = arith.constant 0 : index
    %235 = vector.load %arg2[%c128_78, %c0_79] : memref<256x512xbf16, #tpu.memory_space<vmem>>, vector<128x512xbf16>
    %cst_80 = arith.constant dense<0.000000e+00> : vector<1x512xf32>
    %236 = tpu.matmul %234, %235, %cst_80 {dimension_numbers = #tpu.dot_dimension_numbers<[1], [0], [0], [1], [0, 0, 1, 1], [], []>} : vector<1x128xbf16>, vector<128x512xbf16>, vector<1x512xf32> -> vector<1x512xf32>
    %237 = arith.addf %233, %236 : vector<1x512xf32>
    %238 = vector.extract_strided_slice %237 {offsets = [0, 0], sizes = [1, 128], strides = [1, 1]} : vector<1x512xf32> to vector<1x128xf32>
    %cst_81 = arith.constant 5.000000e-01 : f32
    %239 = vector.broadcast %cst_81 : f32 to vector<1x128xf32>
    %240 = arith.mulf %239, %238 : vector<1x128xf32>
    %241 = math.tanh %240 : vector<1x128xf32>
    %cst_82 = arith.constant 1.000000e+00 : f32
    %242 = vector.broadcast %cst_82 : f32 to vector<1x128xf32>
    %243 = arith.addf %241, %242 : vector<1x128xf32>
    %cst_83 = arith.constant 5.000000e-01 : f32
    %244 = vector.broadcast %cst_83 : f32 to vector<1x128xf32>
    %245 = arith.mulf %244, %243 : vector<1x128xf32>
    %246 = vector.extract_strided_slice %237 {offsets = [0, 128], sizes = [1, 128], strides = [1, 1]} : vector<1x512xf32> to vector<1x128xf32>
    %cst_84 = arith.constant 5.000000e-01 : f32
    %247 = vector.broadcast %cst_84 : f32 to vector<1x128xf32>
    %248 = arith.mulf %247, %246 : vector<1x128xf32>
    %249 = math.tanh %248 : vector<1x128xf32>
    %cst_85 = arith.constant 1.000000e+00 : f32
    %250 = vector.broadcast %cst_85 : f32 to vector<1x128xf32>
    %251 = arith.addf %249, %250 : vector<1x128xf32>
    %cst_86 = arith.constant 5.000000e-01 : f32
    %252 = vector.broadcast %cst_86 : f32 to vector<1x128xf32>
    %253 = arith.mulf %252, %251 : vector<1x128xf32>
    %254 = vector.extract_strided_slice %237 {offsets = [0, 256], sizes = [1, 128], strides = [1, 1]} : vector<1x512xf32> to vector<1x128xf32>
    %255 = math.tanh %254 : vector<1x128xf32>
    %256 = vector.extract_strided_slice %237 {offsets = [0, 384], sizes = [1, 128], strides = [1, 1]} : vector<1x512xf32> to vector<1x128xf32>
    %cst_87 = arith.constant 5.000000e-01 : f32
    %257 = vector.broadcast %cst_87 : f32 to vector<1x128xf32>
    %258 = arith.mulf %257, %256 : vector<1x128xf32>
    %259 = math.tanh %258 : vector<1x128xf32>
    %cst_88 = arith.constant 1.000000e+00 : f32
    %260 = vector.broadcast %cst_88 : f32 to vector<1x128xf32>
    %261 = arith.addf %259, %260 : vector<1x128xf32>
    %cst_89 = arith.constant 5.000000e-01 : f32
    %262 = vector.broadcast %cst_89 : f32 to vector<1x128xf32>
    %263 = arith.mulf %262, %261 : vector<1x128xf32>
    %264 = arith.mulf %253, %230 : vector<1x128xf32>
    %265 = arith.mulf %245, %255 : vector<1x128xf32>
    %266 = arith.addf %264, %265 : vector<1x128xf32>
    %267 = math.tanh %266 : vector<1x128xf32>
    %268 = arith.mulf %263, %267 : vector<1x128xf32>
    %269 = vector.extract_strided_slice %14 {offsets = [7, 0], sizes = [1, 512], strides = [1, 1]} : vector<8x512xf32> to vector<1x512xf32>
    %270 = arith.truncf %268 : vector<1x128xf32> to vector<1x128xbf16>
    %c128_90 = arith.constant 128 : index
    %c0_91 = arith.constant 0 : index
    %271 = vector.load %arg2[%c128_90, %c0_91] : memref<256x512xbf16, #tpu.memory_space<vmem>>, vector<128x512xbf16>
    %cst_92 = arith.constant dense<0.000000e+00> : vector<1x512xf32>
    %272 = tpu.matmul %270, %271, %cst_92 {dimension_numbers = #tpu.dot_dimension_numbers<[1], [0], [0], [1], [0, 0, 1, 1], [], []>} : vector<1x128xbf16>, vector<128x512xbf16>, vector<1x512xf32> -> vector<1x512xf32>
    %273 = arith.addf %269, %272 : vector<1x512xf32>
    %274 = vector.extract_strided_slice %273 {offsets = [0, 0], sizes = [1, 128], strides = [1, 1]} : vector<1x512xf32> to vector<1x128xf32>
    %cst_93 = arith.constant 5.000000e-01 : f32
    %275 = vector.broadcast %cst_93 : f32 to vector<1x128xf32>
    %276 = arith.mulf %275, %274 : vector<1x128xf32>
    %277 = math.tanh %276 : vector<1x128xf32>
    %cst_94 = arith.constant 1.000000e+00 : f32
    %278 = vector.broadcast %cst_94 : f32 to vector<1x128xf32>
    %279 = arith.addf %277, %278 : vector<1x128xf32>
    %cst_95 = arith.constant 5.000000e-01 : f32
    %280 = vector.broadcast %cst_95 : f32 to vector<1x128xf32>
    %281 = arith.mulf %280, %279 : vector<1x128xf32>
    %282 = vector.extract_strided_slice %273 {offsets = [0, 128], sizes = [1, 128], strides = [1, 1]} : vector<1x512xf32> to vector<1x128xf32>
    %cst_96 = arith.constant 5.000000e-01 : f32
    %283 = vector.broadcast %cst_96 : f32 to vector<1x128xf32>
    %284 = arith.mulf %283, %282 : vector<1x128xf32>
    %285 = math.tanh %284 : vector<1x128xf32>
    %cst_97 = arith.constant 1.000000e+00 : f32
    %286 = vector.broadcast %cst_97 : f32 to vector<1x128xf32>
    %287 = arith.addf %285, %286 : vector<1x128xf32>
    %cst_98 = arith.constant 5.000000e-01 : f32
    %288 = vector.broadcast %cst_98 : f32 to vector<1x128xf32>
    %289 = arith.mulf %288, %287 : vector<1x128xf32>
    %290 = vector.extract_strided_slice %273 {offsets = [0, 256], sizes = [1, 128], strides = [1, 1]} : vector<1x512xf32> to vector<1x128xf32>
    %291 = math.tanh %290 : vector<1x128xf32>
    %292 = vector.extract_strided_slice %273 {offsets = [0, 384], sizes = [1, 128], strides = [1, 1]} : vector<1x512xf32> to vector<1x128xf32>
    %cst_99 = arith.constant 5.000000e-01 : f32
    %293 = vector.broadcast %cst_99 : f32 to vector<1x128xf32>
    %294 = arith.mulf %293, %292 : vector<1x128xf32>
    %295 = math.tanh %294 : vector<1x128xf32>
    %cst_100 = arith.constant 1.000000e+00 : f32
    %296 = vector.broadcast %cst_100 : f32 to vector<1x128xf32>
    %297 = arith.addf %295, %296 : vector<1x128xf32>
    %cst_101 = arith.constant 5.000000e-01 : f32
    %298 = vector.broadcast %cst_101 : f32 to vector<1x128xf32>
    %299 = arith.mulf %298, %297 : vector<1x128xf32>
    %300 = arith.mulf %289, %266 : vector<1x128xf32>
    %301 = arith.mulf %281, %291 : vector<1x128xf32>
    %302 = arith.addf %300, %301 : vector<1x128xf32>
    %303 = math.tanh %302 : vector<1x128xf32>
    %304 = arith.mulf %299, %303 : vector<1x128xf32>
    %c0_i32_102 = arith.constant 0 : i32
    %305 = tpu.memref_slice %arg13[%c0_i32_102] : memref<4x!tpu.dma_semaphore, #tpu.memory_space<semaphore_mem>> -> memref<1x!tpu.dma_semaphore, #tpu.memory_space<semaphore_mem>>
    %306 = tpu.memref_squeeze %305 : memref<1x!tpu.dma_semaphore, #tpu.memory_space<semaphore_mem>> -> memref<!tpu.dma_semaphore, #tpu.memory_space<semaphore_mem>>
    tpu.wait_dma2 semaphore(%306 : memref<!tpu.dma_semaphore, #tpu.memory_space<semaphore_mem>>) src(%arg4 : memref<256x512xbf16, #tpu.memory_space<any>>) dst(%arg9 : memref<256x512xbf16, #tpu.memory_space<vmem>>)
    %c1_i32_103 = arith.constant 1 : i32
    %307 = tpu.memref_slice %arg13[%c1_i32_103] : memref<4x!tpu.dma_semaphore, #tpu.memory_space<semaphore_mem>> -> memref<1x!tpu.dma_semaphore, #tpu.memory_space<semaphore_mem>>
    %308 = tpu.memref_squeeze %307 : memref<1x!tpu.dma_semaphore, #tpu.memory_space<semaphore_mem>> -> memref<!tpu.dma_semaphore, #tpu.memory_space<semaphore_mem>>
    tpu.wait_dma2 semaphore(%308 : memref<!tpu.dma_semaphore, #tpu.memory_space<semaphore_mem>>) src(%arg5 : memref<1x512xf32, #tpu.memory_space<any>>) dst(%arg10 : memref<1x512xf32, #tpu.memory_space<vmem>>)
    %c0_104 = arith.constant 0 : index
    %c0_105 = arith.constant 0 : index
    %309 = vector.load %arg1[%c0_104, %c0_105] : memref<8x128xf32, #tpu.memory_space<vmem>>, vector<8x128xf32>
    %cst_106 = arith.constant 0.000000e+00 : f32
    %310 = vector.broadcast %cst_106 : f32 to vector<8x128xf32>
    %311 = arith.maximumf %309, %310 : vector<8x128xf32>
    %312 = arith.truncf %311 : vector<8x128xf32> to vector<8x128xbf16>
    %c0_107 = arith.constant 0 : index
    %c0_108 = arith.constant 0 : index
    %313 = vector.load %arg9[%c0_107, %c0_108] : memref<256x512xbf16, #tpu.memory_space<vmem>>, vector<128x512xbf16>
    %cst_109 = arith.constant dense<0.000000e+00> : vector<8x512xf32>
    %314 = tpu.matmul %312, %313, %cst_109 {dimension_numbers = #tpu.dot_dimension_numbers<[1], [0], [0], [1], [0, 0, 1, 1], [], []>} : vector<8x128xbf16>, vector<128x512xbf16>, vector<8x512xf32> -> vector<8x512xf32>
    %c0_110 = arith.constant 0 : index
    %c0_111 = arith.constant 0 : index
    %315 = vector.load %arg10[%c0_110, %c0_111] : memref<1x512xf32, #tpu.memory_space<vmem>>, vector<1x512xf32>
    %316 = vector.broadcast %315 : vector<1x512xf32> to vector<8x512xf32>
    %317 = arith.addf %314, %316 : vector<8x512xf32>
    %318 = vector.extract_strided_slice %317 {offsets = [0, 0], sizes = [1, 512], strides = [1, 1]} : vector<8x512xf32> to vector<1x512xf32>
    %319 = arith.truncf %304 : vector<1x128xf32> to vector<1x128xbf16>
    %c128_112 = arith.constant 128 : index
    %c0_113 = arith.constant 0 : index
    %320 = vector.load %arg9[%c128_112, %c0_113] : memref<256x512xbf16, #tpu.memory_space<vmem>>, vector<128x512xbf16>
    %cst_114 = arith.constant dense<0.000000e+00> : vector<1x512xf32>
    %321 = tpu.matmul %319, %320, %cst_114 {dimension_numbers = #tpu.dot_dimension_numbers<[1], [0], [0], [1], [0, 0, 1, 1], [], []>} : vector<1x128xbf16>, vector<128x512xbf16>, vector<1x512xf32> -> vector<1x512xf32>
    %322 = arith.addf %318, %321 : vector<1x512xf32>
    %323 = vector.extract_strided_slice %322 {offsets = [0, 0], sizes = [1, 128], strides = [1, 1]} : vector<1x512xf32> to vector<1x128xf32>
    %cst_115 = arith.constant 5.000000e-01 : f32
    %324 = vector.broadcast %cst_115 : f32 to vector<1x128xf32>
    %325 = arith.mulf %324, %323 : vector<1x128xf32>
    %326 = math.tanh %325 : vector<1x128xf32>
    %cst_116 = arith.constant 1.000000e+00 : f32
    %327 = vector.broadcast %cst_116 : f32 to vector<1x128xf32>
    %328 = arith.addf %326, %327 : vector<1x128xf32>
    %cst_117 = arith.constant 5.000000e-01 : f32
    %329 = vector.broadcast %cst_117 : f32 to vector<1x128xf32>
    %330 = arith.mulf %329, %328 : vector<1x128xf32>
    %331 = vector.extract_strided_slice %322 {offsets = [0, 128], sizes = [1, 128], strides = [1, 1]} : vector<1x512xf32> to vector<1x128xf32>
    %cst_118 = arith.constant 5.000000e-01 : f32
    %332 = vector.broadcast %cst_118 : f32 to vector<1x128xf32>
    %333 = arith.mulf %332, %331 : vector<1x128xf32>
    %334 = math.tanh %333 : vector<1x128xf32>
    %cst_119 = arith.constant 1.000000e+00 : f32
    %335 = vector.broadcast %cst_119 : f32 to vector<1x128xf32>
    %336 = arith.addf %334, %335 : vector<1x128xf32>
    %cst_120 = arith.constant 5.000000e-01 : f32
    %337 = vector.broadcast %cst_120 : f32 to vector<1x128xf32>
    %338 = arith.mulf %337, %336 : vector<1x128xf32>
    %339 = vector.extract_strided_slice %322 {offsets = [0, 256], sizes = [1, 128], strides = [1, 1]} : vector<1x512xf32> to vector<1x128xf32>
    %340 = math.tanh %339 : vector<1x128xf32>
    %341 = vector.extract_strided_slice %322 {offsets = [0, 384], sizes = [1, 128], strides = [1, 1]} : vector<1x512xf32> to vector<1x128xf32>
    %cst_121 = arith.constant 5.000000e-01 : f32
    %342 = vector.broadcast %cst_121 : f32 to vector<1x128xf32>
    %343 = arith.mulf %342, %341 : vector<1x128xf32>
    %344 = math.tanh %343 : vector<1x128xf32>
    %cst_122 = arith.constant 1.000000e+00 : f32
    %345 = vector.broadcast %cst_122 : f32 to vector<1x128xf32>
    %346 = arith.addf %344, %345 : vector<1x128xf32>
    %cst_123 = arith.constant 5.000000e-01 : f32
    %347 = vector.broadcast %cst_123 : f32 to vector<1x128xf32>
    %348 = arith.mulf %347, %346 : vector<1x128xf32>
    %349 = arith.mulf %338, %302 : vector<1x128xf32>
    %350 = arith.mulf %330, %340 : vector<1x128xf32>
    %351 = arith.addf %349, %350 : vector<1x128xf32>
    %352 = math.tanh %351 : vector<1x128xf32>
    %353 = arith.mulf %348, %352 : vector<1x128xf32>
    %354 = vector.extract_strided_slice %317 {offsets = [1, 0], sizes = [1, 512], strides = [1, 1]} : vector<8x512xf32> to vector<1x512xf32>
    %355 = arith.truncf %353 : vector<1x128xf32> to vector<1x128xbf16>
    %c128_124 = arith.constant 128 : index
    %c0_125 = arith.constant 0 : index
    %356 = vector.load %arg9[%c128_124, %c0_125] : memref<256x512xbf16, #tpu.memory_space<vmem>>, vector<128x512xbf16>
    %cst_126 = arith.constant dense<0.000000e+00> : vector<1x512xf32>
    %357 = tpu.matmul %355, %356, %cst_126 {dimension_numbers = #tpu.dot_dimension_numbers<[1], [0], [0], [1], [0, 0, 1, 1], [], []>} : vector<1x128xbf16>, vector<128x512xbf16>, vector<1x512xf32> -> vector<1x512xf32>
    %358 = arith.addf %354, %357 : vector<1x512xf32>
    %359 = vector.extract_strided_slice %358 {offsets = [0, 0], sizes = [1, 128], strides = [1, 1]} : vector<1x512xf32> to vector<1x128xf32>
    %cst_127 = arith.constant 5.000000e-01 : f32
    %360 = vector.broadcast %cst_127 : f32 to vector<1x128xf32>
    %361 = arith.mulf %360, %359 : vector<1x128xf32>
    %362 = math.tanh %361 : vector<1x128xf32>
    %cst_128 = arith.constant 1.000000e+00 : f32
    %363 = vector.broadcast %cst_128 : f32 to vector<1x128xf32>
    %364 = arith.addf %362, %363 : vector<1x128xf32>
    %cst_129 = arith.constant 5.000000e-01 : f32
    %365 = vector.broadcast %cst_129 : f32 to vector<1x128xf32>
    %366 = arith.mulf %365, %364 : vector<1x128xf32>
    %367 = vector.extract_strided_slice %358 {offsets = [0, 128], sizes = [1, 128], strides = [1, 1]} : vector<1x512xf32> to vector<1x128xf32>
    %cst_130 = arith.constant 5.000000e-01 : f32
    %368 = vector.broadcast %cst_130 : f32 to vector<1x128xf32>
    %369 = arith.mulf %368, %367 : vector<1x128xf32>
    %370 = math.tanh %369 : vector<1x128xf32>
    %cst_131 = arith.constant 1.000000e+00 : f32
    %371 = vector.broadcast %cst_131 : f32 to vector<1x128xf32>
    %372 = arith.addf %370, %371 : vector<1x128xf32>
    %cst_132 = arith.constant 5.000000e-01 : f32
    %373 = vector.broadcast %cst_132 : f32 to vector<1x128xf32>
    %374 = arith.mulf %373, %372 : vector<1x128xf32>
    %375 = vector.extract_strided_slice %358 {offsets = [0, 256], sizes = [1, 128], strides = [1, 1]} : vector<1x512xf32> to vector<1x128xf32>
    %376 = math.tanh %375 : vector<1x128xf32>
    %377 = vector.extract_strided_slice %358 {offsets = [0, 384], sizes = [1, 128], strides = [1, 1]} : vector<1x512xf32> to vector<1x128xf32>
    %cst_133 = arith.constant 5.000000e-01 : f32
    %378 = vector.broadcast %cst_133 : f32 to vector<1x128xf32>
    %379 = arith.mulf %378, %377 : vector<1x128xf32>
    %380 = math.tanh %379 : vector<1x128xf32>
    %cst_134 = arith.constant 1.000000e+00 : f32
    %381 = vector.broadcast %cst_134 : f32 to vector<1x128xf32>
    %382 = arith.addf %380, %381 : vector<1x128xf32>
    %cst_135 = arith.constant 5.000000e-01 : f32
    %383 = vector.broadcast %cst_135 : f32 to vector<1x128xf32>
    %384 = arith.mulf %383, %382 : vector<1x128xf32>
    %385 = arith.mulf %374, %351 : vector<1x128xf32>
    %386 = arith.mulf %366, %376 : vector<1x128xf32>
    %387 = arith.addf %385, %386 : vector<1x128xf32>
    %388 = math.tanh %387 : vector<1x128xf32>
    %389 = arith.mulf %384, %388 : vector<1x128xf32>
    %390 = vector.extract_strided_slice %317 {offsets = [2, 0], sizes = [1, 512], strides = [1, 1]} : vector<8x512xf32> to vector<1x512xf32>
    %391 = arith.truncf %389 : vector<1x128xf32> to vector<1x128xbf16>
    %c128_136 = arith.constant 128 : index
    %c0_137 = arith.constant 0 : index
    %392 = vector.load %arg9[%c128_136, %c0_137] : memref<256x512xbf16, #tpu.memory_space<vmem>>, vector<128x512xbf16>
    %cst_138 = arith.constant dense<0.000000e+00> : vector<1x512xf32>
    %393 = tpu.matmul %391, %392, %cst_138 {dimension_numbers = #tpu.dot_dimension_numbers<[1], [0], [0], [1], [0, 0, 1, 1], [], []>} : vector<1x128xbf16>, vector<128x512xbf16>, vector<1x512xf32> -> vector<1x512xf32>
    %394 = arith.addf %390, %393 : vector<1x512xf32>
    %395 = vector.extract_strided_slice %394 {offsets = [0, 0], sizes = [1, 128], strides = [1, 1]} : vector<1x512xf32> to vector<1x128xf32>
    %cst_139 = arith.constant 5.000000e-01 : f32
    %396 = vector.broadcast %cst_139 : f32 to vector<1x128xf32>
    %397 = arith.mulf %396, %395 : vector<1x128xf32>
    %398 = math.tanh %397 : vector<1x128xf32>
    %cst_140 = arith.constant 1.000000e+00 : f32
    %399 = vector.broadcast %cst_140 : f32 to vector<1x128xf32>
    %400 = arith.addf %398, %399 : vector<1x128xf32>
    %cst_141 = arith.constant 5.000000e-01 : f32
    %401 = vector.broadcast %cst_141 : f32 to vector<1x128xf32>
    %402 = arith.mulf %401, %400 : vector<1x128xf32>
    %403 = vector.extract_strided_slice %394 {offsets = [0, 128], sizes = [1, 128], strides = [1, 1]} : vector<1x512xf32> to vector<1x128xf32>
    %cst_142 = arith.constant 5.000000e-01 : f32
    %404 = vector.broadcast %cst_142 : f32 to vector<1x128xf32>
    %405 = arith.mulf %404, %403 : vector<1x128xf32>
    %406 = math.tanh %405 : vector<1x128xf32>
    %cst_143 = arith.constant 1.000000e+00 : f32
    %407 = vector.broadcast %cst_143 : f32 to vector<1x128xf32>
    %408 = arith.addf %406, %407 : vector<1x128xf32>
    %cst_144 = arith.constant 5.000000e-01 : f32
    %409 = vector.broadcast %cst_144 : f32 to vector<1x128xf32>
    %410 = arith.mulf %409, %408 : vector<1x128xf32>
    %411 = vector.extract_strided_slice %394 {offsets = [0, 256], sizes = [1, 128], strides = [1, 1]} : vector<1x512xf32> to vector<1x128xf32>
    %412 = math.tanh %411 : vector<1x128xf32>
    %413 = vector.extract_strided_slice %394 {offsets = [0, 384], sizes = [1, 128], strides = [1, 1]} : vector<1x512xf32> to vector<1x128xf32>
    %cst_145 = arith.constant 5.000000e-01 : f32
    %414 = vector.broadcast %cst_145 : f32 to vector<1x128xf32>
    %415 = arith.mulf %414, %413 : vector<1x128xf32>
    %416 = math.tanh %415 : vector<1x128xf32>
    %cst_146 = arith.constant 1.000000e+00 : f32
    %417 = vector.broadcast %cst_146 : f32 to vector<1x128xf32>
    %418 = arith.addf %416, %417 : vector<1x128xf32>
    %cst_147 = arith.constant 5.000000e-01 : f32
    %419 = vector.broadcast %cst_147 : f32 to vector<1x128xf32>
    %420 = arith.mulf %419, %418 : vector<1x128xf32>
    %421 = arith.mulf %410, %387 : vector<1x128xf32>
    %422 = arith.mulf %402, %412 : vector<1x128xf32>
    %423 = arith.addf %421, %422 : vector<1x128xf32>
    %424 = math.tanh %423 : vector<1x128xf32>
    %425 = arith.mulf %420, %424 : vector<1x128xf32>
    %426 = vector.extract_strided_slice %317 {offsets = [3, 0], sizes = [1, 512], strides = [1, 1]} : vector<8x512xf32> to vector<1x512xf32>
    %427 = arith.truncf %425 : vector<1x128xf32> to vector<1x128xbf16>
    %c128_148 = arith.constant 128 : index
    %c0_149 = arith.constant 0 : index
    %428 = vector.load %arg9[%c128_148, %c0_149] : memref<256x512xbf16, #tpu.memory_space<vmem>>, vector<128x512xbf16>
    %cst_150 = arith.constant dense<0.000000e+00> : vector<1x512xf32>
    %429 = tpu.matmul %427, %428, %cst_150 {dimension_numbers = #tpu.dot_dimension_numbers<[1], [0], [0], [1], [0, 0, 1, 1], [], []>} : vector<1x128xbf16>, vector<128x512xbf16>, vector<1x512xf32> -> vector<1x512xf32>
    %430 = arith.addf %426, %429 : vector<1x512xf32>
    %431 = vector.extract_strided_slice %430 {offsets = [0, 0], sizes = [1, 128], strides = [1, 1]} : vector<1x512xf32> to vector<1x128xf32>
    %cst_151 = arith.constant 5.000000e-01 : f32
    %432 = vector.broadcast %cst_151 : f32 to vector<1x128xf32>
    %433 = arith.mulf %432, %431 : vector<1x128xf32>
    %434 = math.tanh %433 : vector<1x128xf32>
    %cst_152 = arith.constant 1.000000e+00 : f32
    %435 = vector.broadcast %cst_152 : f32 to vector<1x128xf32>
    %436 = arith.addf %434, %435 : vector<1x128xf32>
    %cst_153 = arith.constant 5.000000e-01 : f32
    %437 = vector.broadcast %cst_153 : f32 to vector<1x128xf32>
    %438 = arith.mulf %437, %436 : vector<1x128xf32>
    %439 = vector.extract_strided_slice %430 {offsets = [0, 128], sizes = [1, 128], strides = [1, 1]} : vector<1x512xf32> to vector<1x128xf32>
    %cst_154 = arith.constant 5.000000e-01 : f32
    %440 = vector.broadcast %cst_154 : f32 to vector<1x128xf32>
    %441 = arith.mulf %440, %439 : vector<1x128xf32>
    %442 = math.tanh %441 : vector<1x128xf32>
    %cst_155 = arith.constant 1.000000e+00 : f32
    %443 = vector.broadcast %cst_155 : f32 to vector<1x128xf32>
    %444 = arith.addf %442, %443 : vector<1x128xf32>
    %cst_156 = arith.constant 5.000000e-01 : f32
    %445 = vector.broadcast %cst_156 : f32 to vector<1x128xf32>
    %446 = arith.mulf %445, %444 : vector<1x128xf32>
    %447 = vector.extract_strided_slice %430 {offsets = [0, 256], sizes = [1, 128], strides = [1, 1]} : vector<1x512xf32> to vector<1x128xf32>
    %448 = math.tanh %447 : vector<1x128xf32>
    %449 = vector.extract_strided_slice %430 {offsets = [0, 384], sizes = [1, 128], strides = [1, 1]} : vector<1x512xf32> to vector<1x128xf32>
    %cst_157 = arith.constant 5.000000e-01 : f32
    %450 = vector.broadcast %cst_157 : f32 to vector<1x128xf32>
    %451 = arith.mulf %450, %449 : vector<1x128xf32>
    %452 = math.tanh %451 : vector<1x128xf32>
    %cst_158 = arith.constant 1.000000e+00 : f32
    %453 = vector.broadcast %cst_158 : f32 to vector<1x128xf32>
    %454 = arith.addf %452, %453 : vector<1x128xf32>
    %cst_159 = arith.constant 5.000000e-01 : f32
    %455 = vector.broadcast %cst_159 : f32 to vector<1x128xf32>
    %456 = arith.mulf %455, %454 : vector<1x128xf32>
    %457 = arith.mulf %446, %423 : vector<1x128xf32>
    %458 = arith.mulf %438, %448 : vector<1x128xf32>
    %459 = arith.addf %457, %458 : vector<1x128xf32>
    %460 = math.tanh %459 : vector<1x128xf32>
    %461 = arith.mulf %456, %460 : vector<1x128xf32>
    %462 = vector.extract_strided_slice %317 {offsets = [4, 0], sizes = [1, 512], strides = [1, 1]} : vector<8x512xf32> to vector<1x512xf32>
    %463 = arith.truncf %461 : vector<1x128xf32> to vector<1x128xbf16>
    %c128_160 = arith.constant 128 : index
    %c0_161 = arith.constant 0 : index
    %464 = vector.load %arg9[%c128_160, %c0_161] : memref<256x512xbf16, #tpu.memory_space<vmem>>, vector<128x512xbf16>
    %cst_162 = arith.constant dense<0.000000e+00> : vector<1x512xf32>
    %465 = tpu.matmul %463, %464, %cst_162 {dimension_numbers = #tpu.dot_dimension_numbers<[1], [0], [0], [1], [0, 0, 1, 1], [], []>} : vector<1x128xbf16>, vector<128x512xbf16>, vector<1x512xf32> -> vector<1x512xf32>
    %466 = arith.addf %462, %465 : vector<1x512xf32>
    %467 = vector.extract_strided_slice %466 {offsets = [0, 0], sizes = [1, 128], strides = [1, 1]} : vector<1x512xf32> to vector<1x128xf32>
    %cst_163 = arith.constant 5.000000e-01 : f32
    %468 = vector.broadcast %cst_163 : f32 to vector<1x128xf32>
    %469 = arith.mulf %468, %467 : vector<1x128xf32>
    %470 = math.tanh %469 : vector<1x128xf32>
    %cst_164 = arith.constant 1.000000e+00 : f32
    %471 = vector.broadcast %cst_164 : f32 to vector<1x128xf32>
    %472 = arith.addf %470, %471 : vector<1x128xf32>
    %cst_165 = arith.constant 5.000000e-01 : f32
    %473 = vector.broadcast %cst_165 : f32 to vector<1x128xf32>
    %474 = arith.mulf %473, %472 : vector<1x128xf32>
    %475 = vector.extract_strided_slice %466 {offsets = [0, 128], sizes = [1, 128], strides = [1, 1]} : vector<1x512xf32> to vector<1x128xf32>
    %cst_166 = arith.constant 5.000000e-01 : f32
    %476 = vector.broadcast %cst_166 : f32 to vector<1x128xf32>
    %477 = arith.mulf %476, %475 : vector<1x128xf32>
    %478 = math.tanh %477 : vector<1x128xf32>
    %cst_167 = arith.constant 1.000000e+00 : f32
    %479 = vector.broadcast %cst_167 : f32 to vector<1x128xf32>
    %480 = arith.addf %478, %479 : vector<1x128xf32>
    %cst_168 = arith.constant 5.000000e-01 : f32
    %481 = vector.broadcast %cst_168 : f32 to vector<1x128xf32>
    %482 = arith.mulf %481, %480 : vector<1x128xf32>
    %483 = vector.extract_strided_slice %466 {offsets = [0, 256], sizes = [1, 128], strides = [1, 1]} : vector<1x512xf32> to vector<1x128xf32>
    %484 = math.tanh %483 : vector<1x128xf32>
    %485 = vector.extract_strided_slice %466 {offsets = [0, 384], sizes = [1, 128], strides = [1, 1]} : vector<1x512xf32> to vector<1x128xf32>
    %cst_169 = arith.constant 5.000000e-01 : f32
    %486 = vector.broadcast %cst_169 : f32 to vector<1x128xf32>
    %487 = arith.mulf %486, %485 : vector<1x128xf32>
    %488 = math.tanh %487 : vector<1x128xf32>
    %cst_170 = arith.constant 1.000000e+00 : f32
    %489 = vector.broadcast %cst_170 : f32 to vector<1x128xf32>
    %490 = arith.addf %488, %489 : vector<1x128xf32>
    %cst_171 = arith.constant 5.000000e-01 : f32
    %491 = vector.broadcast %cst_171 : f32 to vector<1x128xf32>
    %492 = arith.mulf %491, %490 : vector<1x128xf32>
    %493 = arith.mulf %482, %459 : vector<1x128xf32>
    %494 = arith.mulf %474, %484 : vector<1x128xf32>
    %495 = arith.addf %493, %494 : vector<1x128xf32>
    %496 = math.tanh %495 : vector<1x128xf32>
    %497 = arith.mulf %492, %496 : vector<1x128xf32>
    %498 = vector.extract_strided_slice %317 {offsets = [5, 0], sizes = [1, 512], strides = [1, 1]} : vector<8x512xf32> to vector<1x512xf32>
    %499 = arith.truncf %497 : vector<1x128xf32> to vector<1x128xbf16>
    %c128_172 = arith.constant 128 : index
    %c0_173 = arith.constant 0 : index
    %500 = vector.load %arg9[%c128_172, %c0_173] : memref<256x512xbf16, #tpu.memory_space<vmem>>, vector<128x512xbf16>
    %cst_174 = arith.constant dense<0.000000e+00> : vector<1x512xf32>
    %501 = tpu.matmul %499, %500, %cst_174 {dimension_numbers = #tpu.dot_dimension_numbers<[1], [0], [0], [1], [0, 0, 1, 1], [], []>} : vector<1x128xbf16>, vector<128x512xbf16>, vector<1x512xf32> -> vector<1x512xf32>
    %502 = arith.addf %498, %501 : vector<1x512xf32>
    %503 = vector.extract_strided_slice %502 {offsets = [0, 0], sizes = [1, 128], strides = [1, 1]} : vector<1x512xf32> to vector<1x128xf32>
    %cst_175 = arith.constant 5.000000e-01 : f32
    %504 = vector.broadcast %cst_175 : f32 to vector<1x128xf32>
    %505 = arith.mulf %504, %503 : vector<1x128xf32>
    %506 = math.tanh %505 : vector<1x128xf32>
    %cst_176 = arith.constant 1.000000e+00 : f32
    %507 = vector.broadcast %cst_176 : f32 to vector<1x128xf32>
    %508 = arith.addf %506, %507 : vector<1x128xf32>
    %cst_177 = arith.constant 5.000000e-01 : f32
    %509 = vector.broadcast %cst_177 : f32 to vector<1x128xf32>
    %510 = arith.mulf %509, %508 : vector<1x128xf32>
    %511 = vector.extract_strided_slice %502 {offsets = [0, 128], sizes = [1, 128], strides = [1, 1]} : vector<1x512xf32> to vector<1x128xf32>
    %cst_178 = arith.constant 5.000000e-01 : f32
    %512 = vector.broadcast %cst_178 : f32 to vector<1x128xf32>
    %513 = arith.mulf %512, %511 : vector<1x128xf32>
    %514 = math.tanh %513 : vector<1x128xf32>
    %cst_179 = arith.constant 1.000000e+00 : f32
    %515 = vector.broadcast %cst_179 : f32 to vector<1x128xf32>
    %516 = arith.addf %514, %515 : vector<1x128xf32>
    %cst_180 = arith.constant 5.000000e-01 : f32
    %517 = vector.broadcast %cst_180 : f32 to vector<1x128xf32>
    %518 = arith.mulf %517, %516 : vector<1x128xf32>
    %519 = vector.extract_strided_slice %502 {offsets = [0, 256], sizes = [1, 128], strides = [1, 1]} : vector<1x512xf32> to vector<1x128xf32>
    %520 = math.tanh %519 : vector<1x128xf32>
    %521 = vector.extract_strided_slice %502 {offsets = [0, 384], sizes = [1, 128], strides = [1, 1]} : vector<1x512xf32> to vector<1x128xf32>
    %cst_181 = arith.constant 5.000000e-01 : f32
    %522 = vector.broadcast %cst_181 : f32 to vector<1x128xf32>
    %523 = arith.mulf %522, %521 : vector<1x128xf32>
    %524 = math.tanh %523 : vector<1x128xf32>
    %cst_182 = arith.constant 1.000000e+00 : f32
    %525 = vector.broadcast %cst_182 : f32 to vector<1x128xf32>
    %526 = arith.addf %524, %525 : vector<1x128xf32>
    %cst_183 = arith.constant 5.000000e-01 : f32
    %527 = vector.broadcast %cst_183 : f32 to vector<1x128xf32>
    %528 = arith.mulf %527, %526 : vector<1x128xf32>
    %529 = arith.mulf %518, %495 : vector<1x128xf32>
    %530 = arith.mulf %510, %520 : vector<1x128xf32>
    %531 = arith.addf %529, %530 : vector<1x128xf32>
    %532 = math.tanh %531 : vector<1x128xf32>
    %533 = arith.mulf %528, %532 : vector<1x128xf32>
    %534 = vector.extract_strided_slice %317 {offsets = [6, 0], sizes = [1, 512], strides = [1, 1]} : vector<8x512xf32> to vector<1x512xf32>
    %535 = arith.truncf %533 : vector<1x128xf32> to vector<1x128xbf16>
    %c128_184 = arith.constant 128 : index
    %c0_185 = arith.constant 0 : index
    %536 = vector.load %arg9[%c128_184, %c0_185] : memref<256x512xbf16, #tpu.memory_space<vmem>>, vector<128x512xbf16>
    %cst_186 = arith.constant dense<0.000000e+00> : vector<1x512xf32>
    %537 = tpu.matmul %535, %536, %cst_186 {dimension_numbers = #tpu.dot_dimension_numbers<[1], [0], [0], [1], [0, 0, 1, 1], [], []>} : vector<1x128xbf16>, vector<128x512xbf16>, vector<1x512xf32> -> vector<1x512xf32>
    %538 = arith.addf %534, %537 : vector<1x512xf32>
    %539 = vector.extract_strided_slice %538 {offsets = [0, 0], sizes = [1, 128], strides = [1, 1]} : vector<1x512xf32> to vector<1x128xf32>
    %cst_187 = arith.constant 5.000000e-01 : f32
    %540 = vector.broadcast %cst_187 : f32 to vector<1x128xf32>
    %541 = arith.mulf %540, %539 : vector<1x128xf32>
    %542 = math.tanh %541 : vector<1x128xf32>
    %cst_188 = arith.constant 1.000000e+00 : f32
    %543 = vector.broadcast %cst_188 : f32 to vector<1x128xf32>
    %544 = arith.addf %542, %543 : vector<1x128xf32>
    %cst_189 = arith.constant 5.000000e-01 : f32
    %545 = vector.broadcast %cst_189 : f32 to vector<1x128xf32>
    %546 = arith.mulf %545, %544 : vector<1x128xf32>
    %547 = vector.extract_strided_slice %538 {offsets = [0, 128], sizes = [1, 128], strides = [1, 1]} : vector<1x512xf32> to vector<1x128xf32>
    %cst_190 = arith.constant 5.000000e-01 : f32
    %548 = vector.broadcast %cst_190 : f32 to vector<1x128xf32>
    %549 = arith.mulf %548, %547 : vector<1x128xf32>
    %550 = math.tanh %549 : vector<1x128xf32>
    %cst_191 = arith.constant 1.000000e+00 : f32
    %551 = vector.broadcast %cst_191 : f32 to vector<1x128xf32>
    %552 = arith.addf %550, %551 : vector<1x128xf32>
    %cst_192 = arith.constant 5.000000e-01 : f32
    %553 = vector.broadcast %cst_192 : f32 to vector<1x128xf32>
    %554 = arith.mulf %553, %552 : vector<1x128xf32>
    %555 = vector.extract_strided_slice %538 {offsets = [0, 256], sizes = [1, 128], strides = [1, 1]} : vector<1x512xf32> to vector<1x128xf32>
    %556 = math.tanh %555 : vector<1x128xf32>
    %557 = vector.extract_strided_slice %538 {offsets = [0, 384], sizes = [1, 128], strides = [1, 1]} : vector<1x512xf32> to vector<1x128xf32>
    %cst_193 = arith.constant 5.000000e-01 : f32
    %558 = vector.broadcast %cst_193 : f32 to vector<1x128xf32>
    %559 = arith.mulf %558, %557 : vector<1x128xf32>
    %560 = math.tanh %559 : vector<1x128xf32>
    %cst_194 = arith.constant 1.000000e+00 : f32
    %561 = vector.broadcast %cst_194 : f32 to vector<1x128xf32>
    %562 = arith.addf %560, %561 : vector<1x128xf32>
    %cst_195 = arith.constant 5.000000e-01 : f32
    %563 = vector.broadcast %cst_195 : f32 to vector<1x128xf32>
    %564 = arith.mulf %563, %562 : vector<1x128xf32>
    %565 = arith.mulf %554, %531 : vector<1x128xf32>
    %566 = arith.mulf %546, %556 : vector<1x128xf32>
    %567 = arith.addf %565, %566 : vector<1x128xf32>
    %568 = math.tanh %567 : vector<1x128xf32>
    %569 = arith.mulf %564, %568 : vector<1x128xf32>
    %570 = vector.extract_strided_slice %317 {offsets = [7, 0], sizes = [1, 512], strides = [1, 1]} : vector<8x512xf32> to vector<1x512xf32>
    %571 = arith.truncf %569 : vector<1x128xf32> to vector<1x128xbf16>
    %c128_196 = arith.constant 128 : index
    %c0_197 = arith.constant 0 : index
    %572 = vector.load %arg9[%c128_196, %c0_197] : memref<256x512xbf16, #tpu.memory_space<vmem>>, vector<128x512xbf16>
    %cst_198 = arith.constant dense<0.000000e+00> : vector<1x512xf32>
    %573 = tpu.matmul %571, %572, %cst_198 {dimension_numbers = #tpu.dot_dimension_numbers<[1], [0], [0], [1], [0, 0, 1, 1], [], []>} : vector<1x128xbf16>, vector<128x512xbf16>, vector<1x512xf32> -> vector<1x512xf32>
    %574 = arith.addf %570, %573 : vector<1x512xf32>
    %575 = vector.extract_strided_slice %574 {offsets = [0, 0], sizes = [1, 128], strides = [1, 1]} : vector<1x512xf32> to vector<1x128xf32>
    %cst_199 = arith.constant 5.000000e-01 : f32
    %576 = vector.broadcast %cst_199 : f32 to vector<1x128xf32>
    %577 = arith.mulf %576, %575 : vector<1x128xf32>
    %578 = math.tanh %577 : vector<1x128xf32>
    %cst_200 = arith.constant 1.000000e+00 : f32
    %579 = vector.broadcast %cst_200 : f32 to vector<1x128xf32>
    %580 = arith.addf %578, %579 : vector<1x128xf32>
    %cst_201 = arith.constant 5.000000e-01 : f32
    %581 = vector.broadcast %cst_201 : f32 to vector<1x128xf32>
    %582 = arith.mulf %581, %580 : vector<1x128xf32>
    %583 = vector.extract_strided_slice %574 {offsets = [0, 128], sizes = [1, 128], strides = [1, 1]} : vector<1x512xf32> to vector<1x128xf32>
    %cst_202 = arith.constant 5.000000e-01 : f32
    %584 = vector.broadcast %cst_202 : f32 to vector<1x128xf32>
    %585 = arith.mulf %584, %583 : vector<1x128xf32>
    %586 = math.tanh %585 : vector<1x128xf32>
    %cst_203 = arith.constant 1.000000e+00 : f32
    %587 = vector.broadcast %cst_203 : f32 to vector<1x128xf32>
    %588 = arith.addf %586, %587 : vector<1x128xf32>
    %cst_204 = arith.constant 5.000000e-01 : f32
    %589 = vector.broadcast %cst_204 : f32 to vector<1x128xf32>
    %590 = arith.mulf %589, %588 : vector<1x128xf32>
    %591 = vector.extract_strided_slice %574 {offsets = [0, 256], sizes = [1, 128], strides = [1, 1]} : vector<1x512xf32> to vector<1x128xf32>
    %592 = math.tanh %591 : vector<1x128xf32>
    %593 = vector.extract_strided_slice %574 {offsets = [0, 384], sizes = [1, 128], strides = [1, 1]} : vector<1x512xf32> to vector<1x128xf32>
    %cst_205 = arith.constant 5.000000e-01 : f32
    %594 = vector.broadcast %cst_205 : f32 to vector<1x128xf32>
    %595 = arith.mulf %594, %593 : vector<1x128xf32>
    %596 = math.tanh %595 : vector<1x128xf32>
    %cst_206 = arith.constant 1.000000e+00 : f32
    %597 = vector.broadcast %cst_206 : f32 to vector<1x128xf32>
    %598 = arith.addf %596, %597 : vector<1x128xf32>
    %cst_207 = arith.constant 5.000000e-01 : f32
    %599 = vector.broadcast %cst_207 : f32 to vector<1x128xf32>
    %600 = arith.mulf %599, %598 : vector<1x128xf32>
    %601 = arith.mulf %590, %567 : vector<1x128xf32>
    %602 = arith.mulf %582, %592 : vector<1x128xf32>
    %603 = arith.addf %601, %602 : vector<1x128xf32>
    %604 = math.tanh %603 : vector<1x128xf32>
    %605 = arith.mulf %600, %604 : vector<1x128xf32>
    %606 = tpu.concatenate %353, %389, %425, %461, %497, %533, %569, %605 in 0 : vector<1x128xf32>, vector<1x128xf32>, vector<1x128xf32>, vector<1x128xf32>, vector<1x128xf32>, vector<1x128xf32>, vector<1x128xf32>, vector<1x128xf32> -> vector<8x128xf32>
    %c2_i32_208 = arith.constant 2 : i32
    %607 = tpu.memref_slice %arg13[%c2_i32_208] : memref<4x!tpu.dma_semaphore, #tpu.memory_space<semaphore_mem>> -> memref<1x!tpu.dma_semaphore, #tpu.memory_space<semaphore_mem>>
    %608 = tpu.memref_squeeze %607 : memref<1x!tpu.dma_semaphore, #tpu.memory_space<semaphore_mem>> -> memref<!tpu.dma_semaphore, #tpu.memory_space<semaphore_mem>>
    tpu.wait_dma2 semaphore(%608 : memref<!tpu.dma_semaphore, #tpu.memory_space<semaphore_mem>>) src(%arg6 : memref<128x128xbf16, #tpu.memory_space<any>>) dst(%arg11 : memref<128x128xbf16, #tpu.memory_space<vmem>>)
    %c3_i32_209 = arith.constant 3 : i32
    %609 = tpu.memref_slice %arg13[%c3_i32_209] : memref<4x!tpu.dma_semaphore, #tpu.memory_space<semaphore_mem>> -> memref<1x!tpu.dma_semaphore, #tpu.memory_space<semaphore_mem>>
    %610 = tpu.memref_squeeze %609 : memref<1x!tpu.dma_semaphore, #tpu.memory_space<semaphore_mem>> -> memref<!tpu.dma_semaphore, #tpu.memory_space<semaphore_mem>>
    tpu.wait_dma2 semaphore(%610 : memref<!tpu.dma_semaphore, #tpu.memory_space<semaphore_mem>>) src(%arg7 : memref<1x128xf32, #tpu.memory_space<any>>) dst(%arg12 : memref<1x128xf32, #tpu.memory_space<vmem>>)
    %611 = arith.truncf %606 : vector<8x128xf32> to vector<8x128xbf16>
    %c0_210 = arith.constant 0 : index
    %c0_211 = arith.constant 0 : index
    %612 = vector.load %arg11[%c0_210, %c0_211] : memref<128x128xbf16, #tpu.memory_space<vmem>>, vector<128x128xbf16>
    %cst_212 = arith.constant dense<0.000000e+00> : vector<8x128xf32>
    %613 = tpu.matmul %611, %612, %cst_212 {dimension_numbers = #tpu.dot_dimension_numbers<[1], [0], [0], [1], [0, 0, 1, 1], [], []>} : vector<8x128xbf16>, vector<128x128xbf16>, vector<8x128xf32> -> vector<8x128xf32>
    %c0_213 = arith.constant 0 : index
    %c0_214 = arith.constant 0 : index
    %614 = vector.load %arg12[%c0_213, %c0_214] : memref<1x128xf32, #tpu.memory_space<vmem>>, vector<1x128xf32>
    %615 = vector.broadcast %614 : vector<1x128xf32> to vector<8x128xf32>
    %616 = arith.addf %613, %615 : vector<8x128xf32>
    %c0_215 = arith.constant 0 : index
    %c0_216 = arith.constant 0 : index
    %617 = vector.load %arg8[%c0_215, %c0_216] : memref<8x128xf32, #tpu.memory_space<vmem>>, vector<8x128xf32>
    tpu.vector_store %arg8[%c0_215, %c0_216], %616 {strides = array<i32>} : memref<8x128xf32, #tpu.memory_space<vmem>>, vector<8x128xf32>,
    return
  }
}

</mosaic_0001>

<bundles_post_ra>
// kernel: forward.1
= control target key start
LH: loop header
LB: loop body
LE: loop exit
PB: predicated region body
PF: predicated region fallthrough
CT: control target
= control target key end

     0   :  { %13 = vsyncpa [#allocation8], 0  ;;  %s3433_s27 = smov [#allocation7]   ;;  %s4367_s0 = inlined_call_operand.vmem [shape: f32[8,128], index: 0, kind: input, shape index: {}]   ;;  %s4368_s1 = inlined_call_operand.vmem [shape: f32[8,128], index: 1, kind: input, shape index: {}]   ;;  %s4369_s2 = inlined_call_operand.hbm [shape: bf16[256,512], index: 2, kind: input, shape index: {}]   ;;  %s4370_s3 = inlined_call_operand.vmem [shape: f32[1,512], index: 3, kind: input, shape index: {}]   ;;  %s4371_s4 = inlined_call_operand.hbm [shape: bf16[256,512], index: 4, kind: input, shape index: {}]   ;;  %s4372_s5 = inlined_call_operand.vmem [shape: f32[1,512], index: 5, kind: input, shape index: {}]   ;;  %s4373_s6 = inlined_call_operand.vmem [shape: bf16[128,128], index: 6, kind: input, shape index: {}]   ;;  %s4374_s7 = inlined_call_operand.vmem [shape: f32[1,128], index: 7, kind: input, shape index: {}]   ;;  %s4375_s8 = inlined_call_operand.vmem [shape: f32[8,128], index: 8, kind: output, shape index: {}]  }
   0x1   :  { %s23_s28 = sshll.u32 %s3433_s27, 4  ;;  %s3401_s9 = scalar_lea.hbm %s4369_s2, 8192  ;;  %s24_s28 = int_to_ptr.vmem [resolvable:$true] %s23_s28 }
   0x2   :  { %p3402_p0 = scmp.ne.s32.totalorder %s4369_s2, %s3401_s9  ;;  %p3405_p1 = scmp.lt.u32.totalorder %s3401_s9, %s4369_s2 }
   0x4   :  { %p3407_p2 = pnand %p3405_p1, %p3402_p0 }
   0x6   :  { %3410 = shalt.err (!%p3407_p2)
}
   0x7   :  { %s3411_s14 = scalar_lea.vmem %s24_s28, 8192  ;;  %p3416_p4 = scmp.lt.s32.totalorder %s24_s28, %s24_s28 }
   0x8   :  { %p3412_p3 = scmp.ne.s32.totalorder %s24_s28, %s3411_s14  ;;  %p3417_p5 = scmp.lt.s32.totalorder %s3411_s14, %s3411_s14 }
   0xa   :  { %p3418_p6 = por %p3417_p5, %p3416_p4 }
   0xc   :  { %p3419_p7 = pnand %p3418_p6, %p3412_p3 }
   0xe   :  { %3422 = shalt.err (!%p3419_p7)
}
   0xf   :  { %s3434_s15 = smov 256   ;;  %s3435_s16 = smov 16  }
  0x10   :  { %29 = dma.hbm_to_vmem [thread:$0]  %s4369_s2, 8192, %s24_s28, [#allocation8], %s3434_s15, %s3434_s15, %s3435_s16  }
  0x11   :  { %3423 = dma.done.wait [#allocation8], 8192  }
  0x12   :  { %3424 = vsyncadd [#allocation8], 4294959104  ;;  %s40_s19 = sld [smem:[#allocation0]]   ;;  %s3436_s20 = smov 512  }
  0x13   :  { %52 = sst [smem:[#allocation10]] %s3436_s20  ;;  %s3437_s21 = smov 4  }
  0x14   :  { %54 = sst [smem:[#allocation10 + $0x1]] %s3436_s20  ;;  %s3438_s22 = smov 64  }
  0x15   :  { %56 = sst [smem:[#allocation10 + $0x2]] %s3437_s21  ;;  %s3439_s23 = smov 128  }
  0x16   :  { %58 = sst [smem:[#allocation10 + $0x3]] %s3438_s22  ;;  %s3440_s24 = smov 2  }
  0x17   :  { %60 = sst [smem:[#allocation10 + $0x4]] %s3439_s23  ;;  %s3441_s25 = smov [#allocation2]  }
  0x18   :  { %62 = sst [smem:[#allocation10 + $0x5]] %s3440_s24  ;;  %s48_s26 = sshll.u32 %s3441_s25, 4  ;;  %s49_s26 = int_to_ptr.vmem [resolvable:$true] %s48_s26 }
  0x19   :  { %s2967_s27 = sshll.u32 %s40_s19, 26  ;;  %64 = sst [smem:[#allocation10 + $0x6]] %s3434_s15 }
  0x1a   :  { %s2968_s29 = sadd.s32 134217728, %s2967_s27  ;;  %66 = sst [smem:[#allocation10 + $0x7]] %s3438_s22 }
  0x1b   :  { %68 = sst [smem:[#allocation10 + $0x8]] %s3437_s21  ;;  %s3442_s2 = smov [#allocation6]  }
  0x1c   :  { %s3443_s28 = smov [#allocation9]  }
  0x1d   :  { %70 = dma.general %s4371_s4, 8192, %s49_s26, %s3442_s2, %s3443_s28, [#allocation10], %s2968_s29, 0  }
  0x1e   :  { %v89_v0 = vld [vmem:[%s4372_s5] sm:$0xf] }
  0x1f   :  { %90 = vst [vmem:[#allocation3] sm:$0xf] %v89_v0 }
  0x20   :  { %115 = vsyncadd [#allocation6 + $0x1], 64  ;;  %v3513_v1 = vld [vmem:[%s4373_s6] sm:$0xff]  ;;  %v3518_v2 = vld [vmem:[%s4373_s6 + $0x8] sm:$0xff] }
  0x21   :  { %v3523_v3 = vld [vmem:[%s4373_s6 + $0x10] sm:$0xff]  ;;  %v3528_v4 = vld [vmem:[%s4373_s6 + $0x18] sm:$0xff]  ;;  %v3533_v5 = vld [vmem:[%s4373_s6 + $0x20] sm:$0xff] }
  0x22   :  { %v3538_v6 = vld [vmem:[%s4373_s6 + $0x28] sm:$0xff]  ;;  %v3543_v7 = vld [vmem:[%s4373_s6 + $0x30] sm:$0xff]  ;;  %v3548_v8 = vld [vmem:[%s4373_s6 + $0x38] sm:$0xff] }
  0x23   :  { %4382 = vst [vmem:[#allocation19_spill] sm:$0xff] %v3543_v7  ;;  %4383 = vst [vmem:[#allocation20_spill] sm:$0xff] %v3548_v8 }
  0x24   :  { %172 = vsyncadd [#allocation6 + $0x2], 1024  ;;  %v191_v9 = vld [vmem:[%s4374_s7] sm:$0x1] }
  0x25   :  { %192 = vst [vmem:[#allocation5] sm:$0x1] %v191_v9 }
  0x26   :  { %217 = vsyncadd [#allocation6 + $0x3], 16  ;;  %v3081_v10 = vld [vmem:[#allocation7 + $0x4] ss:$16 sps:$4 sm:$0xff]   ;;  %v4379_v11 = vmov 0   ;;  %v218_v42 = vld [vmem:[%s4367_s0] sm:$0xff] }
  0x27   :  { %466 = vmatprep.mubr.bf16.mxu0 %v4379_v11  ;;  %507 = vmatprep.mubr.bf16.mxu1 %v4379_v11  ;;  %v3083_v12 = vld [vmem:[#allocation7 + $0xc] ss:$16 sps:$4 sm:$0xff]   ;;  %v3085_v13 = vld [vmem:[#allocation7] ss:$16 sps:$4 sm:$0xff]   ;;  %v3086_v14 = vld [vmem:[#allocation7 + $0x8] ss:$16 sps:$4 sm:$0xff]   ;;  %v219_v46 = vpack.c.bf16 %v218_v42, %v218_v42 }
  0x28   :  { %434 = vmatprep.subr.bf16.mxu0 %v3081_v10  ;;  %v3087_v15 = vld [vmem:[#allocation7 + $0x24] ss:$16 sps:$4 sm:$0xff]   ;;  %475 = vmatprep.subr.bf16.mxu1 %v3083_v12  ;;  %v3089_v16 = vld [vmem:[#allocation7 + $0x2c] ss:$16 sps:$4 sm:$0xff]   ;;  %v3091_v17 = vld [vmem:[#allocation7 + $0x20] ss:$16 sps:$4 sm:$0xff]  }
  0x29   :  { %435 = vmatpush1.bf16.msra.mxu0 %v3085_v13  ;;  %476 = vmatpush1.bf16.msra.mxu1 %v3086_v14  ;;  %v3092_v18 = vld [vmem:[#allocation7 + $0x28] ss:$16 sps:$4 sm:$0xff]   ;;  %v3093_v19 = vld [vmem:[#allocation7 + $0x44] ss:$16 sps:$4 sm:$0xff]   ;;  %v3095_v20 = vld [vmem:[#allocation7 + $0x4c] ss:$16 sps:$4 sm:$0xff]  }
  0x2a   :  { %436 = vmatprep.subr.bf16.mxu0 %v3087_v15  ;;  %477 = vmatprep.subr.bf16.mxu1 %v3089_v16  ;;  %v3097_v21 = vld [vmem:[#allocation7 + $0x40] ss:$16 sps:$4 sm:$0xff]   ;;  %v3098_v22 = vld [vmem:[#allocation7 + $0x48] ss:$16 sps:$4 sm:$0xff]   ;;  %v3099_v23 = vld [vmem:[#allocation7 + $0x64] ss:$16 sps:$4 sm:$0xff]  }
  0x2b   :  { %v3101_v24 = vld [vmem:[#allocation7 + $0x6c] ss:$16 sps:$4 sm:$0xff]   ;;  %v3103_v25 = vld [vmem:[#allocation7 + $0x60] ss:$16 sps:$4 sm:$0xff]   ;;  %v3104_v26 = vld [vmem:[#allocation7 + $0x68] ss:$16 sps:$4 sm:$0xff]  }
  0x2c   :  { %v3105_v27 = vld [vmem:[#allocation7 + $0x84] ss:$16 sps:$4 sm:$0xff]   ;;  %v3107_v28 = vld [vmem:[#allocation7 + $0x8c] ss:$16 sps:$4 sm:$0xff]   ;;  %v3109_v29 = vld [vmem:[#allocation7 + $0x80] ss:$16 sps:$4 sm:$0xff]  }
  0x2d   :  { %437 = vmatpush1.bf16.msra.mxu0 %v3091_v17  ;;  %478 = vmatpush1.bf16.msra.mxu1 %v3092_v18  ;;  %v3110_v30 = vld [vmem:[#allocation7 + $0x88] ss:$16 sps:$4 sm:$0xff]   ;;  %v3111_v31 = vld [vmem:[#allocation7 + $0xa4] ss:$16 sps:$4 sm:$0xff]   ;;  %v3113_v32 = vld [vmem:[#allocation7 + $0xac] ss:$16 sps:$4 sm:$0xff]  }
  0x2e   :  { %438 = vmatprep.subr.bf16.mxu0 %v3093_v19  ;;  %479 = vmatprep.subr.bf16.mxu1 %v3095_v20  ;;  %v3115_v33 = vld [vmem:[#allocation7 + $0xa0] ss:$16 sps:$4 sm:$0xff]   ;;  %v3116_v34 = vld [vmem:[#allocation7 + $0xa8] ss:$16 sps:$4 sm:$0xff]   ;;  %v3117_v35 = vld [vmem:[#allocation7 + $0xc4] ss:$16 sps:$4 sm:$0xff]  }
  0x2f   :  { %v3119_v36 = vld [vmem:[#allocation7 + $0xcc] ss:$16 sps:$4 sm:$0xff]   ;;  %v3121_v37 = vld [vmem:[#allocation7 + $0xc0] ss:$16 sps:$4 sm:$0xff]   ;;  %v3122_v38 = vld [vmem:[#allocation7 + $0xc8] ss:$16 sps:$4 sm:$0xff]  }
  0x30   :  { %v3123_v39 = vld [vmem:[#allocation7 + $0xe4] ss:$16 sps:$4 sm:$0xff]   ;;  %v3125_v40 = vld [vmem:[#allocation7 + $0xec] ss:$16 sps:$4 sm:$0xff]   ;;  %v3127_v41 = vld [vmem:[#allocation7 + $0xe0] ss:$16 sps:$4 sm:$0xff]  }
  0x31   :  { %439 = vmatpush1.bf16.msra.mxu0 %v3097_v21  ;;  %480 = vmatpush1.bf16.msra.mxu1 %v3098_v22  ;;  %v3128_v43 = vld [vmem:[#allocation7 + $0xe8] ss:$16 sps:$4 sm:$0xff]   ;;  %v3558_v44 = vld [vmem:[#allocation7 + $0x104] ss:$16 sps:$4 sm:$0xff]   ;;  %v3560_v45 = vld [vmem:[#allocation7 + $0x10c] ss:$16 sps:$4 sm:$0xff]  }
  0x32   :  { %440 = vmatprep.subr.bf16.mxu0 %v3099_v23  ;;  %481 = vmatprep.subr.bf16.mxu1 %v3101_v24  ;;  %v3562_v47 = vld [vmem:[#allocation7 + $0x100] ss:$16 sps:$4 sm:$0xff]   ;;  %v3564_v48 = vld [vmem:[#allocation7 + $0x108] ss:$16 sps:$4 sm:$0xff]   ;;  %v3567_v49 = vld [vmem:[#allocation7 + $0x124] ss:$16 sps:$4 sm:$0xff]  }
  0x33   :  { %v3570_v50 = vld [vmem:[#allocation7 + $0x12c] ss:$16 sps:$4 sm:$0xff]   ;;  %v3573_v51 = vld [vmem:[#allocation7 + $0x120] ss:$16 sps:$4 sm:$0xff]   ;;  %v3577_v52 = vld [vmem:[#allocation7 + $0x128] ss:$16 sps:$4 sm:$0xff]  }
  0x34   :  { %v3579_v53 = vld [vmem:[#allocation7 + $0x144] ss:$16 sps:$4 sm:$0xff]   ;;  %v3582_v54 = vld [vmem:[#allocation7 + $0x14c] ss:$16 sps:$4 sm:$0xff]   ;;  %v3587_v55 = vld [vmem:[#allocation7 + $0x140] ss:$16 sps:$4 sm:$0xff]  }
  0x35   :  { %441 = vmatpush1.bf16.msra.mxu0 %v3103_v25  ;;  %482 = vmatpush1.bf16.msra.mxu1 %v3104_v26  ;;  %v3589_v56 = vld [vmem:[#allocation7 + $0x148] ss:$16 sps:$4 sm:$0xff]   ;;  %v3593_v57 = vld [vmem:[#allocation7 + $0x164] ss:$16 sps:$4 sm:$0xff]   ;;  %v3596_v58 = vld [vmem:[#allocation7 + $0x16c] ss:$16 sps:$4 sm:$0xff]  }
  0x36   :  { %442 = vmatprep.subr.bf16.mxu0 %v3105_v27  ;;  %483 = vmatprep.subr.bf16.mxu1 %v3107_v28  ;;  %v3599_v59 = vld [vmem:[#allocation7 + $0x160] ss:$16 sps:$4 sm:$0xff]   ;;  %v3603_v60 = vld [vmem:[#allocation7 + $0x168] ss:$16 sps:$4 sm:$0xff]   ;;  %v3605_v61 = vld [vmem:[#allocation7 + $0x184] ss:$16 sps:$4 sm:$0xff]  }
  0x37   :  { %v3608_v62 = vld [vmem:[#allocation7 + $0x18c] ss:$16 sps:$4 sm:$0xff]   ;;  %v3611_v63 = vld [vmem:[#allocation7 + $0x180] ss:$16 sps:$4 sm:$0xff]   ;;  %v3615_v0 = vld [vmem:[#allocation7 + $0x188] ss:$16 sps:$4 sm:$0xff]  }
  0x38   :  { %v3617_v9 = vld [vmem:[#allocation7 + $0x1a4] ss:$16 sps:$4 sm:$0xff]   ;;  %v3620_v10 = vld [vmem:[#allocation7 + $0x1ac] ss:$16 sps:$4 sm:$0xff]   ;;  %v3623_v12 = vld [vmem:[#allocation7 + $0x1a0] ss:$16 sps:$4 sm:$0xff]  }
  0x39   :  { %443 = vmatpush1.bf16.msra.mxu0 %v3109_v29  ;;  %484 = vmatpush1.bf16.msra.mxu1 %v3110_v30  ;;  %v3627_v13 = vld [vmem:[#allocation7 + $0x1a8] ss:$16 sps:$4 sm:$0xff]   ;;  %v3629_v14 = vld [vmem:[#allocation7 + $0x1c4] ss:$16 sps:$4 sm:$0xff]   ;;  %v3632_v15 = vld [vmem:[#allocation7 + $0x1cc] ss:$16 sps:$4 sm:$0xff]   ;;  %v254_v30 = vlaneseq }
  0x3a   :  { %444 = vmatprep.subr.bf16.mxu0 %v3111_v31  ;;  %485 = vmatprep.subr.bf16.mxu1 %v3113_v32  ;;  %v3635_v16 = vld [vmem:[#allocation7 + $0x1c0] ss:$16 sps:$4 sm:$0xff]   ;;  %v3639_v17 = vld [vmem:[#allocation7 + $0x1c8] ss:$16 sps:$4 sm:$0xff]   ;;  %v3641_v18 = vld [vmem:[#allocation7 + $0x1e4] ss:$16 sps:$4 sm:$0xff]  }
  0x3b   :  { %v3644_v19 = vld [vmem:[#allocation7 + $0x1ec] ss:$16 sps:$4 sm:$0xff]   ;;  %v3647_v20 = vld [vmem:[#allocation7 + $0x1e0] ss:$16 sps:$4 sm:$0xff]   ;;  %v3651_v21 = vld [vmem:[#allocation7 + $0x1e8] ss:$16 sps:$4 sm:$0xff]  }
  0x3c   :  { %v3694_v31 = vshrl.u32 %v254_v30, 7 }
  0x3d   :  { %445 = vmatpush1.bf16.msra.mxu0 %v3115_v33  ;;  %486 = vmatpush1.bf16.msra.mxu1 %v3116_v34  ;;  %v252_v33 = vld [vmem:[%s4370_s3] sm:$0xf] }
  0x3e   :  { %446 = vmatprep.subr.bf16.mxu0 %v3117_v35  ;;  %487 = vmatprep.subr.bf16.mxu1 %v3119_v36  ;;  %v4378_v32 = vsub.s32 0, %v3694_v31  ;;  %v4377_v34 = vsub.s32 1, %v3694_v31  ;;  %v4376_v36 = vsub.s32 2, %v3694_v31 }
  0x40   :  { %v257_v35 = vrot.slane %v252_v33, %v4378_v32 }
  0x41   :  { %447 = vmatpush1.bf16.msra.mxu0 %v3121_v37  ;;  %488 = vmatpush1.bf16.msra.mxu1 %v3122_v38  ;;  %v261_v37 = vrot.slane %v252_v33, %v4377_v34 }
  0x42   :  { %448 = vmatprep.subr.bf16.mxu0 %v3123_v39  ;;  %489 = vmatprep.subr.bf16.mxu1 %v3125_v40  ;;  %v265_v39 = vrot.slane %v252_v33, %v4376_v36  ;;  %v4381_v40 = vsub.s32 3, %v3694_v31 }
  0x45   :  { %449 = vmatpush1.bf16.msra.mxu0 %v3127_v41  ;;  %490 = vmatpush1.bf16.msra.mxu1 %v3128_v43 }
  0x46   :  { %708 = vmatprep.subr.bf16.mxu0 %v3558_v44  ;;  %749 = vmatprep.subr.bf16.mxu1 %v3560_v45 }
  0x48   :  { %467 = vmatmul.mubr.bf16.vlgmr.msra.gmra.mrb[0].mxu0 %v219_v46  ;;  %508 = vmatmul.mubr.bf16.vlgmr.msra.gmra.mrb[0].mxu1 %v219_v46 }
  0x49   :  { %709 = vmatpush1.bf16.msra.mxu0 %v3562_v47  ;;  %750 = vmatpush1.bf16.msra.mxu1 %v3564_v48 }
  0x4a   :  { %710 = vmatprep.subr.bf16.mxu0 %v3567_v49  ;;  %751 = vmatprep.subr.bf16.mxu1 %v3570_v50 }
  0x4b   :  { %740 = vmatprep.mubr.bf16.mxu0 %v4379_v11  ;;  %781 = vmatprep.mubr.bf16.mxu1 %v4379_v11 }
  0x4d   :  { %711 = vmatpush1.bf16.msra.mxu0 %v3573_v51  ;;  %752 = vmatpush1.bf16.msra.mxu1 %v3577_v52 }
  0x4e   :  { %712 = vmatprep.subr.bf16.mxu0 %v3579_v53  ;;  %753 = vmatprep.subr.bf16.mxu1 %v3582_v54 }
  0x51   :  { %713 = vmatpush1.bf16.msra.mxu0 %v3587_v55  ;;  %754 = vmatpush1.bf16.msra.mxu1 %v3589_v56 }
  0x52   :  { %714 = vmatprep.subr.bf16.mxu0 %v3593_v57  ;;  %755 = vmatprep.subr.bf16.mxu1 %v3596_v58 }
  0x55   :  { %715 = vmatpush1.bf16.msra.mxu0 %v3599_v59  ;;  %756 = vmatpush1.bf16.msra.mxu1 %v3603_v60 }
  0x56   :  { %716 = vmatprep.subr.bf16.mxu0 %v3605_v61  ;;  %757 = vmatprep.subr.bf16.mxu1 %v3608_v62 }
  0x59   :  { %717 = vmatpush1.bf16.msra.mxu0 %v3611_v63  ;;  %758 = vmatpush1.bf16.msra.mxu1 %v3615_v0 }
  0x5a   :  { %718 = vmatprep.subr.bf16.mxu0 %v3617_v9  ;;  %759 = vmatprep.subr.bf16.mxu1 %v3620_v10 }
  0x5d   :  { %719 = vmatpush1.bf16.msra.mxu0 %v3623_v12  ;;  %760 = vmatpush1.bf16.msra.mxu1 %v3627_v13 }
  0x5e   :  { %720 = vmatprep.subr.bf16.mxu0 %v3629_v14  ;;  %761 = vmatprep.subr.bf16.mxu1 %v3632_v15 }
  0x61   :  { %721 = vmatpush1.bf16.msra.mxu0 %v3635_v16  ;;  %762 = vmatpush1.bf16.msra.mxu1 %v3639_v17 }
  0x62   :  { %722 = vmatprep.subr.bf16.mxu0 %v3641_v18  ;;  %763 = vmatprep.subr.bf16.mxu1 %v3644_v19 }
  0x65   :  { %723 = vmatpush1.bf16.msra.mxu0 %v3647_v20  ;;  %764 = vmatpush1.bf16.msra.mxu1 %v3651_v21 }
  0x66   :  { %813 = vmatprep.subr.bf16.mxu0 %v3558_v44  ;;  %854 = vmatprep.subr.bf16.mxu1 %v3560_v45 }
  0x68   :  { %741 = vmatmul.mubr.bf16.vlgmr.msra.gmra.mrb[4].mxu0 %v4379_v11  ;;  %782 = vmatmul.mubr.bf16.vlgmr.msra.gmra.mrb[4].mxu1 %v4379_v11 }
  0x69   :  { %814 = vmatpush1.bf16.msra.mxu0 %v3562_v47  ;;  %855 = vmatpush1.bf16.msra.mxu1 %v3564_v48 }
  0x6a   :  { %815 = vmatprep.subr.bf16.mxu0 %v3567_v49  ;;  %856 = vmatprep.subr.bf16.mxu1 %v3570_v50 }
  0x6b   :  { %845 = vmatprep.mubr.bf16.mxu0 %v4379_v11  ;;  %886 = vmatprep.mubr.bf16.mxu1 %v4379_v11 }
  0x6d   :  { %816 = vmatpush1.bf16.msra.mxu0 %v3573_v51  ;;  %857 = vmatpush1.bf16.msra.mxu1 %v3577_v52 }
  0x6e   :  { %817 = vmatprep.subr.bf16.mxu0 %v3579_v53  ;;  %858 = vmatprep.subr.bf16.mxu1 %v3582_v54 }
  0x71   :  { %818 = vmatpush1.bf16.msra.mxu0 %v3587_v55  ;;  %859 = vmatpush1.bf16.msra.mxu1 %v3589_v56 }
  0x72   :  { %819 = vmatprep.subr.bf16.mxu0 %v3593_v57  ;;  %860 = vmatprep.subr.bf16.mxu1 %v3596_v58 }
  0x75   :  { %820 = vmatpush1.bf16.msra.mxu0 %v3599_v59  ;;  %861 = vmatpush1.bf16.msra.mxu1 %v3603_v60 }
  0x76   :  { %821 = vmatprep.subr.bf16.mxu0 %v3605_v61  ;;  %862 = vmatprep.subr.bf16.mxu1 %v3608_v62 }
  0x79   :  { %822 = vmatpush1.bf16.msra.mxu0 %v3611_v63  ;;  %863 = vmatpush1.bf16.msra.mxu1 %v3615_v0 }
  0x7a   :  { %823 = vmatprep.subr.bf16.mxu0 %v3617_v9  ;;  %864 = vmatprep.subr.bf16.mxu1 %v3620_v10 }
  0x7d   :  { %824 = vmatpush1.bf16.msra.mxu0 %v3623_v12  ;;  %865 = vmatpush1.bf16.msra.mxu1 %v3627_v13 }
  0x7e   :  { %825 = vmatprep.subr.bf16.mxu0 %v3629_v14  ;;  %866 = vmatprep.subr.bf16.mxu1 %v3632_v15 }
  0x81   :  { %826 = vmatpush1.bf16.msra.mxu0 %v3635_v16  ;;  %867 = vmatpush1.bf16.msra.mxu1 %v3639_v17 }
  0x82   :  { %827 = vmatprep.subr.bf16.mxu0 %v3641_v18  ;;  %868 = vmatprep.subr.bf16.mxu1 %v3644_v19 }
  0x85   :  { %828 = vmatpush1.bf16.msra.mxu0 %v3647_v20  ;;  %869 = vmatpush1.bf16.msra.mxu1 %v3651_v21 }
  0x86   :  { %937 = vmatprep.subr.bf16.mxu0 %v3558_v44  ;;  %978 = vmatprep.subr.bf16.mxu1 %v3560_v45 }
 0x11b   :  { %v468_v22 = vpop.f32.mrb[0].mxu0  ;;  %v509_v24 = vpop.f32.mrb[0].mxu1 }
 0x11c   :  { %v470_v23 = vpop.f32.mrb[1].mxu0  ;;  %v511_v26 = vpop.f32.mrb[1].mxu1  ;;  %v3706_v38 = vadd.f32 %v468_v22, %v257_v35  ;;  %v3715_v30 = vadd.f32 %v509_v24, %v265_v39  ;;  %v269_v22 = vrot.slane %v252_v33, %v4381_v40 }
 0x11d   :  { %v472_v25 = vpop.f32.mrb[2].mxu0  ;;  %v513_v28 = vpop.f32.mrb[2].mxu1  ;;  %v3711_v41 = vadd.f32 %v470_v23, %v261_v37 }
 0x11e   :  { %v473_v27 = vpop.f32.mrb[3].mxu0  ;;  %v514_v29 = vpop.f32.mrb[3].mxu1 }
 0x13b   :  { %v742_v42 = vpop.f32.mrb[4].mxu0  ;;  %v783_v46 = vpop.f32.mrb[4].mxu1 }
 0x13c   :  { %v790_v43 = vadd.f32 %v742_v42, %v3706_v38  ;;  %v744_v25 = vpop.f32.mrb[5].mxu0  ;;  %v785_v28 = vpop.f32.mrb[5].mxu1  ;;  %v792_v37 = vadd.f32 %v783_v46, %v3715_v30  ;;  %v3720_v42 = vadd.f32 %v511_v26, %v269_v22 }
 0x13d   :  { %v791_v27 = vadd.f32 %v744_v25, %v3711_v41  ;;  %v746_v29 = vpop.f32.mrb[6].mxu0  ;;  %v787_v34 = vpop.f32.mrb[6].mxu1 }
 0x13e   :  { %v794_v35 = vmul.f32 0.5, %v790_v43  ;;  %v747_v36 = vpop.f32.mrb[7].mxu0  ;;  %v788_v23 = vpop.f32.mrb[7].mxu1  ;;  %v793_v25 = vadd.f32 %v785_v28, %v3720_v42 }
 0x13f   :  { %v798_v32 = vmul.f32 0.5, %v791_v27 }
 0x140   :  { %3177 = vtanh.f32 %v794_v35  ;;  %v803_v29 = vmul.f32 0.5, %v793_v25 }
 0x141   :  { %3179 = vtanh.f32 %v798_v32 }
 0x142   :  { %3181 = vtanh.f32 %v792_v37 }
 0x143   :  { %3183 = vtanh.f32 %v803_v29 }
 0x14a   :  { %v3178_v24 = vpop.eup %3177 }
 0x14b   :  { %v3180_v39 = vpop.eup %3179  ;;  %v796_v11 = vadd.f32 1.0, %v3178_v24 }
 0x14c   :  { %v800_v8 = vadd.f32 1.0, %v3180_v39  ;;  %v3182_v36 = vpop.eup %3181 }
 0x14d   :  { %v797_v33 = vmul.f32 0.5, %v796_v11  ;;  %v3184_v26 = vpop.eup %3183 }
 0x14e   :  { %v801_v34 = vmul.f32 0.5, %v800_v8  ;;  %v805_v32 = vadd.f32 1.0, %v3184_v26  ;;  %v4384_v8 = vmov 0  }
 0x14f   :  { %v808_v43 = vmul.f32 %v3182_v36, %v797_v33 }
 0x150   :  { %v807_v27 = vmul.f32 0.0, %v801_v34  ;;  %v806_v46 = vmul.f32 0.5, %v805_v32 }
 0x152   :  { %v3723_v35 = vadd.f32 %v808_v43, %v807_v27 }
 0x154   :  { %3185 = vtanh.f32 %v3723_v35 }
 0x15e   :  { %v3186_v22 = vpop.eup %3185 }
 0x15f   :  { %v811_v28 = vmul.f32 %v3186_v22, %v806_v46 }
 0x161   :  { %v812_v23 = vpack.c.bf16 %v811_v28, %v811_v28 }
 0x163   :  { %846 = vmatmul.mubr.bf16.vlgmr.msra.gmra.mrb[8].mxu0 %v812_v23  ;;  %887 = vmatmul.mubr.bf16.vlgmr.msra.gmra.mrb[8].mxu1 %v812_v23 }
 0x164   :  { %938 = vmatpush1.bf16.msra.mxu0 %v3562_v47  ;;  %979 = vmatpush1.bf16.msra.mxu1 %v3564_v48 }
 0x165   :  { %939 = vmatprep.subr.bf16.mxu0 %v3567_v49  ;;  %980 = vmatprep.subr.bf16.mxu1 %v3570_v50 }
 0x166   :  { %969 = vmatprep.mubr.bf16.mxu0 %v4384_v8  ;;  %1010 = vmatprep.mubr.bf16.mxu1 %v4384_v8 }
 0x168   :  { %940 = vmatpush1.bf16.msra.mxu0 %v3573_v51  ;;  %981 = vmatpush1.bf16.msra.mxu1 %v3577_v52 }
 0x169   :  { %941 = vmatprep.subr.bf16.mxu0 %v3579_v53  ;;  %982 = vmatprep.subr.bf16.mxu1 %v3582_v54 }
 0x16c   :  { %942 = vmatpush1.bf16.msra.mxu0 %v3587_v55  ;;  %983 = vmatpush1.bf16.msra.mxu1 %v3589_v56 }
 0x16d   :  { %943 = vmatprep.subr.bf16.mxu0 %v3593_v57  ;;  %984 = vmatprep.subr.bf16.mxu1 %v3596_v58 }
 0x170   :  { %944 = vmatpush1.bf16.msra.mxu0 %v3599_v59  ;;  %985 = vmatpush1.bf16.msra.mxu1 %v3603_v60 }
 0x171   :  { %945 = vmatprep.subr.bf16.mxu0 %v3605_v61  ;;  %986 = vmatprep.subr.bf16.mxu1 %v3608_v62 }
 0x174   :  { %946 = vmatpush1.bf16.msra.mxu0 %v3611_v63  ;;  %987 = vmatpush1.bf16.msra.mxu1 %v3615_v0 }
 0x175   :  { %947 = vmatprep.subr.bf16.mxu0 %v3617_v9  ;;  %988 = vmatprep.subr.bf16.mxu1 %v3620_v10 }
 0x178   :  { %948 = vmatpush1.bf16.msra.mxu0 %v3623_v12  ;;  %989 = vmatpush1.bf16.msra.mxu1 %v3627_v13 }
 0x179   :  { %949 = vmatprep.subr.bf16.mxu0 %v3629_v14  ;;  %990 = vmatprep.subr.bf16.mxu1 %v3632_v15 }
 0x17c   :  { %950 = vmatpush1.bf16.msra.mxu0 %v3635_v16  ;;  %991 = vmatpush1.bf16.msra.mxu1 %v3639_v17 }
 0x17d   :  { %951 = vmatprep.subr.bf16.mxu0 %v3641_v18  ;;  %992 = vmatprep.subr.bf16.mxu1 %v3644_v19 }
 0x180   :  { %952 = vmatpush1.bf16.msra.mxu0 %v3647_v20  ;;  %993 = vmatpush1.bf16.msra.mxu1 %v3651_v21 }
 0x181   :  { %1060 = vmatprep.subr.bf16.mxu0 %v3558_v44  ;;  %1101 = vmatprep.subr.bf16.mxu1 %v3560_v45 }
 0x236   :  { %v847_v11 = vpop.f32.mrb[8].mxu0  ;;  %v888_v37 = vpop.f32.mrb[8].mxu1 }
 0x237   :  { %v899_v25 = vrot.slane %v847_v11, 7  ;;  %v849_v29 = vpop.f32.mrb[9].mxu0  ;;  %v890_v24 = vpop.f32.mrb[9].mxu1  ;;  %v901_v43 = vrot.slane %v888_v37, 7 }
 0x238   :  { %v900_v39 = vrot.slane %v849_v29, 7  ;;  %v851_v33 = vpop.f32.mrb[10].mxu0  ;;  %v892_v36 = vpop.f32.mrb[10].mxu1  ;;  %v902_v23 = vrot.slane %v890_v24, 7 }
 0x239   :  { %v907_v34 = vadd.f32 %v899_v25, %v3706_v38  ;;  %v852_v27 = vpop.f32.mrb[11].mxu0  ;;  %v893_v26 = vpop.f32.mrb[11].mxu1  ;;  %v909_v28 = vadd.f32 %v901_v43, %v3715_v30 }
 0x23a   :  { %v908_v32 = vadd.f32 %v900_v39, %v3711_v41  ;;  %v910_v11 = vadd.f32 %v902_v23, %v3720_v42  ;;  %v925_v39 = vrot.slane %v3723_v35, 7 }
 0x23b   :  { %v911_v46 = vmul.f32 0.5, %v907_v34 }
 0x23c   :  { %v915_v22 = vmul.f32 0.5, %v908_v32  ;;  %v920_v29 = vmul.f32 0.5, %v910_v11 }
 0x23d   :  { %3187 = vtanh.f32 %v911_v46 }
 0x23e   :  { %3189 = vtanh.f32 %v915_v22 }
 0x23f   :  { %3191 = vtanh.f32 %v909_v28 }
 0x240   :  { %3193 = vtanh.f32 %v920_v29 }
 0x247   :  { %v3188_v33 = vpop.eup %3187 }
 0x248   :  { %v3190_v36 = vpop.eup %3189  ;;  %v913_v40 = vadd.f32 1.0, %v3188_v33 }
 0x249   :  { %v917_v25 = vadd.f32 1.0, %v3190_v36  ;;  %v3192_v27 = vpop.eup %3191 }
 0x24a   :  { %v914_v37 = vmul.f32 0.5, %v913_v40  ;;  %v3194_v24 = vpop.eup %3193 }
 0x24b   :  { %v918_v34 = vmul.f32 0.5, %v917_v25  ;;  %v922_v43 = vadd.f32 1.0, %v3194_v24 }
 0x24c   :  { %v928_v26 = vmul.f32 %v3192_v27, %v914_v37 }
 0x24d   :  { %v927_v32 = vmul.f32 %v925_v39, %v918_v34  ;;  %v923_v22 = vmul.f32 0.5, %v922_v43 }
 0x24f   :  { %v3765_v46 = vadd.f32 %v928_v26, %v927_v32 }
 0x251   :  { %3195 = vtanh.f32 %v3765_v46 }
 0x25b   :  { %v3196_v28 = vpop.eup %3195 }
 0x25c   :  { %v931_v23 = vmul.f32 %v3196_v28, %v923_v22 }
 0x25e   :  { %v932_v11 = vpack.c.bf16 %v931_v23, %v931_v23 }
 0x260   :  { %v934_v33 = vshrl.u32 %v932_v11, 16 }
 0x262   :  { %970 = vmatmul.mubr.bf16.vlgmr.msra.gmra.mrb[12].mxu0 %v934_v33  ;;  %1011 = vmatmul.mubr.bf16.vlgmr.msra.gmra.mrb[12].mxu1 %v934_v33 }
 0x263   :  { %1061 = vmatpush1.bf16.msra.mxu0 %v3562_v47  ;;  %1102 = vmatpush1.bf16.msra.mxu1 %v3564_v48 }
 0x264   :  { %1062 = vmatprep.subr.bf16.mxu0 %v3567_v49  ;;  %1103 = vmatprep.subr.bf16.mxu1 %v3570_v50 }
 0x265   :  { %1092 = vmatprep.mubr.bf16.mxu0 %v4384_v8  ;;  %1133 = vmatprep.mubr.bf16.mxu1 %v4384_v8 }
 0x267   :  { %1063 = vmatpush1.bf16.msra.mxu0 %v3573_v51  ;;  %1104 = vmatpush1.bf16.msra.mxu1 %v3577_v52 }
 0x268   :  { %1064 = vmatprep.subr.bf16.mxu0 %v3579_v53  ;;  %1105 = vmatprep.subr.bf16.mxu1 %v3582_v54 }
 0x26b   :  { %1065 = vmatpush1.bf16.msra.mxu0 %v3587_v55  ;;  %1106 = vmatpush1.bf16.msra.mxu1 %v3589_v56 }
 0x26c   :  { %1066 = vmatprep.subr.bf16.mxu0 %v3593_v57  ;;  %1107 = vmatprep.subr.bf16.mxu1 %v3596_v58 }
 0x26f   :  { %1067 = vmatpush1.bf16.msra.mxu0 %v3599_v59  ;;  %1108 = vmatpush1.bf16.msra.mxu1 %v3603_v60 }
 0x270   :  { %1068 = vmatprep.subr.bf16.mxu0 %v3605_v61  ;;  %1109 = vmatprep.subr.bf16.mxu1 %v3608_v62 }
 0x273   :  { %1069 = vmatpush1.bf16.msra.mxu0 %v3611_v63  ;;  %1110 = vmatpush1.bf16.msra.mxu1 %v3615_v0 }
 0x274   :  { %1070 = vmatprep.subr.bf16.mxu0 %v3617_v9  ;;  %1111 = vmatprep.subr.bf16.mxu1 %v3620_v10 }
 0x277   :  { %1071 = vmatpush1.bf16.msra.mxu0 %v3623_v12  ;;  %1112 = vmatpush1.bf16.msra.mxu1 %v3627_v13 }
 0x278   :  { %1072 = vmatprep.subr.bf16.mxu0 %v3629_v14  ;;  %1113 = vmatprep.subr.bf16.mxu1 %v3632_v15 }
 0x27b   :  { %1073 = vmatpush1.bf16.msra.mxu0 %v3635_v16  ;;  %1114 = vmatpush1.bf16.msra.mxu1 %v3639_v17 }
 0x27c   :  { %1074 = vmatprep.subr.bf16.mxu0 %v3641_v18  ;;  %1115 = vmatprep.subr.bf16.mxu1 %v3644_v19 }
 0x27f   :  { %1075 = vmatpush1.bf16.msra.mxu0 %v3647_v20  ;;  %1116 = vmatpush1.bf16.msra.mxu1 %v3651_v21 }
 0x280   :  { %1185 = vmatprep.subr.bf16.mxu0 %v3558_v44  ;;  %1226 = vmatprep.subr.bf16.mxu1 %v3560_v45 }
 0x335   :  { %v971_v40 = vpop.f32.mrb[12].mxu0  ;;  %v1012_v35 = vpop.f32.mrb[12].mxu1 }
 0x336   :  { %v1023_v29 = vrot.slane %v971_v40, 6  ;;  %v973_v36 = vpop.f32.mrb[13].mxu0  ;;  %v1014_v25 = vpop.f32.mrb[13].mxu1  ;;  %v1025_v26 = vrot.slane %v1012_v35, 6 }
 0x337   :  { %v1024_v37 = vrot.slane %v973_v36, 6  ;;  %v975_v27 = vpop.f32.mrb[14].mxu0  ;;  %v1016_v39 = vpop.f32.mrb[14].mxu1  ;;  %v1026_v11 = vrot.slane %v1014_v25, 6 }
 0x338   :  { %v1031_v34 = vadd.f32 %v1023_v29, %v3706_v38  ;;  %v976_v32 = vpop.f32.mrb[15].mxu0  ;;  %v1017_v24 = vpop.f32.mrb[15].mxu1  ;;  %v1033_v23 = vadd.f32 %v1025_v26, %v3715_v30 }
 0x339   :  { %v1032_v43 = vadd.f32 %v1024_v37, %v3711_v41  ;;  %v1034_v33 = vadd.f32 %v1026_v11, %v3720_v42  ;;  %v1049_v37 = vrot.slane %v3765_v46, 7 }
 0x33a   :  { %v1035_v22 = vmul.f32 0.5, %v1031_v34 }
 0x33b   :  { %v1039_v28 = vmul.f32 0.5, %v1032_v43  ;;  %v1044_v40 = vmul.f32 0.5, %v1034_v33 }
 0x33c   :  { %3197 = vtanh.f32 %v1035_v22 }
 0x33d   :  { %3199 = vtanh.f32 %v1039_v28 }
 0x33e   :  { %3201 = vtanh.f32 %v1033_v23 }
 0x33f   :  { %3203 = vtanh.f32 %v1044_v40 }
 0x346   :  { %v3198_v36 = vpop.eup %3197 }
 0x347   :  { %v3200_v27 = vpop.eup %3199  ;;  %v1037_v39 = vadd.f32 1.0, %v3198_v36 }
 0x348   :  { %v1041_v29 = vadd.f32 1.0, %v3200_v27  ;;  %v3202_v32 = vpop.eup %3201 }
 0x349   :  { %v1038_v35 = vmul.f32 0.5, %v1037_v39  ;;  %v3204_v25 = vpop.eup %3203 }
 0x34a   :  { %v1042_v24 = vmul.f32 0.5, %v1041_v29  ;;  %v1046_v26 = vadd.f32 1.0, %v3204_v25 }
 0x34b   :  { %v1052_v34 = vmul.f32 %v3202_v32, %v1038_v35 }
 0x34c   :  { %v1051_v43 = vmul.f32 %v1049_v37, %v1042_v24  ;;  %v1047_v28 = vmul.f32 0.5, %v1046_v26 }
 0x34e   :  { %v3807_v22 = vadd.f32 %v1052_v34, %v1051_v43 }
 0x350   :  { %3205 = vtanh.f32 %v3807_v22 }
 0x35a   :  { %v3206_v23 = vpop.eup %3205 }
 0x35b   :  { %v1055_v11 = vmul.f32 %v3206_v23, %v1047_v28 }
 0x35d   :  { %v1056_v33 = vpack.c.bf16 %v1055_v11, %v1055_v11 }
 0x35f   :  { %v1058_v36 = vrot.slane %v1056_v33, 1 }
 0x361   :  { %1093 = vmatmul.mubr.bf16.vlgmr.msra.gmra.mrb[16].mxu0 %v1058_v36  ;;  %1134 = vmatmul.mubr.bf16.vlgmr.msra.gmra.mrb[16].mxu1 %v1058_v36 }
 0x362   :  { %1186 = vmatpush1.bf16.msra.mxu0 %v3562_v47  ;;  %1227 = vmatpush1.bf16.msra.mxu1 %v3564_v48 }
 0x363   :  { %1187 = vmatprep.subr.bf16.mxu0 %v3567_v49  ;;  %1228 = vmatprep.subr.bf16.mxu1 %v3570_v50 }
 0x364   :  { %1217 = vmatprep.mubr.bf16.mxu0 %v4384_v8  ;;  %1258 = vmatprep.mubr.bf16.mxu1 %v4384_v8 }
 0x366   :  { %1188 = vmatpush1.bf16.msra.mxu0 %v3573_v51  ;;  %1229 = vmatpush1.bf16.msra.mxu1 %v3577_v52 }
 0x367   :  { %1189 = vmatprep.subr.bf16.mxu0 %v3579_v53  ;;  %1230 = vmatprep.subr.bf16.mxu1 %v3582_v54 }
 0x36a   :  { %1190 = vmatpush1.bf16.msra.mxu0 %v3587_v55  ;;  %1231 = vmatpush1.bf16.msra.mxu1 %v3589_v56 }
 0x36b   :  { %1191 = vmatprep.subr.bf16.mxu0 %v3593_v57  ;;  %1232 = vmatprep.subr.bf16.mxu1 %v3596_v58 }
 0x36e   :  { %1192 = vmatpush1.bf16.msra.mxu0 %v3599_v59  ;;  %1233 = vmatpush1.bf16.msra.mxu1 %v3603_v60 }
 0x36f   :  { %1193 = vmatprep.subr.bf16.mxu0 %v3605_v61  ;;  %1234 = vmatprep.subr.bf16.mxu1 %v3608_v62 }
 0x372   :  { %1194 = vmatpush1.bf16.msra.mxu0 %v3611_v63  ;;  %1235 = vmatpush1.bf16.msra.mxu1 %v3615_v0 }
 0x373   :  { %1195 = vmatprep.subr.bf16.mxu0 %v3617_v9  ;;  %1236 = vmatprep.subr.bf16.mxu1 %v3620_v10 }
 0x376   :  { %1196 = vmatpush1.bf16.msra.mxu0 %v3623_v12  ;;  %1237 = vmatpush1.bf16.msra.mxu1 %v3627_v13 }
 0x377   :  { %1197 = vmatprep.subr.bf16.mxu0 %v3629_v14  ;;  %1238 = vmatprep.subr.bf16.mxu1 %v3632_v15 }
 0x37a   :  { %1198 = vmatpush1.bf16.msra.mxu0 %v3635_v16  ;;  %1239 = vmatpush1.bf16.msra.mxu1 %v3639_v17 }
 0x37b   :  { %1199 = vmatprep.subr.bf16.mxu0 %v3641_v18  ;;  %1240 = vmatprep.subr.bf16.mxu1 %v3644_v19 }
 0x37e   :  { %1200 = vmatpush1.bf16.msra.mxu0 %v3647_v20  ;;  %1241 = vmatpush1.bf16.msra.mxu1 %v3651_v21 }
 0x37f   :  { %1308 = vmatprep.subr.bf16.mxu0 %v3558_v44  ;;  %1349 = vmatprep.subr.bf16.mxu1 %v3560_v45 }
 0x434   :  { %v1094_v46 = vpop.f32.mrb[16].mxu0  ;;  %v1135_v40 = vpop.f32.mrb[16].mxu1 }
 0x435   :  { %v1146_v27 = vrot.slane %v1094_v46, 5  ;;  %v1096_v39 = vpop.f32.mrb[17].mxu0  ;;  %v1137_v29 = vpop.f32.mrb[17].mxu1  ;;  %v1148_v34 = vrot.slane %v1135_v40, 5 }
 0x436   :  { %v1147_v35 = vrot.slane %v1096_v39, 5  ;;  %v1098_v32 = vpop.f32.mrb[18].mxu0  ;;  %v1139_v24 = vpop.f32.mrb[18].mxu1  ;;  %v1149_v33 = vrot.slane %v1137_v29, 5 }
 0x437   :  { %v1154_v37 = vadd.f32 %v1146_v27, %v3706_v38  ;;  %v1099_v43 = vpop.f32.mrb[19].mxu0  ;;  %v1140_v25 = vpop.f32.mrb[19].mxu1  ;;  %v1156_v11 = vadd.f32 %v1148_v34, %v3715_v30 }
 0x438   :  { %v1155_v26 = vadd.f32 %v1147_v35, %v3711_v41  ;;  %v1157_v36 = vadd.f32 %v1149_v33, %v3720_v42  ;;  %v1172_v35 = vrot.slane %v3807_v22, 7 }
 0x439   :  { %v1158_v28 = vmul.f32 0.5, %v1154_v37 }
 0x43a   :  { %v1162_v23 = vmul.f32 0.5, %v1155_v26  ;;  %v1167_v46 = vmul.f32 0.5, %v1157_v36 }
 0x43b   :  { %3207 = vtanh.f32 %v1158_v28 }
 0x43c   :  { %3209 = vtanh.f32 %v1162_v23 }
 0x43d   :  { %3211 = vtanh.f32 %v1156_v11 }
 0x43e   :  { %3213 = vtanh.f32 %v1167_v46 }
 0x445   :  { %v3208_v39 = vpop.eup %3207 }
 0x446   :  { %v3210_v32 = vpop.eup %3209  ;;  %v1160_v24 = vadd.f32 1.0, %v3208_v39 }
 0x447   :  { %v1164_v27 = vadd.f32 1.0, %v3210_v32  ;;  %v3212_v43 = vpop.eup %3211 }
 0x448   :  { %v1161_v40 = vmul.f32 0.5, %v1160_v24  ;;  %v3214_v29 = vpop.eup %3213 }
 0x449   :  { %v1165_v25 = vmul.f32 0.5, %v1164_v27  ;;  %v1169_v34 = vadd.f32 1.0, %v3214_v29 }
 0x44a   :  { %v1175_v37 = vmul.f32 %v3212_v43, %v1161_v40 }
 0x44b   :  { %v1174_v26 = vmul.f32 %v1172_v35, %v1165_v25  ;;  %v1170_v23 = vmul.f32 0.5, %v1169_v34 }
 0x44d   :  { %v3849_v28 = vadd.f32 %v1175_v37, %v1174_v26 }
 0x44f   :  { %3215 = vtanh.f32 %v3849_v28 }
 0x459   :  { %v3216_v11 = vpop.eup %3215 }
 0x45a   :  { %v1178_v33 = vmul.f32 %v3216_v11, %v1170_v23 }
 0x45c   :  { %v1179_v36 = vpack.c.bf16 %v1178_v33, %v1178_v33 }
 0x45e   :  { %v1181_v39 = vshrl.u32 %v1179_v36, 16 }
 0x460   :  { %v1183_v32 = vrot.slane %v1181_v39, 1 }
 0x462   :  { %1218 = vmatmul.mubr.bf16.vlgmr.msra.gmra.mrb[20].mxu0 %v1183_v32  ;;  %1259 = vmatmul.mubr.bf16.vlgmr.msra.gmra.mrb[20].mxu1 %v1183_v32 }
 0x463   :  { %1309 = vmatpush1.bf16.msra.mxu0 %v3562_v47  ;;  %1350 = vmatpush1.bf16.msra.mxu1 %v3564_v48 }
 0x464   :  { %1310 = vmatprep.subr.bf16.mxu0 %v3567_v49  ;;  %1351 = vmatprep.subr.bf16.mxu1 %v3570_v50 }
 0x465   :  { %1340 = vmatprep.mubr.bf16.mxu0 %v4384_v8  ;;  %1381 = vmatprep.mubr.bf16.mxu1 %v4384_v8 }
 0x467   :  { %1311 = vmatpush1.bf16.msra.mxu0 %v3573_v51  ;;  %1352 = vmatpush1.bf16.msra.mxu1 %v3577_v52 }
 0x468   :  { %1312 = vmatprep.subr.bf16.mxu0 %v3579_v53  ;;  %1353 = vmatprep.subr.bf16.mxu1 %v3582_v54 }
 0x46b   :  { %1313 = vmatpush1.bf16.msra.mxu0 %v3587_v55  ;;  %1354 = vmatpush1.bf16.msra.mxu1 %v3589_v56 }
 0x46c   :  { %1314 = vmatprep.subr.bf16.mxu0 %v3593_v57  ;;  %1355 = vmatprep.subr.bf16.mxu1 %v3596_v58 }
 0x46f   :  { %1315 = vmatpush1.bf16.msra.mxu0 %v3599_v59  ;;  %1356 = vmatpush1.bf16.msra.mxu1 %v3603_v60 }
 0x470   :  { %1316 = vmatprep.subr.bf16.mxu0 %v3605_v61  ;;  %1357 = vmatprep.subr.bf16.mxu1 %v3608_v62 }
 0x473   :  { %1317 = vmatpush1.bf16.msra.mxu0 %v3611_v63  ;;  %1358 = vmatpush1.bf16.msra.mxu1 %v3615_v0 }
 0x474   :  { %1318 = vmatprep.subr.bf16.mxu0 %v3617_v9  ;;  %1359 = vmatprep.subr.bf16.mxu1 %v3620_v10 }
 0x477   :  { %1319 = vmatpush1.bf16.msra.mxu0 %v3623_v12  ;;  %1360 = vmatpush1.bf16.msra.mxu1 %v3627_v13 }
 0x478   :  { %1320 = vmatprep.subr.bf16.mxu0 %v3629_v14  ;;  %1361 = vmatprep.subr.bf16.mxu1 %v3632_v15 }
 0x47b   :  { %1321 = vmatpush1.bf16.msra.mxu0 %v3635_v16  ;;  %1362 = vmatpush1.bf16.msra.mxu1 %v3639_v17 }
 0x47c   :  { %1322 = vmatprep.subr.bf16.mxu0 %v3641_v18  ;;  %1363 = vmatprep.subr.bf16.mxu1 %v3644_v19 }
 0x47f   :  { %1323 = vmatpush1.bf16.msra.mxu0 %v3647_v20  ;;  %1364 = vmatpush1.bf16.msra.mxu1 %v3651_v21 }
 0x480   :  { %1433 = vmatprep.subr.bf16.mxu0 %v3558_v44  ;;  %1474 = vmatprep.subr.bf16.mxu1 %v3560_v45 }
 0x535   :  { %v1219_v22 = vpop.f32.mrb[20].mxu0  ;;  %v1260_v46 = vpop.f32.mrb[20].mxu1 }
 0x536   :  { %v1271_v24 = vrot.slane %v1219_v22, 4  ;;  %v1221_v27 = vpop.f32.mrb[21].mxu0  ;;  %v1262_v40 = vpop.f32.mrb[21].mxu1  ;;  %v1273_v26 = vrot.slane %v1260_v46, 4 }
 0x537   :  { %v1272_v43 = vrot.slane %v1221_v27, 4  ;;  %v1223_v25 = vpop.f32.mrb[22].mxu0  ;;  %v1264_v35 = vpop.f32.mrb[22].mxu1  ;;  %v1274_v45 = vrot.slane %v1262_v40, 4 }
 0x538   :  { %v1279_v37 = vadd.f32 %v1271_v24, %v3706_v38  ;;  %v1224_v29 = vpop.f32.mrb[23].mxu0  ;;  %v1265_v34 = vpop.f32.mrb[23].mxu1  ;;  %v1281_v44 = vadd.f32 %v1273_v26, %v3715_v30 }
 0x539   :  { %v1280_v23 = vadd.f32 %v1272_v43, %v3711_v41  ;;  %v1282_v36 = vadd.f32 %v1274_v45, %v3720_v42  ;;  %v1297_v43 = vrot.slane %v3849_v28, 7 }
 0x53a   :  { %v1283_v11 = vmul.f32 0.5, %v1279_v37 }
 0x53b   :  { %v1287_v33 = vmul.f32 0.5, %v1280_v23  ;;  %v1292_v39 = vmul.f32 0.5, %v1282_v36 }
 0x53c   :  { %3217 = vtanh.f32 %v1283_v11 }
 0x53d   :  { %3219 = vtanh.f32 %v1287_v33 }
 0x53e   :  { %3221 = vtanh.f32 %v1281_v44 }
 0x53f   :  { %3223 = vtanh.f32 %v1292_v39 }
 0x546   :  { %v3218_v32 = vpop.eup %3217 }
 0x547   :  { %v3220_v22 = vpop.eup %3219  ;;  %v1285_v27 = vadd.f32 1.0, %v3218_v32 }
 0x548   :  { %v1289_v24 = vadd.f32 1.0, %v3220_v22  ;;  %v3222_v25 = vpop.eup %3221 }
 0x549   :  { %v1286_v46 = vmul.f32 0.5, %v1285_v27  ;;  %v3224_v40 = vpop.eup %3223 }
 0x54a   :  { %v1290_v35 = vmul.f32 0.5, %v1289_v24  ;;  %v1294_v26 = vadd.f32 1.0, %v3224_v40  ;;  %v3263_v40 = vld [vmem:[#allocation7 + $0x120] ss:$16 sps:$4 sm:$0xff]  }
 0x54b   :  { %v1300_v37 = vmul.f32 %v3222_v25, %v1286_v46 }
 0x54c   :  { %v1299_v29 = vmul.f32 %v1297_v43, %v1290_v35  ;;  %v1295_v23 = vmul.f32 0.5, %v1294_v26  ;;  %v3259_v43 = vld [vmem:[#allocation7 + $0x100] ss:$16 sps:$4 sm:$0xff]   ;;  %v3264_v26 = vld [vmem:[#allocation7 + $0x128] ss:$16 sps:$4 sm:$0xff]  }
 0x54e   :  { %v3891_v34 = vadd.f32 %v1300_v37, %v1299_v29  ;;  %v3260_v37 = vld [vmem:[#allocation7 + $0x108] ss:$16 sps:$4 sm:$0xff]   ;;  %v3261_v29 = vld [vmem:[#allocation7 + $0x124] ss:$16 sps:$4 sm:$0xff]  }
 0x550   :  { %3225 = vtanh.f32 %v3891_v34 }
 0x55a   :  { %v3226_v11 = vpop.eup %3225 }
 0x55b   :  { %v1303_v33 = vmul.f32 %v3226_v11, %v1295_v23  ;;  %v3265_v23 = vld [vmem:[#allocation7 + $0x144] ss:$16 sps:$4 sm:$0xff]   ;;  %v3266_v11 = vld [vmem:[#allocation7 + $0x14c] ss:$16 sps:$4 sm:$0xff]  }
 0x55d   :  { %v1304_v44 = vpack.c.bf16 %v1303_v33, %v1303_v33  ;;  %v3267_v33 = vld [vmem:[#allocation7 + $0x140] ss:$16 sps:$4 sm:$0xff]  }
 0x55f   :  { %v1306_v45 = vrot.slane %v1304_v44, 2  ;;  %v3268_v44 = vld [vmem:[#allocation7 + $0x148] ss:$16 sps:$4 sm:$0xff]  }
 0x561   :  { %1341 = vmatmul.mubr.bf16.vlgmr.msra.gmra.mrb[24].mxu0 %v1306_v45  ;;  %1382 = vmatmul.mubr.bf16.vlgmr.msra.gmra.mrb[24].mxu1 %v1306_v45  ;;  %v3269_v45 = vld [vmem:[#allocation7 + $0x164] ss:$16 sps:$4 sm:$0xff]  }
 0x562   :  { %1434 = vmatpush1.bf16.msra.mxu0 %v3562_v47  ;;  %1475 = vmatpush1.bf16.msra.mxu1 %v3564_v48  ;;  %v3257_v47 = vld [vmem:[#allocation7 + $0x104] ss:$16 sps:$4 sm:$0xff]   ;;  %v3258_v48 = vld [vmem:[#allocation7 + $0x10c] ss:$16 sps:$4 sm:$0xff]  }
 0x563   :  { %1435 = vmatprep.subr.bf16.mxu0 %v3567_v49  ;;  %1476 = vmatprep.subr.bf16.mxu1 %v3570_v50 }
 0x564   :  { %1465 = vmatprep.mubr.bf16.mxu0 %v4384_v8  ;;  %1506 = vmatprep.mubr.bf16.mxu1 %v4384_v8 }
 0x566   :  { %1436 = vmatpush1.bf16.msra.mxu0 %v3573_v51  ;;  %1477 = vmatpush1.bf16.msra.mxu1 %v3577_v52 }
 0x567   :  { %1437 = vmatprep.subr.bf16.mxu0 %v3579_v53  ;;  %1478 = vmatprep.subr.bf16.mxu1 %v3582_v54 }
 0x56a   :  { %1438 = vmatpush1.bf16.msra.mxu0 %v3587_v55  ;;  %1479 = vmatpush1.bf16.msra.mxu1 %v3589_v56 }
 0x56b   :  { %1439 = vmatprep.subr.bf16.mxu0 %v3593_v57  ;;  %1480 = vmatprep.subr.bf16.mxu1 %v3596_v58 }
 0x56e   :  { %1440 = vmatpush1.bf16.msra.mxu0 %v3599_v59  ;;  %1481 = vmatpush1.bf16.msra.mxu1 %v3603_v60 }
 0x56f   :  { %1441 = vmatprep.subr.bf16.mxu0 %v3605_v61  ;;  %1482 = vmatprep.subr.bf16.mxu1 %v3608_v62 }
 0x572   :  { %1442 = vmatpush1.bf16.msra.mxu0 %v3611_v63  ;;  %1483 = vmatpush1.bf16.msra.mxu1 %v3615_v0 }
 0x573   :  { %1443 = vmatprep.subr.bf16.mxu0 %v3617_v9  ;;  %1484 = vmatprep.subr.bf16.mxu1 %v3620_v10 }
 0x576   :  { %1444 = vmatpush1.bf16.msra.mxu0 %v3623_v12  ;;  %1485 = vmatpush1.bf16.msra.mxu1 %v3627_v13 }
 0x577   :  { %1445 = vmatprep.subr.bf16.mxu0 %v3629_v14  ;;  %1486 = vmatprep.subr.bf16.mxu1 %v3632_v15 }
 0x57a   :  { %1446 = vmatpush1.bf16.msra.mxu0 %v3635_v16  ;;  %1487 = vmatpush1.bf16.msra.mxu1 %v3639_v17 }
 0x57b   :  { %1447 = vmatprep.subr.bf16.mxu0 %v3641_v18  ;;  %1488 = vmatprep.subr.bf16.mxu1 %v3644_v19 }
 0x57e   :  { %1448 = vmatpush1.bf16.msra.mxu0 %v3647_v20  ;;  %1489 = vmatpush1.bf16.msra.mxu1 %v3651_v21  ;;  %v1420_v20 = vrot.slane %v3891_v34, 7  ;;  %v3262_v34 = vld [vmem:[#allocation7 + $0x12c] ss:$16 sps:$4 sm:$0xff]  }
 0x57f   :  { %1556 = vmatprep.subr.bf16.mxu0 %v3257_v47  ;;  %1597 = vmatprep.subr.bf16.mxu1 %v3258_v48  ;;  %v3270_v47 = vld [vmem:[#allocation7 + $0x16c] ss:$16 sps:$4 sm:$0xff]   ;;  %v3271_v48 = vld [vmem:[#allocation7 + $0x160] ss:$16 sps:$4 sm:$0xff]  }
 0x634   :  { %v1342_v49 = vpop.f32.mrb[24].mxu0  ;;  %v1383_v50 = vpop.f32.mrb[24].mxu1 }
 0x635   :  { %v1394_v51 = vrot.slane %v1342_v49, 3  ;;  %v1344_v52 = vpop.f32.mrb[25].mxu0  ;;  %v1385_v53 = vpop.f32.mrb[25].mxu1  ;;  %v1396_v58 = vrot.slane %v1383_v50, 3  ;;  %v3272_v49 = vld [vmem:[#allocation7 + $0x168] ss:$16 sps:$4 sm:$0xff]  }
 0x636   :  { %v1395_v54 = vrot.slane %v1344_v52, 3  ;;  %v1346_v55 = vpop.f32.mrb[26].mxu0  ;;  %v1387_v56 = vpop.f32.mrb[26].mxu1  ;;  %v1397_v9 = vrot.slane %v1385_v53, 3  ;;  %v3273_v50 = vld [vmem:[#allocation7 + $0x184] ss:$16 sps:$4 sm:$0xff]  }
 0x637   :  { %v1402_v57 = vadd.f32 %v1394_v51, %v3706_v38  ;;  %v1347_v59 = vpop.f32.mrb[27].mxu0  ;;  %v1388_v60 = vpop.f32.mrb[27].mxu1  ;;  %v1404_v0 = vadd.f32 %v1396_v58, %v3715_v30  ;;  %v3274_v51 = vld [vmem:[#allocation7 + $0x18c] ss:$16 sps:$4 sm:$0xff]   ;;  %v3275_v52 = vld [vmem:[#allocation7 + $0x180] ss:$16 sps:$4 sm:$0xff]  }
 0x638   :  { %v1403_v61 = vadd.f32 %v1395_v54, %v3711_v41  ;;  %v1405_v10 = vadd.f32 %v1397_v9, %v3720_v42  ;;  %v3276_v53 = vld [vmem:[#allocation7 + $0x188] ss:$16 sps:$4 sm:$0xff]   ;;  %v3277_v54 = vld [vmem:[#allocation7 + $0x1a4] ss:$16 sps:$4 sm:$0xff]   ;;  %v3278_v55 = vld [vmem:[#allocation7 + $0x1ac] ss:$16 sps:$4 sm:$0xff]  }
 0x639   :  { %v1406_v62 = vmul.f32 0.5, %v1402_v57  ;;  %v3279_v56 = vld [vmem:[#allocation7 + $0x1a0] ss:$16 sps:$4 sm:$0xff]   ;;  %v3280_v57 = vld [vmem:[#allocation7 + $0x1a8] ss:$16 sps:$4 sm:$0xff]  }
 0x63a   :  { %v1410_v63 = vmul.f32 0.5, %v1403_v61  ;;  %v1415_v12 = vmul.f32 0.5, %v1405_v10  ;;  %v3281_v58 = vld [vmem:[#allocation7 + $0x1c4] ss:$16 sps:$4 sm:$0xff]   ;;  %v3282_v59 = vld [vmem:[#allocation7 + $0x1cc] ss:$16 sps:$4 sm:$0xff]  }
 0x63b   :  { %3227 = vtanh.f32 %v1406_v62  ;;  %v3283_v60 = vld [vmem:[#allocation7 + $0x1c0] ss:$16 sps:$4 sm:$0xff]   ;;  %v3284_v61 = vld [vmem:[#allocation7 + $0x1c8] ss:$16 sps:$4 sm:$0xff]   ;;  %v3285_v62 = vld [vmem:[#allocation7 + $0x1e4] ss:$16 sps:$4 sm:$0xff]  }
 0x63c   :  { %3229 = vtanh.f32 %v1410_v63  ;;  %v3286_v63 = vld [vmem:[#allocation7 + $0x1ec] ss:$16 sps:$4 sm:$0xff]   ;;  %v3288_v9 = vld [vmem:[#allocation7 + $0x1e8] ss:$16 sps:$4 sm:$0xff]  }
 0x63d   :  { %3231 = vtanh.f32 %v1404_v0  ;;  %v3287_v0 = vld [vmem:[#allocation7 + $0x1e0] ss:$16 sps:$4 sm:$0xff]  }
 0x63e   :  { %3233 = vtanh.f32 %v1415_v12 }
 0x645   :  { %v3228_v13 = vpop.eup %3227 }
 0x646   :  { %v3230_v14 = vpop.eup %3229  ;;  %v1408_v15 = vadd.f32 1.0, %v3228_v13 }
 0x647   :  { %v1412_v16 = vadd.f32 1.0, %v3230_v14  ;;  %v3232_v18 = vpop.eup %3231 }
 0x648   :  { %v1409_v17 = vmul.f32 0.5, %v1408_v15  ;;  %v3234_v39 = vpop.eup %3233 }
 0x649   :  { %v1413_v19 = vmul.f32 0.5, %v1412_v16  ;;  %v1417_v32 = vadd.f32 1.0, %v3234_v39 }
 0x64a   :  { %v1423_v21 = vmul.f32 %v3232_v18, %v1409_v17 }
 0x64b   :  { %v1422_v28 = vmul.f32 %v1420_v20, %v1413_v19  ;;  %v1418_v22 = vmul.f32 0.5, %v1417_v32 }
 0x64d   :  { %v3931_v36 = vadd.f32 %v1423_v21, %v1422_v28 }
 0x64f   :  { %3235 = vtanh.f32 %v3931_v36 }
 0x659   :  { %v3236_v27 = vpop.eup %3235 }
 0x65a   :  { %v1426_v24 = vmul.f32 %v3236_v27, %v1418_v22 }
 0x65c   :  { %v1427_v46 = vpack.c.bf16 %v1426_v24, %v1426_v24 }
 0x65e   :  { %v1429_v25 = vshrl.u32 %v1427_v46, 16 }
 0x660   :  { %v1431_v35 = vrot.slane %v1429_v25, 2 }
 0x662   :  { %1466 = vmatmul.mubr.bf16.vlgmr.msra.gmra.mrb[28].mxu0 %v1431_v35  ;;  %1507 = vmatmul.mubr.bf16.vlgmr.msra.gmra.mrb[28].mxu1 %v1431_v35 }
 0x663   :  { %1557 = vmatpush1.bf16.msra.mxu0 %v3259_v43  ;;  %1598 = vmatpush1.bf16.msra.mxu1 %v3260_v37 }
 0x664   :  { %1558 = vmatprep.subr.bf16.mxu0 %v3261_v29  ;;  %1599 = vmatprep.subr.bf16.mxu1 %v3262_v34 }
 0x665   :  { %1588 = vmatprep.mubr.bf16.mxu0 %v4384_v8  ;;  %1629 = vmatprep.mubr.bf16.mxu1 %v4384_v8 }
 0x667   :  { %1559 = vmatpush1.bf16.msra.mxu0 %v3263_v40  ;;  %1600 = vmatpush1.bf16.msra.mxu1 %v3264_v26 }
 0x668   :  { %1560 = vmatprep.subr.bf16.mxu0 %v3265_v23  ;;  %1601 = vmatprep.subr.bf16.mxu1 %v3266_v11  ;;  %v1545_v23 = vrot.slane %v3931_v36, 7 }
 0x66b   :  { %1561 = vmatpush1.bf16.msra.mxu0 %v3267_v33  ;;  %1602 = vmatpush1.bf16.msra.mxu1 %v3268_v44 }
 0x66c   :  { %1562 = vmatprep.subr.bf16.mxu0 %v3269_v45  ;;  %1603 = vmatprep.subr.bf16.mxu1 %v3270_v47 }
 0x66f   :  { %1563 = vmatpush1.bf16.msra.mxu0 %v3271_v48  ;;  %1604 = vmatpush1.bf16.msra.mxu1 %v3272_v49 }
 0x670   :  { %1564 = vmatprep.subr.bf16.mxu0 %v3273_v50  ;;  %1605 = vmatprep.subr.bf16.mxu1 %v3274_v51 }
 0x673   :  { %1565 = vmatpush1.bf16.msra.mxu0 %v3275_v52  ;;  %1606 = vmatpush1.bf16.msra.mxu1 %v3276_v53 }
 0x674   :  { %1566 = vmatprep.subr.bf16.mxu0 %v3277_v54  ;;  %1607 = vmatprep.subr.bf16.mxu1 %v3278_v55 }
 0x677   :  { %1567 = vmatpush1.bf16.msra.mxu0 %v3279_v56  ;;  %1608 = vmatpush1.bf16.msra.mxu1 %v3280_v57 }
 0x678   :  { %1568 = vmatprep.subr.bf16.mxu0 %v3281_v58  ;;  %1609 = vmatprep.subr.bf16.mxu1 %v3282_v59 }
 0x67b   :  { %1569 = vmatpush1.bf16.msra.mxu0 %v3283_v60  ;;  %1610 = vmatpush1.bf16.msra.mxu1 %v3284_v61 }
 0x67c   :  { %1570 = vmatprep.subr.bf16.mxu0 %v3285_v62  ;;  %1611 = vmatprep.subr.bf16.mxu1 %v3286_v63 }
 0x67f   :  { %1571 = vmatpush1.bf16.msra.mxu0 %v3287_v0  ;;  %1612 = vmatpush1.bf16.msra.mxu1 %v3288_v9 }
 0x735   :  { %v1467_v10 = vpop.f32.mrb[28].mxu0  ;;  %v1508_v12 = vpop.f32.mrb[28].mxu1 }
 0x736   :  { %v1519_v13 = vrot.slane %v1467_v10, 2  ;;  %v1469_v14 = vpop.f32.mrb[29].mxu0  ;;  %v1510_v15 = vpop.f32.mrb[29].mxu1  ;;  %v1521_v20 = vrot.slane %v1508_v12, 2 }
 0x737   :  { %v1520_v16 = vrot.slane %v1469_v14, 2  ;;  %v1471_v17 = vpop.f32.mrb[30].mxu0  ;;  %v1512_v18 = vpop.f32.mrb[30].mxu1  ;;  %v1522_v24 = vrot.slane %v1510_v15, 2 }
 0x738   :  { %v1527_v19 = vadd.f32 %v1519_v13, %v3706_v38  ;;  %v1472_v21 = vpop.f32.mrb[31].mxu0  ;;  %v1513_v28 = vpop.f32.mrb[31].mxu1  ;;  %v1529_v27 = vadd.f32 %v1521_v20, %v3715_v30 }
 0x739   :  { %v1528_v39 = vadd.f32 %v1520_v16, %v3711_v41  ;;  %v1530_v46 = vadd.f32 %v1522_v24, %v3720_v42 }
 0x73a   :  { %v1531_v32 = vmul.f32 0.5, %v1527_v19 }
 0x73b   :  { %v1535_v22 = vmul.f32 0.5, %v1528_v39  ;;  %v1540_v25 = vmul.f32 0.5, %v1530_v46 }
 0x73c   :  { %3237 = vtanh.f32 %v1531_v32 }
 0x73d   :  { %3239 = vtanh.f32 %v1535_v22 }
 0x73e   :  { %3241 = vtanh.f32 %v1529_v27 }
 0x73f   :  { %3243 = vtanh.f32 %v1540_v25 }
 0x746   :  { %v3238_v35 = vpop.eup %3237 }
 0x747   :  { %v3240_v43 = vpop.eup %3239  ;;  %v1533_v37 = vadd.f32 1.0, %v3238_v35 }
 0x748   :  { %v1537_v29 = vadd.f32 1.0, %v3240_v43  ;;  %v3242_v40 = vpop.eup %3241 }
 0x749   :  { %v1534_v34 = vmul.f32 0.5, %v1533_v37  ;;  %v3244_v45 = vpop.eup %3243 }
 0x74a   :  { %v1538_v26 = vmul.f32 0.5, %v1537_v29  ;;  %v1542_v47 = vadd.f32 1.0, %v3244_v45 }
 0x74b   :  { %v1548_v11 = vmul.f32 %v3242_v40, %v1534_v34 }
 0x74c   :  { %v1547_v33 = vmul.f32 %v1545_v23, %v1538_v26  ;;  %v1543_v48 = vmul.f32 0.5, %v1542_v47 }
 0x74e   :  { %v1549_v44 = vadd.f32 %v1548_v11, %v1547_v33 }
 0x750   :  { %3245 = vtanh.f32 %v1549_v44 }
 0x75a   :  { %v3246_v49 = vpop.eup %3245 }
 0x75b   :  { %v1551_v50 = vmul.f32 %v3246_v49, %v1543_v48 }
 0x75d   :  { %v1552_v51 = vpack.c.bf16 %v1551_v50, %v1551_v50 }
 0x75f   :  { %v1554_v52 = vrot.slane %v1552_v51, 3 }
 0x761   :  { %1589 = vmatmul.mubr.bf16.vlgmr.msra.gmra.mrb[32].mxu0 %v1554_v52  ;;  %1630 = vmatmul.mubr.bf16.vlgmr.msra.gmra.mrb[32].mxu1 %v1554_v52 }
 0x834   :  { %v1590_v53 = vpop.f32.mrb[32].mxu0  ;;  %v1631_v54 = vpop.f32.mrb[32].mxu1 }
 0x835   :  { %v1642_v55 = vrot.slane %v1590_v53, 1  ;;  %v1592_v56 = vpop.f32.mrb[33].mxu0  ;;  %v1633_v57 = vpop.f32.mrb[33].mxu1  ;;  %v1644_v61 = vrot.slane %v1631_v54, 1 }
 0x836   :  { %v1643_v58 = vrot.slane %v1592_v56, 1  ;;  %v1594_v36 = vpop.f32.mrb[34].mxu0  ;;  %v1635_v59 = vpop.f32.mrb[34].mxu1  ;;  %v1645_v13 = vrot.slane %v1633_v57, 1 }
 0x837   :  { %v1650_v60 = vadd.f32 %v1642_v55, %v3706_v38  ;;  %v1595_v62 = vpop.f32.mrb[35].mxu0  ;;  %v1636_v63 = vpop.f32.mrb[35].mxu1  ;;  %v1652_v12 = vadd.f32 %v1644_v61, %v3715_v30 }
 0x838   :  { %v1651_v0 = vadd.f32 %v1643_v58, %v3711_v41  ;;  %v1653_v14 = vadd.f32 %v1645_v13, %v3720_v42  ;;  %v1668_v41 = vrot.slane %v1549_v44, 7 }
 0x839   :  { %v1654_v9 = vmul.f32 0.5, %v1650_v60 }
 0x83a   :  { %v1658_v10 = vmul.f32 0.5, %v1651_v0  ;;  %v1663_v15 = vmul.f32 0.5, %v1653_v14 }
 0x83b   :  { %3247 = vtanh.f32 %v1654_v9 }
 0x83c   :  { %3249 = vtanh.f32 %v1658_v10 }
 0x83d   :  { %3251 = vtanh.f32 %v1652_v12 }
 0x83e   :  { %3253 = vtanh.f32 %v1663_v15 }
 0x845   :  { %v3248_v16 = vpop.eup %3247 }
 0x846   :  { %v3250_v17 = vpop.eup %3249  ;;  %v1656_v18 = vadd.f32 1.0, %v3248_v16 }
 0x847   :  { %v1660_v38 = vadd.f32 1.0, %v3250_v17  ;;  %v3252_v20 = vpop.eup %3251 }
 0x848   :  { %v1657_v19 = vmul.f32 0.5, %v1656_v18  ;;  %v3254_v30 = vpop.eup %3253 }
 0x849   :  { %v1661_v21 = vmul.f32 0.5, %v1660_v38  ;;  %v1665_v22 = vadd.f32 1.0, %v3254_v30 }
 0x84a   :  { %v1671_v28 = vmul.f32 %v3252_v20, %v1657_v19 }
 0x84b   :  { %v1670_v39 = vmul.f32 %v1668_v41, %v1661_v21  ;;  %v1666_v27 = vmul.f32 0.5, %v1665_v22 }
 0x84d   :  { %v3945_v32 = vadd.f32 %v1671_v28, %v1670_v39 }
 0x84f   :  { %3255 = vtanh.f32 %v3945_v32 }
 0x859   :  { %v3256_v42 = vpop.eup %3255 }
 0x85a   :  { %v3948_v24 = vmul.f32 %v3256_v42, %v1666_v27 }
 0x85b   :  { %3425 = dma.done.wait [#allocation6], 8192 }
 0x85c   :  { %3426 = vsyncadd [#allocation6], 4294959104 }
 0x85d   :  { %3427 = dma.done.wait [#allocation6 + $0x1], 64 }
 0x85e   :  { %3428 = vsyncadd [#allocation6 + $0x1], 4294967232  ;;  %1771 = vmatprep.mubr.bf16.mxu0 %v4384_v8  ;;  %1812 = vmatprep.mubr.bf16.mxu1 %v4384_v8  ;;  %v1686_v46 = vld [vmem:[#allocation2 + $0x8] sm:$0xff]  ;;  %v1688_v25 = vld [vmem:[#allocation2 + $0x18] sm:$0xff]  ;;  %vm2829_vm0 = vcmask 1040384   ;;  %vm2831_vm1 = vcmask 1041408  }
 0x85f   :  { %v1685_v35 = vld [vmem:[#allocation2] sm:$0xff]  ;;  %1739 = vmatprep.subr.bf16.mxu0 %v1686_v46  ;;  %1780 = vmatprep.subr.bf16.mxu1 %v1688_v25  ;;  %v1687_v43 = vld [vmem:[#allocation2 + $0x10] sm:$0xff]  ;;  %v1690_v37 = vld [vmem:[#allocation2 + $0x28] sm:$0xff]  ;;  %vm2833_vm2 = vcmask 1042432   ;;  %vm2835_vm3 = vcmask 1043456   ;;  %vm2837_vm4 = vcmask 1044480  }
 0x860   :  { %v1692_v29 = vld [vmem:[#allocation2 + $0x38] sm:$0xff]  ;;  %1740 = vmatpush1.bf16.msra.mxu0 %v1685_v35  ;;  %1781 = vmatpush1.bf16.msra.mxu1 %v1687_v43  ;;  %v1689_v34 = vld [vmem:[#allocation2 + $0x20] sm:$0xff]  ;;  %v1691_v40 = vld [vmem:[#allocation2 + $0x30] sm:$0xff]  ;;  %vm2839_vm5 = vcmask 1045504   ;;  %vm2841_vm6 = vcmask 1046528  }
 0x861   :  { %1741 = vmatprep.subr.bf16.mxu0 %v1690_v37  ;;  %1782 = vmatprep.subr.bf16.mxu1 %v1692_v29  ;;  %v1694_v26 = vld [vmem:[#allocation2 + $0x48] sm:$0xff]  ;;  %v1696_v23 = vld [vmem:[#allocation2 + $0x58] sm:$0xff]  ;;  %v1693_v11 = vld [vmem:[#allocation2 + $0x40] sm:$0xff] }
 0x862   :  { %v1695_v33 = vld [vmem:[#allocation2 + $0x50] sm:$0xff]  ;;  %v1698_v44 = vld [vmem:[#allocation2 + $0x68] sm:$0xff]  ;;  %v1700_v45 = vld [vmem:[#allocation2 + $0x78] sm:$0xff] }
 0x863   :  { %v1697_v47 = vld [vmem:[#allocation2 + $0x60] sm:$0xff]  ;;  %v1699_v48 = vld [vmem:[#allocation2 + $0x70] sm:$0xff]  ;;  %v1702_v49 = vld [vmem:[#allocation2 + $0x88] sm:$0xff] }
 0x864   :  { %1742 = vmatpush1.bf16.msra.mxu0 %v1689_v34  ;;  %1783 = vmatpush1.bf16.msra.mxu1 %v1691_v40  ;;  %v1704_v50 = vld [vmem:[#allocation2 + $0x98] sm:$0xff]  ;;  %v1701_v51 = vld [vmem:[#allocation2 + $0x80] sm:$0xff]  ;;  %v1703_v52 = vld [vmem:[#allocation2 + $0x90] sm:$0xff] }
 0x865   :  { %1743 = vmatprep.subr.bf16.mxu0 %v1694_v26  ;;  %1784 = vmatprep.subr.bf16.mxu1 %v1696_v23  ;;  %v1706_v53 = vld [vmem:[#allocation2 + $0xa8] sm:$0xff]  ;;  %v1708_v54 = vld [vmem:[#allocation2 + $0xb8] sm:$0xff]  ;;  %v1705_v55 = vld [vmem:[#allocation2 + $0xa0] sm:$0xff]  ;;  %v1821_v26 = vpack.c.bf16 %v3948_v24, %v3948_v24 }
 0x866   :  { %v1707_v56 = vld [vmem:[#allocation2 + $0xb0] sm:$0xff]  ;;  %v1710_v57 = vld [vmem:[#allocation2 + $0xc8] sm:$0xff]  ;;  %v1712_v58 = vld [vmem:[#allocation2 + $0xd8] sm:$0xff] }
 0x867   :  { %v1682_v36 = vld [vmem:[%s4368_s1] sm:$0xff]  ;;  %v1711_v60 = vld [vmem:[#allocation2 + $0xd0] sm:$0xff]  ;;  %v1714_v61 = vld [vmem:[#allocation2 + $0xe8] sm:$0xff] }
 0x868   :  { %1744 = vmatpush1.bf16.msra.mxu0 %v1693_v11  ;;  %1785 = vmatpush1.bf16.msra.mxu1 %v1695_v33  ;;  %v1709_v59 = vld [vmem:[#allocation2 + $0xc0] sm:$0xff]  ;;  %v1716_v62 = vld [vmem:[#allocation2 + $0xf8] sm:$0xff]  ;;  %v1683_v63 = vmax.f32 %v1682_v36, 0.0  ;;  %v1715_v9 = vld [vmem:[#allocation2 + $0xf0] sm:$0xff] }
 0x869   :  { %1745 = vmatprep.subr.bf16.mxu0 %v1698_v44  ;;  %1786 = vmatprep.subr.bf16.mxu1 %v1700_v45  ;;  %v1713_v0 = vld [vmem:[#allocation2 + $0xe0] sm:$0xff]  ;;  %v3955_v10 = vld [vmem:[#allocation2 + $0x108] sm:$0xff]  ;;  %v3957_v12 = vld [vmem:[#allocation2 + $0x118] sm:$0xff]  ;;  %v1855_v45 = vshrl.u32 %v1821_v26, 16 }
 0x86a   :  { %v1684_v13 = vpack.c.bf16 %v1683_v63, %v1683_v63  ;;  %v3961_v14 = vld [vmem:[#allocation2 + $0x100] sm:$0xff]  ;;  %v3963_v15 = vld [vmem:[#allocation2 + $0x110] sm:$0xff]  ;;  %v3965_v16 = vld [vmem:[#allocation2 + $0x128] sm:$0xff] }
 0x86b   :  { %v3967_v17 = vld [vmem:[#allocation2 + $0x138] sm:$0xff]  ;;  %v3973_v18 = vld [vmem:[#allocation2 + $0x120] sm:$0xff]  ;;  %v3975_v38 = vld [vmem:[#allocation2 + $0x130] sm:$0xff] }
 0x86c   :  { %1746 = vmatpush1.bf16.msra.mxu0 %v1697_v47  ;;  %1787 = vmatpush1.bf16.msra.mxu1 %v1699_v48  ;;  %v3977_v19 = vld [vmem:[#allocation2 + $0x148] sm:$0xff]  ;;  %v3979_v20 = vld [vmem:[#allocation2 + $0x158] sm:$0xff]  ;;  %v3987_v21 = vld [vmem:[#allocation2 + $0x140] sm:$0xff]  ;;  %v1857_v48 = vrot.slane %v1855_v45, 3 }
 0x86d   :  { %1747 = vmatprep.subr.bf16.mxu0 %v1702_v49  ;;  %1788 = vmatprep.subr.bf16.mxu1 %v1704_v50  ;;  %v3989_v41 = vld [vmem:[#allocation2 + $0x150] sm:$0xff]  ;;  %v3991_v28 = vld [vmem:[#allocation2 + $0x168] sm:$0xff]  ;;  %v3993_v39 = vld [vmem:[#allocation2 + $0x178] sm:$0xff] }
 0x86e   :  { %v3999_v30 = vld [vmem:[#allocation2 + $0x160] sm:$0xff]  ;;  %v4001_v22 = vld [vmem:[#allocation2 + $0x170] sm:$0xff]  ;;  %v4003_v27 = vld [vmem:[#allocation2 + $0x188] sm:$0xff] }
 0x86f   :  { %v4005_v42 = vld [vmem:[#allocation2 + $0x198] sm:$0xff]  ;;  %v4011_v46 = vld [vmem:[#allocation2 + $0x180] sm:$0xff]  ;;  %v4013_v25 = vld [vmem:[#allocation2 + $0x190] sm:$0xff] }
 0x870   :  { %1748 = vmatpush1.bf16.msra.mxu0 %v1701_v51  ;;  %1789 = vmatpush1.bf16.msra.mxu1 %v1703_v52  ;;  %v4015_v35 = vld [vmem:[#allocation2 + $0x1a8] sm:$0xff]  ;;  %v4017_v43 = vld [vmem:[#allocation2 + $0x1b8] sm:$0xff]  ;;  %v4023_v37 = vld [vmem:[#allocation2 + $0x1a0] sm:$0xff] }
 0x871   :  { %1749 = vmatprep.subr.bf16.mxu0 %v1706_v53  ;;  %1790 = vmatprep.subr.bf16.mxu1 %v1708_v54  ;;  %v4025_v29 = vld [vmem:[#allocation2 + $0x1b0] sm:$0xff]  ;;  %v4027_v34 = vld [vmem:[#allocation2 + $0x1c8] sm:$0xff]  ;;  %v4029_v40 = vld [vmem:[#allocation2 + $0x1d8] sm:$0xff] }
 0x872   :  { %v4037_v23 = vld [vmem:[#allocation2 + $0x1c0] sm:$0xff]  ;;  %v4039_v11 = vld [vmem:[#allocation2 + $0x1d0] sm:$0xff]  ;;  %v4041_v33 = vld [vmem:[#allocation2 + $0x1e8] sm:$0xff] }
 0x873   :  { %v4043_v44 = vld [vmem:[#allocation2 + $0x1f8] sm:$0xff]  ;;  %v4049_v24 = vld [vmem:[#allocation2 + $0x1e0] sm:$0xff]  ;;  %v4051_v47 = vld [vmem:[#allocation2 + $0x1f0] sm:$0xff] }
 0x874   :  { %1750 = vmatpush1.bf16.msra.mxu0 %v1705_v55  ;;  %1791 = vmatpush1.bf16.msra.mxu1 %v1707_v56 }
 0x875   :  { %1751 = vmatprep.subr.bf16.mxu0 %v1710_v57  ;;  %1792 = vmatprep.subr.bf16.mxu1 %v1712_v58  ;;  %v1717_v57 = vld [vmem:[#allocation3] sm:$0xf]  ;;  %v4385_v58 = vsub.s32 0, %v3694_v31 }
 0x877   :  { %v1722_v36 = vrot.slane %v1717_v57, %v4385_v58 }
 0x878   :  { %1752 = vmatpush1.bf16.msra.mxu0 %v1709_v59  ;;  %1793 = vmatpush1.bf16.msra.mxu1 %v1711_v60  ;;  %v4386_v59 = vsub.s32 1, %v3694_v31 }
 0x879   :  { %1753 = vmatprep.subr.bf16.mxu0 %v1714_v61  ;;  %1794 = vmatprep.subr.bf16.mxu1 %v1716_v62  ;;  %v4387_v62 = vsub.s32 2, %v3694_v31 }
 0x87a   :  { %v1726_v60 = vrot.slane %v1717_v57, %v4386_v59 }
 0x87b   :  { %v1730_v63 = vrot.slane %v1717_v57, %v4387_v62 }
 0x87c   :  { %1754 = vmatpush1.bf16.msra.mxu0 %v1713_v0  ;;  %1795 = vmatpush1.bf16.msra.mxu1 %v1715_v9 }
 0x87d   :  { %1859 = vmatprep.subr.bf16.mxu0 %v3955_v10  ;;  %1900 = vmatprep.subr.bf16.mxu1 %v3957_v12 }
 0x87f   :  { %1772 = vmatmul.mubr.bf16.vlgmr.msra.gmra.mrb[36].mxu0 %v1684_v13  ;;  %1813 = vmatmul.mubr.bf16.vlgmr.msra.gmra.mrb[36].mxu1 %v1684_v13 }
 0x880   :  { %1860 = vmatpush1.bf16.msra.mxu0 %v3961_v14  ;;  %1901 = vmatpush1.bf16.msra.mxu1 %v3963_v15 }
 0x881   :  { %1861 = vmatprep.subr.bf16.mxu0 %v3965_v16  ;;  %1902 = vmatprep.subr.bf16.mxu1 %v3967_v17 }
 0x882   :  { %1891 = vmatprep.mubr.bf16.mxu0 %v4384_v8  ;;  %1932 = vmatprep.mubr.bf16.mxu1 %v4384_v8 }
 0x884   :  { %1862 = vmatpush1.bf16.msra.mxu0 %v3973_v18  ;;  %1903 = vmatpush1.bf16.msra.mxu1 %v3975_v38 }
 0x885   :  { %1863 = vmatprep.subr.bf16.mxu0 %v3977_v19  ;;  %1904 = vmatprep.subr.bf16.mxu1 %v3979_v20 }
 0x888   :  { %1864 = vmatpush1.bf16.msra.mxu0 %v3987_v21  ;;  %1905 = vmatpush1.bf16.msra.mxu1 %v3989_v41 }
 0x889   :  { %1865 = vmatprep.subr.bf16.mxu0 %v3991_v28  ;;  %1906 = vmatprep.subr.bf16.mxu1 %v3993_v39 }
 0x88c   :  { %1866 = vmatpush1.bf16.msra.mxu0 %v3999_v30  ;;  %1907 = vmatpush1.bf16.msra.mxu1 %v4001_v22 }
 0x88d   :  { %1867 = vmatprep.subr.bf16.mxu0 %v4003_v27  ;;  %1908 = vmatprep.subr.bf16.mxu1 %v4005_v42 }
 0x890   :  { %1868 = vmatpush1.bf16.msra.mxu0 %v4011_v46  ;;  %1909 = vmatpush1.bf16.msra.mxu1 %v4013_v25 }
 0x891   :  { %1869 = vmatprep.subr.bf16.mxu0 %v4015_v35  ;;  %1910 = vmatprep.subr.bf16.mxu1 %v4017_v43 }
 0x894   :  { %1870 = vmatpush1.bf16.msra.mxu0 %v4023_v37  ;;  %1911 = vmatpush1.bf16.msra.mxu1 %v4025_v29 }
 0x895   :  { %1871 = vmatprep.subr.bf16.mxu0 %v4027_v34  ;;  %1912 = vmatprep.subr.bf16.mxu1 %v4029_v40 }
 0x898   :  { %1872 = vmatpush1.bf16.msra.mxu0 %v4037_v23  ;;  %1913 = vmatpush1.bf16.msra.mxu1 %v4039_v11 }
 0x899   :  { %1873 = vmatprep.subr.bf16.mxu0 %v4041_v33  ;;  %1914 = vmatprep.subr.bf16.mxu1 %v4043_v44 }
 0x89c   :  { %1874 = vmatpush1.bf16.msra.mxu0 %v4049_v24  ;;  %1915 = vmatpush1.bf16.msra.mxu1 %v4051_v47 }
 0x89d   :  { %1967 = vmatprep.subr.bf16.mxu0 %v3955_v10  ;;  %2008 = vmatprep.subr.bf16.mxu1 %v3957_v12 }
 0x89f   :  { %1892 = vmatmul.mubr.bf16.vlgmr.msra.gmra.mrb[40].mxu0 %v1857_v48  ;;  %1933 = vmatmul.mubr.bf16.vlgmr.msra.gmra.mrb[40].mxu1 %v1857_v48 }
 0x8a0   :  { %1968 = vmatpush1.bf16.msra.mxu0 %v3961_v14  ;;  %2009 = vmatpush1.bf16.msra.mxu1 %v3963_v15 }
 0x8a1   :  { %1969 = vmatprep.subr.bf16.mxu0 %v3965_v16  ;;  %2010 = vmatprep.subr.bf16.mxu1 %v3967_v17 }
 0x8a2   :  { %1999 = vmatprep.mubr.bf16.mxu0 %v4384_v8  ;;  %2040 = vmatprep.mubr.bf16.mxu1 %v4384_v8 }
 0x8a4   :  { %1970 = vmatpush1.bf16.msra.mxu0 %v3973_v18  ;;  %2011 = vmatpush1.bf16.msra.mxu1 %v3975_v38 }
 0x8a5   :  { %1971 = vmatprep.subr.bf16.mxu0 %v3977_v19  ;;  %2012 = vmatprep.subr.bf16.mxu1 %v3979_v20 }
 0x8a8   :  { %1972 = vmatpush1.bf16.msra.mxu0 %v3987_v21  ;;  %2013 = vmatpush1.bf16.msra.mxu1 %v3989_v41 }
 0x8a9   :  { %1973 = vmatprep.subr.bf16.mxu0 %v3991_v28  ;;  %2014 = vmatprep.subr.bf16.mxu1 %v3993_v39 }
 0x8ac   :  { %1974 = vmatpush1.bf16.msra.mxu0 %v3999_v30  ;;  %2015 = vmatpush1.bf16.msra.mxu1 %v4001_v22 }
 0x8ad   :  { %1975 = vmatprep.subr.bf16.mxu0 %v4003_v27  ;;  %2016 = vmatprep.subr.bf16.mxu1 %v4005_v42 }
 0x8b0   :  { %1976 = vmatpush1.bf16.msra.mxu0 %v4011_v46  ;;  %2017 = vmatpush1.bf16.msra.mxu1 %v4013_v25 }
 0x8b1   :  { %1977 = vmatprep.subr.bf16.mxu0 %v4015_v35  ;;  %2018 = vmatprep.subr.bf16.mxu1 %v4017_v43 }
 0x8b4   :  { %1978 = vmatpush1.bf16.msra.mxu0 %v4023_v37  ;;  %2019 = vmatpush1.bf16.msra.mxu1 %v4025_v29 }
 0x8b5   :  { %1979 = vmatprep.subr.bf16.mxu0 %v4027_v34  ;;  %2020 = vmatprep.subr.bf16.mxu1 %v4029_v40 }
 0x8b8   :  { %1980 = vmatpush1.bf16.msra.mxu0 %v4037_v23  ;;  %2021 = vmatpush1.bf16.msra.mxu1 %v4039_v11 }
 0x8b9   :  { %1981 = vmatprep.subr.bf16.mxu0 %v4041_v33  ;;  %2022 = vmatprep.subr.bf16.mxu1 %v4043_v44 }
 0x8bc   :  { %1982 = vmatpush1.bf16.msra.mxu0 %v4049_v24  ;;  %2023 = vmatpush1.bf16.msra.mxu1 %v4051_v47 }
 0x8bd   :  { %2091 = vmatprep.subr.bf16.mxu0 %v3955_v10  ;;  %2132 = vmatprep.subr.bf16.mxu1 %v3957_v12 }
 0x952   :  { %v1773_v49 = vpop.f32.mrb[36].mxu0  ;;  %v1814_v50 = vpop.f32.mrb[36].mxu1 }
 0x953   :  { %v1775_v51 = vpop.f32.mrb[37].mxu0  ;;  %v1816_v52 = vpop.f32.mrb[37].mxu1  ;;  %v4095_v61 = vadd.f32 %v1773_v49, %v1722_v36  ;;  %v4388_v49 = vsub.s32 3, %v3694_v31  ;;  %v1959_v31 = vrot.slane %v3945_v32, 7 }
 0x954   :  { %v1777_v53 = vpop.f32.mrb[38].mxu0  ;;  %v1818_v54 = vpop.f32.mrb[38].mxu1  ;;  %v4099_v0 = vadd.f32 %v1775_v51, %v1726_v60 }
 0x955   :  { %v1778_v55 = vpop.f32.mrb[39].mxu0  ;;  %v1819_v56 = vpop.f32.mrb[39].mxu1  ;;  %v1734_v58 = vrot.slane %v1717_v57, %v4388_v49 }
 0x956   :  { %v4103_v56 = vadd.f32 %v1814_v50, %v1730_v63 }
 0x972   :  { %v1893_v9 = vpop.f32.mrb[40].mxu0  ;;  %v1934_v13 = vpop.f32.mrb[40].mxu1 }
 0x973   :  { %v1941_v26 = vadd.f32 %v1893_v9, %v4095_v61  ;;  %v1895_v45 = vpop.f32.mrb[41].mxu0  ;;  %v1936_v48 = vpop.f32.mrb[41].mxu1  ;;  %v1943_v60 = vadd.f32 %v1934_v13, %v4103_v56  ;;  %v4108_v9 = vadd.f32 %v1816_v52, %v1734_v58 }
 0x974   :  { %v1942_v53 = vadd.f32 %v1895_v45, %v4099_v0  ;;  %v1897_v54 = vpop.f32.mrb[42].mxu0  ;;  %v1938_v55 = vpop.f32.mrb[42].mxu1 }
 0x975   :  { %v1945_v36 = vmul.f32 0.5, %v1941_v26  ;;  %v1898_v59 = vpop.f32.mrb[43].mxu0  ;;  %v1939_v62 = vpop.f32.mrb[43].mxu1  ;;  %v1944_v45 = vadd.f32 %v1936_v48, %v4108_v9 }
 0x976   :  { %v1949_v51 = vmul.f32 0.5, %v1942_v53 }
 0x977   :  { %3289 = vtanh.f32 %v1945_v36  ;;  %v1954_v54 = vmul.f32 0.5, %v1944_v45 }
 0x978   :  { %3291 = vtanh.f32 %v1949_v51 }
 0x979   :  { %3293 = vtanh.f32 %v1943_v60 }
 0x97a   :  { %3295 = vtanh.f32 %v1954_v54 }
 0x981   :  { %v3290_v55 = vpop.eup %3289 }
 0x982   :  { %v3292_v50 = vpop.eup %3291  ;;  %v1947_v63 = vadd.f32 1.0, %v3290_v55 }
 0x983   :  { %v1951_v7 = vadd.f32 1.0, %v3292_v50  ;;  %v3294_v26 = vpop.eup %3293 }
 0x984   :  { %v1948_v57 = vmul.f32 0.5, %v1947_v63  ;;  %v3296_v52 = vpop.eup %3295 }
 0x985   :  { %v1952_v53 = vmul.f32 0.5, %v1951_v7  ;;  %v1956_v58 = vadd.f32 1.0, %v3296_v52 }
 0x986   :  { %v1962_v49 = vmul.f32 %v3294_v26, %v1948_v57 }
 0x987   :  { %v1961_v36 = vmul.f32 %v1959_v31, %v1952_v53  ;;  %v1957_v48 = vmul.f32 0.5, %v1956_v58 }
 0x989   :  { %v4112_v13 = vadd.f32 %v1962_v49, %v1961_v36 }
 0x98b   :  { %3297 = vtanh.f32 %v4112_v13 }
 0x995   :  { %v3298_v59 = vpop.eup %3297 }
 0x996   :  { %v4115_v62 = vmul.f32 %v3298_v59, %v1957_v48 }
 0x998   :  { %v1966_v51 = vpack.c.bf16 %v4115_v62, %v4115_v62 }
 0x99a   :  { %2000 = vmatmul.mubr.bf16.vlgmr.msra.gmra.mrb[44].mxu0 %v1966_v51  ;;  %2041 = vmatmul.mubr.bf16.vlgmr.msra.gmra.mrb[44].mxu1 %v1966_v51 }
 0x99b   :  { %2092 = vmatpush1.bf16.msra.mxu0 %v3961_v14  ;;  %2133 = vmatpush1.bf16.msra.mxu1 %v3963_v15 }
 0x99c   :  { %2093 = vmatprep.subr.bf16.mxu0 %v3965_v16  ;;  %2134 = vmatprep.subr.bf16.mxu1 %v3967_v17 }
 0x99d   :  { %2123 = vmatprep.mubr.bf16.mxu0 %v4384_v8  ;;  %2164 = vmatprep.mubr.bf16.mxu1 %v4384_v8 }
 0x99f   :  { %2094 = vmatpush1.bf16.msra.mxu0 %v3973_v18  ;;  %2135 = vmatpush1.bf16.msra.mxu1 %v3975_v38 }
 0x9a0   :  { %2095 = vmatprep.subr.bf16.mxu0 %v3977_v19  ;;  %2136 = vmatprep.subr.bf16.mxu1 %v3979_v20 }
 0x9a3   :  { %2096 = vmatpush1.bf16.msra.mxu0 %v3987_v21  ;;  %2137 = vmatpush1.bf16.msra.mxu1 %v3989_v41 }
 0x9a4   :  { %2097 = vmatprep.subr.bf16.mxu0 %v3991_v28  ;;  %2138 = vmatprep.subr.bf16.mxu1 %v3993_v39 }
 0x9a7   :  { %2098 = vmatpush1.bf16.msra.mxu0 %v3999_v30  ;;  %2139 = vmatpush1.bf16.msra.mxu1 %v4001_v22 }
 0x9a8   :  { %2099 = vmatprep.subr.bf16.mxu0 %v4003_v27  ;;  %2140 = vmatprep.subr.bf16.mxu1 %v4005_v42 }
 0x9ab   :  { %2100 = vmatpush1.bf16.msra.mxu0 %v4011_v46  ;;  %2141 = vmatpush1.bf16.msra.mxu1 %v4013_v25 }
 0x9ac   :  { %2101 = vmatprep.subr.bf16.mxu0 %v4015_v35  ;;  %2142 = vmatprep.subr.bf16.mxu1 %v4017_v43 }
 0x9af   :  { %2102 = vmatpush1.bf16.msra.mxu0 %v4023_v37  ;;  %2143 = vmatpush1.bf16.msra.mxu1 %v4025_v29 }
 0x9b0   :  { %2103 = vmatprep.subr.bf16.mxu0 %v4027_v34  ;;  %2144 = vmatprep.subr.bf16.mxu1 %v4029_v40 }
 0x9b3   :  { %2104 = vmatpush1.bf16.msra.mxu0 %v4037_v23  ;;  %2145 = vmatpush1.bf16.msra.mxu1 %v4039_v11 }
 0x9b4   :  { %2105 = vmatprep.subr.bf16.mxu0 %v4041_v33  ;;  %2146 = vmatprep.subr.bf16.mxu1 %v4043_v44 }
 0x9b7   :  { %2106 = vmatpush1.bf16.msra.mxu0 %v4049_v24  ;;  %2147 = vmatpush1.bf16.msra.mxu1 %v4051_v47 }
 0x9b8   :  { %2214 = vmatprep.subr.bf16.mxu0 %v3955_v10  ;;  %2255 = vmatprep.subr.bf16.mxu1 %v3957_v12 }
 0xa6d   :  { %v2001_v7 = vpop.f32.mrb[44].mxu0  ;;  %v2042_v32 = vpop.f32.mrb[44].mxu1 }
 0xa6e   :  { %v2053_v60 = vrot.slane %v2001_v7, 7  ;;  %v2003_v45 = vpop.f32.mrb[45].mxu0  ;;  %v2044_v54 = vpop.f32.mrb[45].mxu1  ;;  %v2055_v57 = vrot.slane %v2042_v32, 7 }
 0xa6f   :  { %v2054_v55 = vrot.slane %v2003_v45, 7  ;;  %v2005_v50 = vpop.f32.mrb[46].mxu0  ;;  %v2046_v63 = vpop.f32.mrb[46].mxu1  ;;  %v2056_v48 = vrot.slane %v2044_v54, 7 }
 0xa70   :  { %v2061_v31 = vadd.f32 %v2053_v60, %v4095_v61  ;;  %v2006_v26 = vpop.f32.mrb[47].mxu0  ;;  %v2047_v53 = vpop.f32.mrb[47].mxu1  ;;  %v2063_v58 = vadd.f32 %v2055_v57, %v4103_v56 }
 0xa71   :  { %v2062_v49 = vadd.f32 %v2054_v55, %v4099_v0  ;;  %v2064_v59 = vadd.f32 %v2056_v48, %v4108_v9  ;;  %v2079_v55 = vrot.slane %v4112_v13, 7 }
 0xa72   :  { %v2065_v36 = vmul.f32 0.5, %v2061_v31 }
 0xa73   :  { %v2069_v52 = vmul.f32 0.5, %v2062_v49  ;;  %v2074_v51 = vmul.f32 0.5, %v2064_v59 }
 0xa74   :  { %3299 = vtanh.f32 %v2065_v36 }
 0xa75   :  { %3301 = vtanh.f32 %v2069_v52 }
 0xa76   :  { %3303 = vtanh.f32 %v2063_v58 }
 0xa77   :  { %3305 = vtanh.f32 %v2074_v51 }
 0xa7e   :  { %v3300_v7 = vpop.eup %3299 }
 0xa7f   :  { %v3302_v45 = vpop.eup %3301  ;;  %v2067_v50 = vadd.f32 1.0, %v3300_v7 }
 0xa80   :  { %v2071_v60 = vadd.f32 1.0, %v3302_v45  ;;  %v3304_v63 = vpop.eup %3303 }
 0xa81   :  { %v2068_v32 = vmul.f32 0.5, %v2067_v50  ;;  %v3306_v54 = vpop.eup %3305 }
 0xa82   :  { %v2072_v26 = vmul.f32 0.5, %v2071_v60  ;;  %v2076_v57 = vadd.f32 1.0, %v3306_v54 }
 0xa83   :  { %v2082_v31 = vmul.f32 %v3304_v63, %v2068_v32 }
 0xa84   :  { %v2081_v53 = vmul.f32 %v2079_v55, %v2072_v26  ;;  %v2077_v36 = vmul.f32 0.5, %v2076_v57 }
 0xa86   :  { %v4158_v49 = vadd.f32 %v2082_v31, %v2081_v53 }
 0xa88   :  { %3307 = vtanh.f32 %v4158_v49 }
 0xa92   :  { %v3308_v52 = vpop.eup %3307 }
 0xa93   :  { %v4161_v58 = vmul.f32 %v3308_v52, %v2077_v36 }
 0xa95   :  { %v2086_v48 = vpack.c.bf16 %v4161_v58, %v4161_v58 }
 0xa97   :  { %v2088_v59 = vshrl.u32 %v2086_v48, 16 }
 0xa99   :  { %2124 = vmatmul.mubr.bf16.vlgmr.msra.gmra.mrb[48].mxu0 %v2088_v59  ;;  %2165 = vmatmul.mubr.bf16.vlgmr.msra.gmra.mrb[48].mxu1 %v2088_v59 }
 0xa9a   :  { %2215 = vmatpush1.bf16.msra.mxu0 %v3961_v14  ;;  %2256 = vmatpush1.bf16.msra.mxu1 %v3963_v15 }
 0xa9b   :  { %2216 = vmatprep.subr.bf16.mxu0 %v3965_v16  ;;  %2257 = vmatprep.subr.bf16.mxu1 %v3967_v17 }
 0xa9c   :  { %2246 = vmatprep.mubr.bf16.mxu0 %v4384_v8  ;;  %2287 = vmatprep.mubr.bf16.mxu1 %v4384_v8 }
 0xa9e   :  { %2217 = vmatpush1.bf16.msra.mxu0 %v3973_v18  ;;  %2258 = vmatpush1.bf16.msra.mxu1 %v3975_v38 }
 0xa9f   :  { %2218 = vmatprep.subr.bf16.mxu0 %v3977_v19  ;;  %2259 = vmatprep.subr.bf16.mxu1 %v3979_v20 }
 0xaa2   :  { %2219 = vmatpush1.bf16.msra.mxu0 %v3987_v21  ;;  %2260 = vmatpush1.bf16.msra.mxu1 %v3989_v41 }
 0xaa3   :  { %2220 = vmatprep.subr.bf16.mxu0 %v3991_v28  ;;  %2261 = vmatprep.subr.bf16.mxu1 %v3993_v39 }
 0xaa6   :  { %2221 = vmatpush1.bf16.msra.mxu0 %v3999_v30  ;;  %2262 = vmatpush1.bf16.msra.mxu1 %v4001_v22 }
 0xaa7   :  { %2222 = vmatprep.subr.bf16.mxu0 %v4003_v27  ;;  %2263 = vmatprep.subr.bf16.mxu1 %v4005_v42 }
 0xaaa   :  { %2223 = vmatpush1.bf16.msra.mxu0 %v4011_v46  ;;  %2264 = vmatpush1.bf16.msra.mxu1 %v4013_v25 }
 0xaab   :  { %2224 = vmatprep.subr.bf16.mxu0 %v4015_v35  ;;  %2265 = vmatprep.subr.bf16.mxu1 %v4017_v43 }
 0xaae   :  { %2225 = vmatpush1.bf16.msra.mxu0 %v4023_v37  ;;  %2266 = vmatpush1.bf16.msra.mxu1 %v4025_v29 }
 0xaaf   :  { %2226 = vmatprep.subr.bf16.mxu0 %v4027_v34  ;;  %2267 = vmatprep.subr.bf16.mxu1 %v4029_v40 }
 0xab2   :  { %2227 = vmatpush1.bf16.msra.mxu0 %v4037_v23  ;;  %2268 = vmatpush1.bf16.msra.mxu1 %v4039_v11 }
 0xab3   :  { %2228 = vmatprep.subr.bf16.mxu0 %v4041_v33  ;;  %2269 = vmatprep.subr.bf16.mxu1 %v4043_v44 }
 0xab6   :  { %2229 = vmatpush1.bf16.msra.mxu0 %v4049_v24  ;;  %2270 = vmatpush1.bf16.msra.mxu1 %v4051_v47 }
 0xab7   :  { %2339 = vmatprep.subr.bf16.mxu0 %v3955_v10  ;;  %2380 = vmatprep.subr.bf16.mxu1 %v3957_v12 }
 0xb6c   :  { %v2125_v13 = vpop.f32.mrb[48].mxu0  ;;  %v2166_v51 = vpop.f32.mrb[48].mxu1 }
 0xb6d   :  { %v2177_v7 = vrot.slane %v2125_v13, 6  ;;  %v2127_v45 = vpop.f32.mrb[49].mxu0  ;;  %v2168_v50 = vpop.f32.mrb[49].mxu1  ;;  %v2179_v55 = vrot.slane %v2166_v51, 6 }
 0xb6e   :  { %v2178_v60 = vrot.slane %v2127_v45, 6  ;;  %v2129_v32 = vpop.f32.mrb[50].mxu0  ;;  %v2170_v63 = vpop.f32.mrb[50].mxu1  ;;  %v2180_v48 = vrot.slane %v2168_v50, 6 }
 0xb6f   :  { %v2185_v26 = vadd.f32 %v2177_v7, %v4095_v61  ;;  %v2130_v31 = vpop.f32.mrb[51].mxu0  ;;  %v2171_v53 = vpop.f32.mrb[51].mxu1  ;;  %v2187_v52 = vadd.f32 %v2179_v55, %v4103_v56 }
 0xb70   :  { %v2186_v54 = vadd.f32 %v2178_v60, %v4099_v0  ;;  %v2188_v59 = vadd.f32 %v2180_v48, %v4108_v9  ;;  %v2203_v60 = vrot.slane %v4158_v49, 7 }
 0xb71   :  { %v2189_v57 = vmul.f32 0.5, %v2185_v26 }
 0xb72   :  { %v2193_v36 = vmul.f32 0.5, %v2186_v54  ;;  %v2198_v13 = vmul.f32 0.5, %v2188_v59  ;;  %v2830_v59 = vsel %vm2829_vm0, %v4115_v62, %v4161_v58 }
 0xb73   :  { %3309 = vtanh.f32 %v2189_v57 }
 0xb74   :  { %3311 = vtanh.f32 %v2193_v36 }
 0xb75   :  { %3313 = vtanh.f32 %v2187_v52 }
 0xb76   :  { %3315 = vtanh.f32 %v2198_v13 }
 0xb7d   :  { %v3310_v45 = vpop.eup %3309 }
 0xb7e   :  { %v3312_v32 = vpop.eup %3311  ;;  %v2191_v63 = vadd.f32 1.0, %v3310_v45 }
 0xb7f   :  { %v2195_v7 = vadd.f32 1.0, %v3312_v32  ;;  %v3314_v31 = vpop.eup %3313 }
 0xb80   :  { %v2192_v51 = vmul.f32 0.5, %v2191_v63  ;;  %v3316_v50 = vpop.eup %3315 }
 0xb81   :  { %v2196_v53 = vmul.f32 0.5, %v2195_v7  ;;  %v2200_v55 = vadd.f32 1.0, %v3316_v50 }
 0xb82   :  { %v2206_v26 = vmul.f32 %v3314_v31, %v2192_v51 }
 0xb83   :  { %v2205_v54 = vmul.f32 %v2203_v60, %v2196_v53  ;;  %v2201_v36 = vmul.f32 0.5, %v2200_v55 }
 0xb85   :  { %v4204_v57 = vadd.f32 %v2206_v26, %v2205_v54 }
 0xb87   :  { %3317 = vtanh.f32 %v4204_v57 }
 0xb91   :  { %v3318_v52 = vpop.eup %3317 }
 0xb92   :  { %v2209_v48 = vmul.f32 %v3318_v52, %v2201_v36 }
 0xb94   :  { %v4209_v13 = vsel %vm2831_vm1, %v2830_v59, %v2209_v48  ;;  %v2210_v45 = vpack.c.bf16 %v2209_v48, %v2209_v48 }
 0xb96   :  { %v2212_v49 = vrot.slane %v2210_v45, 1 }
 0xb98   :  { %2247 = vmatmul.mubr.bf16.vlgmr.msra.gmra.mrb[52].mxu0 %v2212_v49  ;;  %2288 = vmatmul.mubr.bf16.vlgmr.msra.gmra.mrb[52].mxu1 %v2212_v49 }
 0xb99   :  { %2340 = vmatpush1.bf16.msra.mxu0 %v3961_v14  ;;  %2381 = vmatpush1.bf16.msra.mxu1 %v3963_v15 }
 0xb9a   :  { %2341 = vmatprep.subr.bf16.mxu0 %v3965_v16  ;;  %2382 = vmatprep.subr.bf16.mxu1 %v3967_v17 }
 0xb9b   :  { %2371 = vmatprep.mubr.bf16.mxu0 %v4384_v8  ;;  %2412 = vmatprep.mubr.bf16.mxu1 %v4384_v8 }
 0xb9d   :  { %2342 = vmatpush1.bf16.msra.mxu0 %v3973_v18  ;;  %2383 = vmatpush1.bf16.msra.mxu1 %v3975_v38 }
 0xb9e   :  { %2343 = vmatprep.subr.bf16.mxu0 %v3977_v19  ;;  %2384 = vmatprep.subr.bf16.mxu1 %v3979_v20 }
 0xba1   :  { %2344 = vmatpush1.bf16.msra.mxu0 %v3987_v21  ;;  %2385 = vmatpush1.bf16.msra.mxu1 %v3989_v41 }
 0xba2   :  { %2345 = vmatprep.subr.bf16.mxu0 %v3991_v28  ;;  %2386 = vmatprep.subr.bf16.mxu1 %v3993_v39 }
 0xba5   :  { %2346 = vmatpush1.bf16.msra.mxu0 %v3999_v30  ;;  %2387 = vmatpush1.bf16.msra.mxu1 %v4001_v22 }
 0xba6   :  { %2347 = vmatprep.subr.bf16.mxu0 %v4003_v27  ;;  %2388 = vmatprep.subr.bf16.mxu1 %v4005_v42 }
 0xba9   :  { %2348 = vmatpush1.bf16.msra.mxu0 %v4011_v46  ;;  %2389 = vmatpush1.bf16.msra.mxu1 %v4013_v25 }
 0xbaa   :  { %2349 = vmatprep.subr.bf16.mxu0 %v4015_v35  ;;  %2390 = vmatprep.subr.bf16.mxu1 %v4017_v43 }
 0xbad   :  { %2350 = vmatpush1.bf16.msra.mxu0 %v4023_v37  ;;  %2391 = vmatpush1.bf16.msra.mxu1 %v4025_v29 }
 0xbae   :  { %2351 = vmatprep.subr.bf16.mxu0 %v4027_v34  ;;  %2392 = vmatprep.subr.bf16.mxu1 %v4029_v40 }
 0xbb1   :  { %2352 = vmatpush1.bf16.msra.mxu0 %v4037_v23  ;;  %2393 = vmatpush1.bf16.msra.mxu1 %v4039_v11 }
 0xbb2   :  { %2353 = vmatprep.subr.bf16.mxu0 %v4041_v33  ;;  %2394 = vmatprep.subr.bf16.mxu1 %v4043_v44 }
 0xbb5   :  { %2354 = vmatpush1.bf16.msra.mxu0 %v4049_v24  ;;  %2395 = vmatpush1.bf16.msra.mxu1 %v4051_v47 }
 0xbb6   :  { %2462 = vmatprep.subr.bf16.mxu0 %v3955_v10  ;;  %2503 = vmatprep.subr.bf16.mxu1 %v3957_v12 }
 0xc6b   :  { %v2248_v62 = vpop.f32.mrb[52].mxu0  ;;  %v2289_v58 = vpop.f32.mrb[52].mxu1 }
 0xc6c   :  { %v2300_v32 = vrot.slane %v2248_v62, 5  ;;  %v2250_v63 = vpop.f32.mrb[53].mxu0  ;;  %v2291_v7 = vpop.f32.mrb[53].mxu1  ;;  %v2302_v26 = vrot.slane %v2289_v58, 5 }
 0xc6d   :  { %v2301_v51 = vrot.slane %v2250_v63, 5  ;;  %v2252_v31 = vpop.f32.mrb[54].mxu0  ;;  %v2293_v53 = vpop.f32.mrb[54].mxu1  ;;  %v2303_v59 = vrot.slane %v2291_v7, 5 }
 0xc6e   :  { %v2308_v60 = vadd.f32 %v2300_v32, %v4095_v61  ;;  %v2253_v54 = vpop.f32.mrb[55].mxu0  ;;  %v2294_v50 = vpop.f32.mrb[55].mxu1  ;;  %v2310_v48 = vadd.f32 %v2302_v26, %v4103_v56 }
 0xc6f   :  { %v2309_v55 = vadd.f32 %v2301_v51, %v4099_v0  ;;  %v2311_v45 = vadd.f32 %v2303_v59, %v4108_v9  ;;  %v2326_v51 = vrot.slane %v4204_v57, 7 }
 0xc70   :  { %v2312_v36 = vmul.f32 0.5, %v2308_v60 }
 0xc71   :  { %v2316_v52 = vmul.f32 0.5, %v2309_v55  ;;  %v2321_v49 = vmul.f32 0.5, %v2311_v45 }
 0xc72   :  { %3319 = vtanh.f32 %v2312_v36 }
 0xc73   :  { %3321 = vtanh.f32 %v2316_v52 }
 0xc74   :  { %3323 = vtanh.f32 %v2310_v48 }
 0xc75   :  { %3325 = vtanh.f32 %v2321_v49 }
 0xc7c   :  { %v3320_v62 = vpop.eup %3319 }
 0xc7d   :  { %v3322_v63 = vpop.eup %3321  ;;  %v2314_v31 = vadd.f32 1.0, %v3320_v62 }
 0xc7e   :  { %v2318_v32 = vadd.f32 1.0, %v3322_v63  ;;  %v3324_v53 = vpop.eup %3323 }
 0xc7f   :  { %v2315_v58 = vmul.f32 0.5, %v2314_v31  ;;  %v3326_v7 = vpop.eup %3325 }
 0xc80   :  { %v2319_v54 = vmul.f32 0.5, %v2318_v32  ;;  %v2323_v26 = vadd.f32 1.0, %v3326_v7 }
 0xc81   :  { %v2329_v60 = vmul.f32 %v3324_v53, %v2315_v58 }
 0xc82   :  { %v2328_v50 = vmul.f32 %v2326_v51, %v2319_v54  ;;  %v2324_v36 = vmul.f32 0.5, %v2323_v26 }
 0xc84   :  { %v4250_v55 = vadd.f32 %v2329_v60, %v2328_v50 }
 0xc86   :  { %3327 = vtanh.f32 %v4250_v55 }
 0xc90   :  { %v3328_v52 = vpop.eup %3327 }
 0xc91   :  { %v2332_v48 = vmul.f32 %v3328_v52, %v2324_v36 }
 0xc93   :  { %v4254_v59 = vsel %vm2833_vm2, %v4209_v13, %v2332_v48  ;;  %v2333_v45 = vpack.c.bf16 %v2332_v48, %v2332_v48 }
 0xc95   :  { %v2335_v49 = vshrl.u32 %v2333_v45, 16 }
 0xc97   :  { %v2337_v62 = vrot.slane %v2335_v49, 1 }
 0xc99   :  { %2372 = vmatmul.mubr.bf16.vlgmr.msra.gmra.mrb[56].mxu0 %v2337_v62  ;;  %2413 = vmatmul.mubr.bf16.vlgmr.msra.gmra.mrb[56].mxu1 %v2337_v62 }
 0xc9a   :  { %2463 = vmatpush1.bf16.msra.mxu0 %v3961_v14  ;;  %2504 = vmatpush1.bf16.msra.mxu1 %v3963_v15 }
 0xc9b   :  { %2464 = vmatprep.subr.bf16.mxu0 %v3965_v16  ;;  %2505 = vmatprep.subr.bf16.mxu1 %v3967_v17 }
 0xc9c   :  { %2494 = vmatprep.mubr.bf16.mxu0 %v4384_v8  ;;  %2535 = vmatprep.mubr.bf16.mxu1 %v4384_v8 }
 0xc9e   :  { %2465 = vmatpush1.bf16.msra.mxu0 %v3973_v18  ;;  %2506 = vmatpush1.bf16.msra.mxu1 %v3975_v38 }
 0xc9f   :  { %2466 = vmatprep.subr.bf16.mxu0 %v3977_v19  ;;  %2507 = vmatprep.subr.bf16.mxu1 %v3979_v20 }
 0xca2   :  { %2467 = vmatpush1.bf16.msra.mxu0 %v3987_v21  ;;  %2508 = vmatpush1.bf16.msra.mxu1 %v3989_v41 }
 0xca3   :  { %2468 = vmatprep.subr.bf16.mxu0 %v3991_v28  ;;  %2509 = vmatprep.subr.bf16.mxu1 %v3993_v39 }
 0xca6   :  { %2469 = vmatpush1.bf16.msra.mxu0 %v3999_v30  ;;  %2510 = vmatpush1.bf16.msra.mxu1 %v4001_v22 }
 0xca7   :  { %2470 = vmatprep.subr.bf16.mxu0 %v4003_v27  ;;  %2511 = vmatprep.subr.bf16.mxu1 %v4005_v42 }
 0xcaa   :  { %2471 = vmatpush1.bf16.msra.mxu0 %v4011_v46  ;;  %2512 = vmatpush1.bf16.msra.mxu1 %v4013_v25 }
 0xcab   :  { %2472 = vmatprep.subr.bf16.mxu0 %v4015_v35  ;;  %2513 = vmatprep.subr.bf16.mxu1 %v4017_v43 }
 0xcae   :  { %2473 = vmatpush1.bf16.msra.mxu0 %v4023_v37  ;;  %2514 = vmatpush1.bf16.msra.mxu1 %v4025_v29 }
 0xcaf   :  { %2474 = vmatprep.subr.bf16.mxu0 %v4027_v34  ;;  %2515 = vmatprep.subr.bf16.mxu1 %v4029_v40 }
 0xcb2   :  { %2475 = vmatpush1.bf16.msra.mxu0 %v4037_v23  ;;  %2516 = vmatpush1.bf16.msra.mxu1 %v4039_v11 }
 0xcb3   :  { %2476 = vmatprep.subr.bf16.mxu0 %v4041_v33  ;;  %2517 = vmatprep.subr.bf16.mxu1 %v4043_v44 }
 0xcb6   :  { %2477 = vmatpush1.bf16.msra.mxu0 %v4049_v24  ;;  %2518 = vmatpush1.bf16.msra.mxu1 %v4051_v47 }
 0xcb7   :  { %2587 = vmatprep.subr.bf16.mxu0 %v3955_v10  ;;  %2628 = vmatprep.subr.bf16.mxu1 %v3957_v12 }
 0xd6c   :  { %v2373_v57 = vpop.f32.mrb[56].mxu0  ;;  %v2414_v13 = vpop.f32.mrb[56].mxu1 }
 0xd6d   :  { %v2425_v63 = vrot.slane %v2373_v57, 4  ;;  %v2375_v31 = vpop.f32.mrb[57].mxu0  ;;  %v2416_v32 = vpop.f32.mrb[57].mxu1  ;;  %v2427_v60 = vrot.slane %v2414_v13, 4 }
 0xd6e   :  { %v2426_v58 = vrot.slane %v2375_v31, 4  ;;  %v2377_v53 = vpop.f32.mrb[58].mxu0  ;;  %v2418_v54 = vpop.f32.mrb[58].mxu1  ;;  %v2428_v12 = vrot.slane %v2416_v32, 4 }
 0xd6f   :  { %v2433_v51 = vadd.f32 %v2425_v63, %v4095_v61  ;;  %v2378_v50 = vpop.f32.mrb[59].mxu0  ;;  %v2419_v7 = vpop.f32.mrb[59].mxu1  ;;  %v2435_v10 = vadd.f32 %v2427_v60, %v4103_v56 }
 0xd70   :  { %v2434_v26 = vadd.f32 %v2426_v58, %v4099_v0  ;;  %v2436_v48 = vadd.f32 %v2428_v12, %v4108_v9  ;;  %v2451_v58 = vrot.slane %v4250_v55, 7 }
 0xd71   :  { %v2437_v36 = vmul.f32 0.5, %v2433_v51 }
 0xd72   :  { %v2441_v52 = vmul.f32 0.5, %v2434_v26  ;;  %v2446_v45 = vmul.f32 0.5, %v2436_v48 }
 0xd73   :  { %3329 = vtanh.f32 %v2437_v36 }
 0xd74   :  { %3331 = vtanh.f32 %v2441_v52 }
 0xd75   :  { %3333 = vtanh.f32 %v2435_v10 }
 0xd76   :  { %3335 = vtanh.f32 %v2446_v45 }
 0xd7d   :  { %v3330_v49 = vpop.eup %3329 }
 0xd7e   :  { %v3332_v62 = vpop.eup %3331  ;;  %v2439_v57 = vadd.f32 1.0, %v3330_v49 }
 0xd7f   :  { %v2443_v63 = vadd.f32 1.0, %v3332_v62  ;;  %v3334_v31 = vpop.eup %3333 }
 0xd80   :  { %v2440_v13 = vmul.f32 0.5, %v2439_v57  ;;  %v3336_v32 = vpop.eup %3335 }
 0xd81   :  { %v2444_v53 = vmul.f32 0.5, %v2443_v63  ;;  %v2448_v60 = vadd.f32 1.0, %v3336_v32  ;;  %v3375_v32 = vld [vmem:[#allocation2 + $0x120] sm:$0xff] }
 0xd82   :  { %v2454_v54 = vmul.f32 %v3334_v31, %v2440_v13 }
 0xd83   :  { %v2453_v51 = vmul.f32 %v2451_v58, %v2444_v53  ;;  %v2449_v7 = vmul.f32 0.5, %v2448_v60  ;;  %v3371_v58 = vld [vmem:[#allocation2 + $0x100] sm:$0xff]  ;;  %v3376_v60 = vld [vmem:[#allocation2 + $0x130] sm:$0xff] }
 0xd85   :  { %v4295_v50 = vadd.f32 %v2454_v54, %v2453_v51  ;;  %v3372_v54 = vld [vmem:[#allocation2 + $0x110] sm:$0xff]  ;;  %v3373_v51 = vld [vmem:[#allocation2 + $0x128] sm:$0xff] }
 0xd87   :  { %3337 = vtanh.f32 %v4295_v50 }
 0xd91   :  { %v3338_v26 = vpop.eup %3337 }
 0xd92   :  { %v2457_v36 = vmul.f32 %v3338_v26, %v2449_v7  ;;  %v3377_v7 = vld [vmem:[#allocation2 + $0x148] sm:$0xff]  ;;  %v3378_v26 = vld [vmem:[#allocation2 + $0x158] sm:$0xff] }
 0xd94   :  { %v4299_v52 = vsel %vm2835_vm3, %v4254_v59, %v2457_v36  ;;  %v2458_v10 = vpack.c.bf16 %v2457_v36, %v2457_v36  ;;  %v3379_v36 = vld [vmem:[#allocation2 + $0x140] sm:$0xff] }
 0xd96   :  { %v2460_v12 = vrot.slane %v2458_v10, 2  ;;  %v3381_v10 = vld [vmem:[#allocation2 + $0x168] sm:$0xff] }
 0xd98   :  { %2495 = vmatmul.mubr.bf16.vlgmr.msra.gmra.mrb[60].mxu0 %v2460_v12  ;;  %2536 = vmatmul.mubr.bf16.vlgmr.msra.gmra.mrb[60].mxu1 %v2460_v12  ;;  %v3382_v12 = vld [vmem:[#allocation2 + $0x178] sm:$0xff] }
 0xd99   :  { %2588 = vmatpush1.bf16.msra.mxu0 %v3961_v14  ;;  %2629 = vmatpush1.bf16.msra.mxu1 %v3963_v15  ;;  %v3369_v14 = vld [vmem:[#allocation2 + $0x108] sm:$0xff]  ;;  %v3370_v15 = vld [vmem:[#allocation2 + $0x118] sm:$0xff] }
 0xd9a   :  { %2589 = vmatprep.subr.bf16.mxu0 %v3965_v16  ;;  %2630 = vmatprep.subr.bf16.mxu1 %v3967_v17 }
 0xd9b   :  { %2619 = vmatprep.mubr.bf16.mxu0 %v4384_v8  ;;  %2660 = vmatprep.mubr.bf16.mxu1 %v4384_v8 }
 0xd9d   :  { %2590 = vmatpush1.bf16.msra.mxu0 %v3973_v18  ;;  %2631 = vmatpush1.bf16.msra.mxu1 %v3975_v38 }
 0xd9e   :  { %2591 = vmatprep.subr.bf16.mxu0 %v3977_v19  ;;  %2632 = vmatprep.subr.bf16.mxu1 %v3979_v20 }
 0xda1   :  { %2592 = vmatpush1.bf16.msra.mxu0 %v3987_v21  ;;  %2633 = vmatpush1.bf16.msra.mxu1 %v3989_v41 }
 0xda2   :  { %2593 = vmatprep.subr.bf16.mxu0 %v3991_v28  ;;  %2634 = vmatprep.subr.bf16.mxu1 %v3993_v39 }
 0xda5   :  { %2594 = vmatpush1.bf16.msra.mxu0 %v3999_v30  ;;  %2635 = vmatpush1.bf16.msra.mxu1 %v4001_v22 }
 0xda6   :  { %2595 = vmatprep.subr.bf16.mxu0 %v4003_v27  ;;  %2636 = vmatprep.subr.bf16.mxu1 %v4005_v42 }
 0xda9   :  { %2596 = vmatpush1.bf16.msra.mxu0 %v4011_v46  ;;  %2637 = vmatpush1.bf16.msra.mxu1 %v4013_v25 }
 0xdaa   :  { %2597 = vmatprep.subr.bf16.mxu0 %v4015_v35  ;;  %2638 = vmatprep.subr.bf16.mxu1 %v4017_v43 }
 0xdad   :  { %2598 = vmatpush1.bf16.msra.mxu0 %v4023_v37  ;;  %2639 = vmatpush1.bf16.msra.mxu1 %v4025_v29 }
 0xdae   :  { %2599 = vmatprep.subr.bf16.mxu0 %v4027_v34  ;;  %2640 = vmatprep.subr.bf16.mxu1 %v4029_v40 }
 0xdb1   :  { %2600 = vmatpush1.bf16.msra.mxu0 %v4037_v23  ;;  %2641 = vmatpush1.bf16.msra.mxu1 %v4039_v11 }
 0xdb2   :  { %2601 = vmatprep.subr.bf16.mxu0 %v4041_v33  ;;  %2642 = vmatprep.subr.bf16.mxu1 %v4043_v44 }
 0xdb5   :  { %2602 = vmatpush1.bf16.msra.mxu0 %v4049_v24  ;;  %2643 = vmatpush1.bf16.msra.mxu1 %v4051_v47  ;;  %v2574_v24 = vrot.slane %v4295_v50, 7  ;;  %v3374_v50 = vld [vmem:[#allocation2 + $0x138] sm:$0xff] }
 0xdb6   :  { %2710 = vmatprep.subr.bf16.mxu0 %v3369_v14  ;;  %2751 = vmatprep.subr.bf16.mxu1 %v3370_v15  ;;  %v3383_v14 = vld [vmem:[#allocation2 + $0x160] sm:$0xff]  ;;  %v3384_v15 = vld [vmem:[#allocation2 + $0x170] sm:$0xff] }
 0xe6b   :  { %v2496_v16 = vpop.f32.mrb[60].mxu0  ;;  %v2537_v17 = vpop.f32.mrb[60].mxu1 }
 0xe6c   :  { %v2548_v18 = vrot.slane %v2496_v16, 3  ;;  %v2498_v38 = vpop.f32.mrb[61].mxu0  ;;  %v2539_v19 = vpop.f32.mrb[61].mxu1  ;;  %v2550_v39 = vrot.slane %v2537_v17, 3  ;;  %v3386_v16 = vld [vmem:[#allocation2 + $0x198] sm:$0xff]  ;;  %v3387_v17 = vld [vmem:[#allocation2 + $0x180] sm:$0xff] }
 0xe6d   :  { %v2549_v20 = vrot.slane %v2498_v38, 3  ;;  %v2500_v21 = vpop.f32.mrb[62].mxu0  ;;  %v2541_v41 = vpop.f32.mrb[62].mxu1  ;;  %v2551_v35 = vrot.slane %v2539_v19, 3  ;;  %v3389_v38 = vld [vmem:[#allocation2 + $0x1a8] sm:$0xff]  ;;  %v3390_v19 = vld [vmem:[#allocation2 + $0x1b8] sm:$0xff] }
 0xe6e   :  { %v2556_v28 = vadd.f32 %v2548_v18, %v4095_v61  ;;  %v2501_v30 = vpop.f32.mrb[63].mxu0  ;;  %v2542_v22 = vpop.f32.mrb[63].mxu1  ;;  %v2558_v25 = vadd.f32 %v2550_v39, %v4103_v56  ;;  %v3388_v18 = vld [vmem:[#allocation2 + $0x190] sm:$0xff]  ;;  %v3393_v41 = vld [vmem:[#allocation2 + $0x1c8] sm:$0xff]  ;;  %v3395_v39 = vld [vmem:[#allocation2 + $0x1c0] sm:$0xff] }
 0xe6f   :  { %v2557_v27 = vadd.f32 %v2549_v20, %v4099_v0  ;;  %v2559_v43 = vadd.f32 %v2551_v35, %v4108_v9  ;;  %v3391_v20 = vld [vmem:[#allocation2 + $0x1a0] sm:$0xff]  ;;  %v3392_v21 = vld [vmem:[#allocation2 + $0x1b0] sm:$0xff]  ;;  %v3397_v22 = vld [vmem:[#allocation2 + $0x1e8] sm:$0xff] }
 0xe70   :  { %v2560_v42 = vmul.f32 0.5, %v2556_v28  ;;  %v3394_v28 = vld [vmem:[#allocation2 + $0x1d8] sm:$0xff]  ;;  %v3396_v30 = vld [vmem:[#allocation2 + $0x1d0] sm:$0xff] }
 0xe71   :  { %v2564_v46 = vmul.f32 0.5, %v2557_v27  ;;  %v2569_v37 = vmul.f32 0.5, %v2559_v43  ;;  %v3398_v27 = vld [vmem:[#allocation2 + $0x1f8] sm:$0xff] }
 0xe72   :  { %3339 = vtanh.f32 %v2560_v42  ;;  %v3399_v42 = vld [vmem:[#allocation2 + $0x1e0] sm:$0xff] }
 0xe73   :  { %3341 = vtanh.f32 %v2564_v46  ;;  %v3400_v46 = vld [vmem:[#allocation2 + $0x1f0] sm:$0xff] }
 0xe74   :  { %3343 = vtanh.f32 %v2558_v25 }
 0xe75   :  { %3345 = vtanh.f32 %v2569_v37 }
 0xe7c   :  { %v3340_v29 = vpop.eup %3339 }
 0xe7d   :  { %v3342_v34 = vpop.eup %3341  ;;  %v2562_v40 = vadd.f32 1.0, %v3340_v29 }
 0xe7e   :  { %v2566_v23 = vadd.f32 1.0, %v3342_v34  ;;  %v3344_v33 = vpop.eup %3343 }
 0xe7f   :  { %v2563_v11 = vmul.f32 0.5, %v2562_v40  ;;  %v3346_v48 = vpop.eup %3345 }
 0xe80   :  { %v2567_v44 = vmul.f32 0.5, %v2566_v23  ;;  %v2571_v45 = vadd.f32 1.0, %v3346_v48 }
 0xe81   :  { %v2577_v47 = vmul.f32 %v3344_v33, %v2563_v11 }
 0xe82   :  { %v2576_v55 = vmul.f32 %v2574_v24, %v2567_v44  ;;  %v2572_v49 = vmul.f32 0.5, %v2571_v45 }
 0xe84   :  { %v4338_v59 = vadd.f32 %v2577_v47, %v2576_v55 }
 0xe86   :  { %3347 = vtanh.f32 %v4338_v59 }
 0xe90   :  { %v3348_v62 = vpop.eup %3347 }
 0xe91   :  { %v2580_v57 = vmul.f32 %v3348_v62, %v2572_v49 }
 0xe93   :  { %v4342_v63 = vsel %vm2837_vm4, %v4299_v52, %v2580_v57  ;;  %v2581_v13 = vpack.c.bf16 %v2580_v57, %v2580_v57  ;;  %v3380_v52 = vld [vmem:[#allocation2 + $0x150] sm:$0xff] }
 0xe95   :  { %v2583_v31 = vshrl.u32 %v2581_v13, 16 }
 0xe97   :  { %v2585_v53 = vrot.slane %v2583_v31, 2 }
 0xe99   :  { %2620 = vmatmul.mubr.bf16.vlgmr.msra.gmra.mrb[64].mxu0 %v2585_v53  ;;  %2661 = vmatmul.mubr.bf16.vlgmr.msra.gmra.mrb[64].mxu1 %v2585_v53 }
 0xe9a   :  { %2711 = vmatpush1.bf16.msra.mxu0 %v3371_v58  ;;  %2752 = vmatpush1.bf16.msra.mxu1 %v3372_v54 }
 0xe9b   :  { %2712 = vmatprep.subr.bf16.mxu0 %v3373_v51  ;;  %2753 = vmatprep.subr.bf16.mxu1 %v3374_v50 }
 0xe9c   :  { %2742 = vmatprep.mubr.bf16.mxu0 %v4384_v8  ;;  %2783 = vmatprep.mubr.bf16.mxu1 %v4384_v8  ;;  %v3385_v8 = vld [vmem:[#allocation2 + $0x188] sm:$0xff] }
 0xe9e   :  { %2713 = vmatpush1.bf16.msra.mxu0 %v3375_v32  ;;  %2754 = vmatpush1.bf16.msra.mxu1 %v3376_v60  ;;  %v2699_v32 = vrot.slane %v4338_v59, 7 }
 0xe9f   :  { %2714 = vmatprep.subr.bf16.mxu0 %v3377_v7  ;;  %2755 = vmatprep.subr.bf16.mxu1 %v3378_v26 }
 0xea2   :  { %2715 = vmatpush1.bf16.msra.mxu0 %v3379_v36  ;;  %2756 = vmatpush1.bf16.msra.mxu1 %v3380_v52 }
 0xea3   :  { %2716 = vmatprep.subr.bf16.mxu0 %v3381_v10  ;;  %2757 = vmatprep.subr.bf16.mxu1 %v3382_v12 }
 0xea6   :  { %2717 = vmatpush1.bf16.msra.mxu0 %v3383_v14  ;;  %2758 = vmatpush1.bf16.msra.mxu1 %v3384_v15 }
 0xea7   :  { %2718 = vmatprep.subr.bf16.mxu0 %v3385_v8  ;;  %2759 = vmatprep.subr.bf16.mxu1 %v3386_v16 }
 0xeaa   :  { %2719 = vmatpush1.bf16.msra.mxu0 %v3387_v17  ;;  %2760 = vmatpush1.bf16.msra.mxu1 %v3388_v18 }
 0xeab   :  { %2720 = vmatprep.subr.bf16.mxu0 %v3389_v38  ;;  %2761 = vmatprep.subr.bf16.mxu1 %v3390_v19 }
 0xeae   :  { %2721 = vmatpush1.bf16.msra.mxu0 %v3391_v20  ;;  %2762 = vmatpush1.bf16.msra.mxu1 %v3392_v21 }
 0xeaf   :  { %2722 = vmatprep.subr.bf16.mxu0 %v3393_v41  ;;  %2763 = vmatprep.subr.bf16.mxu1 %v3394_v28 }
 0xeb2   :  { %2723 = vmatpush1.bf16.msra.mxu0 %v3395_v39  ;;  %2764 = vmatpush1.bf16.msra.mxu1 %v3396_v30 }
 0xeb3   :  { %2724 = vmatprep.subr.bf16.mxu0 %v3397_v22  ;;  %2765 = vmatprep.subr.bf16.mxu1 %v3398_v27 }
 0xeb6   :  { %2725 = vmatpush1.bf16.msra.mxu0 %v3399_v42  ;;  %2766 = vmatpush1.bf16.msra.mxu1 %v3400_v46 }
 0xf6c   :  { %v2621_v25 = vpop.f32.mrb[64].mxu0  ;;  %v2662_v35 = vpop.f32.mrb[64].mxu1 }
 0xf6d   :  { %v2673_v43 = vrot.slane %v2621_v25, 2  ;;  %v2623_v37 = vpop.f32.mrb[65].mxu0  ;;  %v2664_v29 = vpop.f32.mrb[65].mxu1  ;;  %v2675_v33 = vrot.slane %v2662_v35, 2 }
 0xf6e   :  { %v2674_v34 = vrot.slane %v2623_v37, 2  ;;  %v2625_v40 = vpop.f32.mrb[66].mxu0  ;;  %v2666_v23 = vpop.f32.mrb[66].mxu1  ;;  %v2676_v49 = vrot.slane %v2664_v29, 2 }
 0xf6f   :  { %v2681_v11 = vadd.f32 %v2673_v43, %v4095_v61  ;;  %v2626_v44 = vpop.f32.mrb[67].mxu0  ;;  %v2667_v24 = vpop.f32.mrb[67].mxu1  ;;  %v2683_v45 = vadd.f32 %v2675_v33, %v4103_v56 }
 0xf70   :  { %v2682_v47 = vadd.f32 %v2674_v34, %v4099_v0  ;;  %v2684_v62 = vadd.f32 %v2676_v49, %v4108_v9 }
 0xf71   :  { %v2685_v55 = vmul.f32 0.5, %v2681_v11 }
 0xf72   :  { %v2689_v48 = vmul.f32 0.5, %v2682_v47  ;;  %v2694_v57 = vmul.f32 0.5, %v2684_v62 }
 0xf73   :  { %3349 = vtanh.f32 %v2685_v55 }
 0xf74   :  { %3351 = vtanh.f32 %v2689_v48 }
 0xf75   :  { %3353 = vtanh.f32 %v2683_v45 }
 0xf76   :  { %3355 = vtanh.f32 %v2694_v57 }
 0xf7d   :  { %v3350_v13 = vpop.eup %3349 }
 0xf7e   :  { %v3352_v31 = vpop.eup %3351  ;;  %v2687_v53 = vadd.f32 1.0, %v3350_v13 }
 0xf7f   :  { %v2691_v58 = vadd.f32 1.0, %v3352_v31  ;;  %v3354_v51 = vpop.eup %3353 }
 0xf80   :  { %v2688_v54 = vmul.f32 0.5, %v2687_v53  ;;  %v3356_v36 = vpop.eup %3355 }
 0xf81   :  { %v2692_v50 = vmul.f32 0.5, %v2691_v58  ;;  %v2696_v52 = vadd.f32 1.0, %v3356_v36 }
 0xf82   :  { %v2702_v60 = vmul.f32 %v3354_v51, %v2688_v54 }
 0xf83   :  { %v2701_v7 = vmul.f32 %v2699_v32, %v2692_v50  ;;  %v2697_v10 = vmul.f32 0.5, %v2696_v52 }
 0xf85   :  { %v2703_v26 = vadd.f32 %v2702_v60, %v2701_v7 }
 0xf87   :  { %3357 = vtanh.f32 %v2703_v26 }
 0xf91   :  { %v3358_v12 = vpop.eup %3357 }
 0xf92   :  { %v2705_v14 = vmul.f32 %v3358_v12, %v2697_v10 }
 0xf94   :  { %v2840_v15 = vsel %vm2839_vm5, %v4342_v63, %v2705_v14  ;;  %v2706_v8 = vpack.c.bf16 %v2705_v14, %v2705_v14 }
 0xf96   :  { %v2708_v16 = vrot.slane %v2706_v8, 3 }
 0xf98   :  { %2743 = vmatmul.mubr.bf16.vlgmr.msra.gmra.mrb[68].mxu0 %v2708_v16  ;;  %2784 = vmatmul.mubr.bf16.vlgmr.msra.gmra.mrb[68].mxu1 %v2708_v16 }
0x106b   :  { %v2744_v17 = vpop.f32.mrb[68].mxu0  ;;  %v2785_v18 = vpop.f32.mrb[68].mxu1 }
0x106c   :  { %v2796_v38 = vrot.slane %v2744_v17, 1  ;;  %v2746_v59 = vpop.f32.mrb[69].mxu0  ;;  %v2787_v19 = vpop.f32.mrb[69].mxu1  ;;  %v2798_v39 = vrot.slane %v2785_v18, 1 }
0x106d   :  { %v2797_v20 = vrot.slane %v2746_v59, 1  ;;  %v2748_v21 = vpop.f32.mrb[70].mxu0  ;;  %v2789_v41 = vpop.f32.mrb[70].mxu1  ;;  %v2799_v25 = vrot.slane %v2787_v19, 1 }
0x106e   :  { %v2804_v28 = vadd.f32 %v2796_v38, %v4095_v61  ;;  %v2749_v30 = vpop.f32.mrb[71].mxu0  ;;  %v2790_v22 = vpop.f32.mrb[71].mxu1  ;;  %v2806_v46 = vadd.f32 %v2798_v39, %v4103_v56 }
0x106f   :  { %v2805_v27 = vadd.f32 %v2797_v20, %v4099_v0  ;;  %v2807_v35 = vadd.f32 %v2799_v25, %v4108_v9  ;;  %v2822_v0 = vrot.slane %v2703_v26, 7 }
0x1070   :  { %v2808_v63 = vmul.f32 0.5, %v2804_v28 }
0x1071   :  { %v2812_v42 = vmul.f32 0.5, %v2805_v27  ;;  %v2817_v43 = vmul.f32 0.5, %v2807_v35 }
0x1072   :  { %3359 = vtanh.f32 %v2808_v63 }
0x1073   :  { %3361 = vtanh.f32 %v2812_v42 }
0x1074   :  { %3363 = vtanh.f32 %v2806_v46 }
0x1075   :  { %3365 = vtanh.f32 %v2817_v43 }
0x107c   :  { %v3360_v37 = vpop.eup %3359 }
0x107d   :  { %v3362_v29 = vpop.eup %3361  ;;  %v2810_v34 = vadd.f32 1.0, %v3360_v37 }
0x107e   :  { %v2814_v61 = vadd.f32 1.0, %v3362_v29  ;;  %v3364_v23 = vpop.eup %3363 }
0x107f   :  { %v2811_v40 = vmul.f32 0.5, %v2810_v34  ;;  %v3366_v56 = vpop.eup %3365 }
0x1080   :  { %v2815_v11 = vmul.f32 0.5, %v2814_v61  ;;  %v2819_v47 = vadd.f32 1.0, %v3366_v56 }
0x1081   :  { %v2825_v33 = vmul.f32 %v3364_v23, %v2811_v40 }
0x1082   :  { %v2824_v44 = vmul.f32 %v2822_v0, %v2815_v11  ;;  %v2820_v55 = vmul.f32 0.5, %v2819_v47 }
0x1084   :  { %v2826_v24 = vadd.f32 %v2825_v33, %v2824_v44 }
0x1086   :  { %3367 = vtanh.f32 %v2826_v24 }
0x1090   :  { %v3368_v48 = vpop.eup %3367 }
0x1091   :  { %v2828_v9 = vmul.f32 %v3368_v48, %v2820_v55 }
0x1093   :  { %v2842_v45 = vsel %vm2841_vm6, %v2840_v15, %v2828_v9 }
0x1094   :  { %3429 = dma.done.wait [#allocation6 + $0x2], 1024 }
0x1095   :  { %3430 = vsyncadd [#allocation6 + $0x2], 4294966272 }
0x1096   :  { %3431 = dma.done.wait [#allocation6 + $0x3], 16 }
0x1097   :  { %3432 = vsyncadd [#allocation6 + $0x3], 4294967280  ;;  %v3445_v49 = vmov 0.0   ;;  %vm3446_vm7 = vmmov 0   ;;  %v4389_v62 = vld [vmem:[#allocation19_spill] sm:$0xff]  ;;  %v4390_v57 = vld [vmem:[#allocation20_spill] sm:$0xff] }
0x1098   :  { %3047 = vmatprep.subr.bf16.mxu0 %v3445_v49  ;;  %3063 = vmatprep.mubr.msk.bf16.mxu0 %vm3446_vm7, %v3445_v49 }
0x1099   :  { %3048 = vmatpush3.bf16.msra.mxu0 %v3513_v1  ;;  %v2850_v1 = vpack.c.bf16 %v2842_v45, %v2842_v45 }
0x109a   :  { %3049 = vmatprep.subr.bf16.mxu0 %v3445_v49 }
0x109d   :  { %3050 = vmatpush3.bf16.msra.mxu0 %v3518_v2  ;;  %v3033_v2 = vld [vmem:[#allocation5] ss:$0 sm:$0xff] }
0x109e   :  { %3051 = vmatprep.subr.bf16.mxu0 %v3445_v49 }
0x10a1   :  { %3052 = vmatpush3.bf16.msra.mxu0 %v3523_v3 }
0x10a2   :  { %3053 = vmatprep.subr.bf16.mxu0 %v3445_v49 }
0x10a5   :  { %3054 = vmatpush3.bf16.msra.mxu0 %v3528_v4 }
0x10a6   :  { %3055 = vmatprep.subr.bf16.mxu0 %v3445_v49 }
0x10a9   :  { %3056 = vmatpush3.bf16.msra.mxu0 %v3533_v5 }
0x10aa   :  { %3057 = vmatprep.subr.bf16.mxu0 %v3445_v49 }
0x10ad   :  { %3058 = vmatpush3.bf16.msra.mxu0 %v3538_v6 }
0x10ae   :  { %3059 = vmatprep.subr.bf16.mxu0 %v3445_v49 }
0x10b1   :  { %3060 = vmatpush3.bf16.msra.mxu0 %v4389_v62 }
0x10b2   :  { %3061 = vmatprep.subr.bf16.mxu0 %v3445_v49 }
0x10b5   :  { %3062 = vmatpush3.bf16.msra.mxu0 %v4390_v57 }
0x10b8   :  { %3064 = vmatmul.mubr.bf16.vlgmr.msra.gmra.mrb[72].mxu0 %v2850_v1 }
0x118b   :  { %v2900_v13 = vpop.f32.mrb[72].mxu0 }
0x118c   :  { %v2901_v3 = vadd.f32 %v3033_v2, %v2900_v13  ;;  %v3065_v31 = vpop.f32.mrb[73].mxu0 }
0x118d   :  { %v2903_v53 = vpop.f32.mrb[74].mxu0 }
0x118e   :  { %2906 = vst [vmem:[%s4375_s8] sm:$0xff] %v2901_v3  ;;  %v3066_v4 = vpop.f32.mrb[75].mxu0 }
0x118f   :  { %2911 = vsyncpa [#allocation8], 1 }
0x1190   :  { %2912 = vsyncmov [#allocation6] }
0x1193   :  { %s2913_s30 = vpop.sfrf %2912 }
0x1194   :  { %p3034_p8 = scmp.ne.s32.totalorder %s2913_s30, 0 }
0x1196   :  { %2917 = shalt.err (%p3034_p8)  }
0x1197   :  { %2919 = vsyncmov [#allocation6 + $0x1] }
0x119a   :  { %s2920_s9 = vpop.sfrf %2919 }
0x119b   :  { %p3035_p9 = scmp.ne.s32.totalorder %s2920_s9, 0 }
0x119d   :  { %2924 = shalt.err (%p3035_p9)  }
0x119e   :  { %2926 = vsyncmov [#allocation6 + $0x2] }
0x11a1   :  { %s2927_s10 = vpop.sfrf %2926 }
0x11a2   :  { %p3036_p10 = scmp.ne.s32.totalorder %s2927_s10, 0 }
0x11a4   :  { %2931 = shalt.err (%p3036_p10)  }
0x11a5   :  { %2933 = vsyncmov [#allocation6 + $0x3] }
0x11a8   :  { %s2934_s11 = vpop.sfrf %2933 }
0x11a9   :  { %p3037_p11 = scmp.ne.s32.totalorder %s2934_s11, 0 }
0x11ab   :  { %2938 = shalt.err (%p3037_p11)  }

</bundles_post_ra>
